<compile_context>
chip_gen: v7x
topology: tpu7x:2x2x1
jax: 0.10.0
libtpu: 0.0.40
codegen_flags: <defaults>
</compile_context>

<pallas_src>
import jax
import jax.numpy as jnp
from jax import lax
from jax.experimental import pallas as pl
from jax.experimental.pallas import tpu as pltpu

BN_EPS = 1e-3
_BRANCH_COUT = 192      # every InceptionC branch ends with 192 output channels
_SUBLANE = 8            # sublane tile height: keeps in-kernel W-halo concat aligned

_CONV_ORDER = (
    "branch1x1",
    "branch7x7_1", "branch7x7_2", "branch7x7_3",
    "branch7x7dbl_1", "branch7x7dbl_2", "branch7x7dbl_3",
    "branch7x7dbl_4", "branch7x7dbl_5",
    "branch_pool",
)


def _vmem_limit_bytes():
    """Generation-aware VMEM cap (~3/4 of physical, bounded)."""
    try:
        cap = int(pltpu.get_tpu_info().vmem_capacity_bytes)
    except Exception:
        cap = 64 * 1024 * 1024          # conservative fallback (v7x physical)
    return max(32 * 1024 * 1024, min(cap * 3 // 4, 96 * 1024 * 1024))


# ----------------------------- in-kernel conv stages -----------------------------

def _conv1x1(a, w_ref, b_ref):
    """1x1 conv (BN scale folded into w) + fp32 bias + ReLU.  (H,W,Cin)bf16 -> (H,W,Cout)bf16."""
    H, W, Cin = a.shape
    Cout = w_ref.shape[2]
    y = jnp.dot(a.reshape(H * W, Cin), w_ref[0], preferred_element_type=jnp.float32)
    y = jnp.maximum(y + b_ref[...], 0.0)
    return y.reshape(H, W, Cout).astype(jnp.bfloat16)


def _conv_taps(a, w_ref, b_ref, axis):
    """K-tap conv sliding along `axis` (0 -> (K,1), 1 -> (1,K)) + bias + ReLU.

    Halo handled in-kernel: zero blocks concatenated along the sliding axis.  Along
    the sublane axis (axis=1) the halo is a full 8-row tile so the concat is
    tile-aligned; tap slices then start at a static (possibly unaligned) offset.
    """
    H, W, Cin = a.shape
    K, _, Cout = w_ref.shape
    pad = K // 2
    halo = _SUBLANE if axis == 1 else pad
    zshape = list(a.shape)
    zshape[axis] = halo
    zeros = jnp.zeros(tuple(zshape), a.dtype)
    ap = jnp.concatenate([zeros, a, zeros], axis=axis)
    base = halo - pad

    acc = jnp.zeros((H * W, Cout), jnp.float32)
    for k in range(K):                      # static unrolled taps, fp32 MXU accumulation
        off = base + k
        xs = ap[off:off + H, :, :] if axis == 0 else ap[:, off:off + W, :]
        acc = acc + jnp.dot(xs.reshape(H * W, Cin), w_ref[k],
                            preferred_element_type=jnp.float32)
    y = jnp.maximum(acc + b_ref[...], 0.0)
    return y.reshape(H, W, Cout).astype(jnp.bfloat16)


def _pool_conv1x1(a, w_ref, b_ref):
    """3x3/stride-1 avg-pool (count_include_pad; 1/9 folded into w) + 1x1 conv + ReLU."""
    H, W, Cin = a.shape
    Cout = w_ref.shape[2]
    zr = jnp.zeros((1, W, Cin), a.dtype)
    xp = jnp.concatenate([zr, a, zr], axis=0)                       # (H+2, W, Cin)
    zc = jnp.zeros((H + 2, _SUBLANE, Cin), a.dtype)
    xp = jnp.concatenate([zc, xp, zc], axis=1)                      # (H+2, W+16, Cin)
    rows = (xp[0:H].astype(jnp.float32)
            + xp[1:H + 1].astype(jnp.float32)
            + xp[2:H + 2].astype(jnp.float32))                      # 3-tap sum along H
    b0 = _SUBLANE - 1
    pooled = (rows[:, b0:b0 + W, :]
              + rows[:, b0 + 1:b0 + 1 + W, :]
              + rows[:, b0 + 2:b0 + 2 + W, :])                      # 3-tap sum along W (= 9*avg)
    y = jnp.dot(pooled.astype(jnp.bfloat16).reshape(H * W, Cin), w_ref[0],
                preferred_element_type=jnp.float32)
    y = jnp.maximum(y + b_ref[...], 0.0)
    return y.reshape(H, W, Cout).astype(jnp.bfloat16)


# ----------------------------- the fused kernel -----------------------------

def _inception_c_kernel(
    x_ref,
    w_1x1, b_1x1,
    w_7a1, b_7a1, w_7a2, b_7a2, w_7a3, b_7a3,
    w_7b1, b_7b1, w_7b2, b_7b2, w_7b3, b_7b3, w_7b4, b_7b4, w_7b5, b_7b5,
    w_pl, b_pl,
    o_ref,
):
    """One batch element of InceptionC.  x_ref: (H,W,Cin) bf16; o_ref: (4,H,W,192) bf16."""
    x = x_ref[...]

    # branch1x1
    o_ref[0] = _conv1x1(x, w_1x1, b_1x1)

    # branch7x7: 1x1 -> (1,7) -> (7,1); intermediates stay in VMEM/vregs
    t = _conv1x1(x, w_7a1, b_7a1)
    t = _conv_taps(t, w_7a2, b_7a2, axis=1)
    o_ref[1] = _conv_taps(t, w_7a3, b_7a3, axis=0)

    # branch7x7dbl: 1x1 -> (7,1) -> (1,7) -> (7,1) -> (1,7)
    t = _conv1x1(x, w_7b1, b_7b1)
    t = _conv_taps(t, w_7b2, b_7b2, axis=0)
    t = _conv_taps(t, w_7b3, b_7b3, axis=1)
    t = _conv_taps(t, w_7b4, b_7b4, axis=0)
    o_ref[2] = _conv_taps(t, w_7b5, b_7b5, axis=1)

    # branch_pool: fused 3x3 avg-pool + 1x1 conv
    o_ref[3] = _pool_conv1x1(x, w_pl, b_pl)


# ----------------------------- wrapper -----------------------------

def inception_c_forward(params, x_nchw):
    N, Cin, H, W = x_nchw.shape
    # NCHW -> NHWC (channels on the 128-lane axis); bf16 activations feed the MXU.
    x = jnp.transpose(x_nchw, (0, 2, 3, 1)).astype(jnp.bfloat16)

    flat_args = [x]
    in_specs = [pl.BlockSpec((None, H, W, Cin), lambda n: (n, 0, 0, 0))]
    for name in _CONV_ORDER:
        w = params[name]["w_taps"]
        b = params[name]["bias"]
        flat_args += [w, b]
        in_specs.append(pl.BlockSpec(w.shape, lambda n: (0, 0, 0)))   # VMEM-resident weights
        in_specs.append(pl.BlockSpec(b.shape, lambda n: (0, 0)))      # VMEM-resident bias

    out5 = pl.pallas_call(
        _inception_c_kernel,
        grid=(N,),
        out_shape=jax.ShapeDtypeStruct((N, 4, H, W, _BRANCH_COUT), jnp.bfloat16),
        in_specs=in_specs,
        out_specs=pl.BlockSpec((None, 4, H, W, _BRANCH_COUT),
                               lambda n: (n, 0, 0, 0, 0)),
        compiler_params=pltpu.CompilerParams(
            dimension_semantics=("parallel",),
            vmem_limit_bytes=_vmem_limit_bytes(),
        ),
    )(*flat_args)

    # Single epilogue pass: (N,4,H,W,192) branch-major -> NCHW (N,768,H,W) + fp32 cast.
    out = jnp.transpose(out5, (0, 1, 4, 2, 3)).reshape(N, 4 * _BRANCH_COUT, H, W)
    return out.astype(jnp.float32)


# ----------------------------- parameters -----------------------------

def init_basic_conv(key, cin, cout, kh, kw, extra_scale=1.0):
    k1, k2, k3, k4, k5 = jax.random.split(key, 5)
    fan_in = cin * kh * kw
    w_hwio = jax.random.normal(k1, (kh, kw, cin, cout), jnp.float32) / jnp.sqrt(fan_in)
    gamma = jax.random.uniform(k2, (cout,), jnp.float32, 0.8, 1.2)
    beta = 0.1 * jax.random.normal(k3, (cout,), jnp.float32)
    mean = 0.1 * jax.random.normal(k4, (cout,), jnp.float32)
    var = jax.random.uniform(k5, (cout,), jnp.float32, 0.5, 1.5)
    scale = gamma / jnp.sqrt(var + BN_EPS)                  # folded BatchNorm (eval mode)
    bias = beta - mean * scale
    w_folded = w_hwio * (scale * extra_scale)[None, None, None, :]   # BN (and pool) scale folded
    return dict(
        w_hwio=w_hwio,                                                # fp32 HWIO, reference only
        scale=scale,                                                  # reference only
        w_taps=w_folded.reshape(kh * kw, cin, cout).astype(jnp.bfloat16),  # (K, Cin, Cout)
        bias=bias.reshape(1, cout),                                   # fp32
    )


def init_inception_c(key, in_channels, channels_7x7):
    c7 = channels_7x7
    keys = jax.random.split(key, 10)
    return dict(
        branch1x1=init_basic_conv(keys[0], in_channels, 192, 1, 1),
        branch7x7_1=init_basic_conv(keys[1], in_channels, c7, 1, 1),
        branch7x7_2=init_basic_conv(keys[2], c7, c7, 1, 7),
        branch7x7_3=init_basic_conv(keys[3], c7, 192, 7, 1),
        branch7x7dbl_1=init_basic_conv(keys[4], in_channels, c7, 1, 1),
        branch7x7dbl_2=init_basic_conv(keys[5], c7, c7, 7, 1),
        branch7x7dbl_3=init_basic_conv(keys[6], c7, c7, 1, 7),
        branch7x7dbl_4=init_basic_conv(keys[7], c7, c7, 7, 1),
        branch7x7dbl_5=init_basic_conv(keys[8], c7, 192, 1, 7),
        # avg-pool 1/9 folded into the 1x1 conv weights (pool+conv fused in-kernel)
        branch_pool=init_basic_conv(keys[9], in_channels, 192, 1, 1, extra_scale=1.0 / 9.0),
    )


# ----------------------------- plain-JAX reference (fp32, verification) -----------------------------

def _ref_conv_bn_relu(x, p):
    kh, kw = p["w_hwio"].shape[0], p["w_hwio"].shape[1]
    pad = ((kh // 2, kh // 2), (kw // 2, kw // 2))
    y = lax.conv_general_dilated(
        x, p["w_hwio"], window_strides=(1, 1), padding=pad,
        dimension_numbers=("NHWC", "HWIO", "NHWC"),
        precision=lax.Precision.HIGHEST)
    y = y * p["scale"].reshape(1, 1, 1, -1) + p["bias"].reshape(1, 1, 1, -1)
    return jnp.maximum(y, 0.0)


def _ref_avg_pool(x):
    s = lax.reduce_window(x, 0.0, lax.add, (1, 3, 3, 1), (1, 1, 1, 1),
                          ((0, 0), (1, 1), (1, 1), (0, 0)))
    return s / 9.0  # count_include_pad=True, as in F.avg_pool2d default


def inception_c_reference(params, x_nchw):
    x = jnp.transpose(x_nchw, (0, 2, 3, 1))
    b1 = _ref_conv_bn_relu(x, params["branch1x1"])
    b7 = _ref_conv_bn_relu(x, params["branch7x7_1"])
    b7 = _ref_conv_bn_relu(b7, params["branch7x7_2"])
    b7 = _ref_conv_bn_relu(b7, params["branch7x7_3"])
    bd = _ref_conv_bn_relu(x, params["branch7x7dbl_1"])
    bd = _ref_conv_bn_relu(bd, params["branch7x7dbl_2"])
    bd = _ref_conv_bn_relu(bd, params["branch7x7dbl_3"])
    bd = _ref_conv_bn_relu(bd, params["branch7x7dbl_4"])
    bd = _ref_conv_bn_relu(bd, params["branch7x7dbl_5"])
    bp = _ref_conv_bn_relu(_ref_avg_pool(x), params["branch_pool"])
    out = jnp.concatenate([b1, b7, bd, bp], axis=-1)
    return jnp.transpose(out, (0, 3, 1, 2))


# ----------------------------- main -----------------------------

if __name__ == "__main__":
    N, Cin, H, W = 2, 32, 8, 8
    channels_7x7 = 16

    key = jax.random.PRNGKey(0)
    kx, kp = jax.random.split(key)
    x = jax.random.normal(kx, (N, Cin, H, W), jnp.float32)   # NCHW, like the PyTorch input
    params = init_inception_c(kp, Cin, channels_7x7)

    out = jax.block_until_ready(jax.jit(inception_c_forward)(params, x))
    assert out.shape == (N, 192 * 4, H, W), out.shape

    ref = jax.block_until_ready(jax.jit(inception_c_reference)(params, x))
    max_err = float(jnp.max(jnp.abs(out - ref)))
    # bf16 MXU operands / bf16 inter-stage activations vs an fp32-HIGHEST reference.
    tol = 3e-2 * (1.0 + float(jnp.max(jnp.abs(ref))))
    assert max_err < tol, f"max abs err {max_err} (tol {tol})"

    print("KERNEL_OK")
</pallas_src>

<mosaic_0001>
module attributes {stable_mosaic.version = 11 : i64} {
  func.func @_inception_c_kernel(%arg0: i32, %arg1: memref<1x8x8x32xbf16, #tpu.memory_space<vmem>>, %arg2: memref<1x32x192xbf16, #tpu.memory_space<vmem>>, %arg3: memref<1x192xf32, #tpu.memory_space<vmem>>, %arg4: memref<1x32x16xbf16, #tpu.memory_space<vmem>>, %arg5: memref<1x16xf32, #tpu.memory_space<vmem>>, %arg6: memref<7x16x16xbf16, #tpu.memory_space<vmem>>, %arg7: memref<1x16xf32, #tpu.memory_space<vmem>>, %arg8: memref<7x16x192xbf16, #tpu.memory_space<vmem>>, %arg9: memref<1x192xf32, #tpu.memory_space<vmem>>, %arg10: memref<1x32x16xbf16, #tpu.memory_space<vmem>>, %arg11: memref<1x16xf32, #tpu.memory_space<vmem>>, %arg12: memref<7x16x16xbf16, #tpu.memory_space<vmem>>, %arg13: memref<1x16xf32, #tpu.memory_space<vmem>>, %arg14: memref<7x16x16xbf16, #tpu.memory_space<vmem>>, %arg15: memref<1x16xf32, #tpu.memory_space<vmem>>, %arg16: memref<7x16x16xbf16, #tpu.memory_space<vmem>>, %arg17: memref<1x16xf32, #tpu.memory_space<vmem>>, %arg18: memref<7x16x192xbf16, #tpu.memory_space<vmem>>, %arg19: memref<1x192xf32, #tpu.memory_space<vmem>>, %arg20: memref<1x32x192xbf16, #tpu.memory_space<vmem>>, %arg21: memref<1x192xf32, #tpu.memory_space<vmem>>, %arg22: memref<1x4x8x8x192xbf16, #tpu.memory_space<vmem>>) attributes {dimension_semantics = [#tpu.dimension_semantics<parallel>], iteration_bounds = array<i64: 2>, scalar_prefetch = 0 : i64, scratch_operands = 0 : i64, tpu.core_type = #tpu.core_type<tc>, window_params = [{transform_indices = @transform_0, window_bounds = array<i64: 1, 8, 8, 32>}, {pipeline_mode = #tpu.pipeline_mode<synchronous>, transform_indices = @transform_1, window_bounds = array<i64: 1, 32, 192>}, {pipeline_mode = #tpu.pipeline_mode<synchronous>, transform_indices = @transform_2, window_bounds = array<i64: 1, 192>}, {pipeline_mode = #tpu.pipeline_mode<synchronous>, transform_indices = @transform_3, window_bounds = array<i64: 1, 32, 16>}, {pipeline_mode = #tpu.pipeline_mode<synchronous>, transform_indices = @transform_4, window_bounds = array<i64: 1, 16>}, {pipeline_mode = #tpu.pipeline_mode<synchronous>, transform_indices = @transform_5, window_bounds = array<i64: 7, 16, 16>}, {pipeline_mode = #tpu.pipeline_mode<synchronous>, transform_indices = @transform_6, window_bounds = array<i64: 1, 16>}, {pipeline_mode = #tpu.pipeline_mode<synchronous>, transform_indices = @transform_7, window_bounds = array<i64: 7, 16, 192>}, {pipeline_mode = #tpu.pipeline_mode<synchronous>, transform_indices = @transform_8, window_bounds = array<i64: 1, 192>}, {pipeline_mode = #tpu.pipeline_mode<synchronous>, transform_indices = @transform_9, window_bounds = array<i64: 1, 32, 16>}, {pipeline_mode = #tpu.pipeline_mode<synchronous>, transform_indices = @transform_10, window_bounds = array<i64: 1, 16>}, {pipeline_mode = #tpu.pipeline_mode<synchronous>, transform_indices = @transform_11, window_bounds = array<i64: 7, 16, 16>}, {pipeline_mode = #tpu.pipeline_mode<synchronous>, transform_indices = @transform_12, window_bounds = array<i64: 1, 16>}, {pipeline_mode = #tpu.pipeline_mode<synchronous>, transform_indices = @transform_13, window_bounds = array<i64: 7, 16, 16>}, {pipeline_mode = #tpu.pipeline_mode<synchronous>, transform_indices = @transform_14, window_bounds = array<i64: 1, 16>}, {pipeline_mode = #tpu.pipeline_mode<synchronous>, transform_indices = @transform_15, window_bounds = array<i64: 7, 16, 16>}, {pipeline_mode = #tpu.pipeline_mode<synchronous>, transform_indices = @transform_16, window_bounds = array<i64: 1, 16>}, {pipeline_mode = #tpu.pipeline_mode<synchronous>, transform_indices = @transform_17, window_bounds = array<i64: 7, 16, 192>}, {pipeline_mode = #tpu.pipeline_mode<synchronous>, transform_indices = @transform_18, window_bounds = array<i64: 1, 192>}, {pipeline_mode = #tpu.pipeline_mode<synchronous>, transform_indices = @transform_19, window_bounds = array<i64: 1, 32, 192>}, {pipeline_mode = #tpu.pipeline_mode<synchronous>, transform_indices = @transform_20, window_bounds = array<i64: 1, 192>}, {transform_indices = @transform_21, window_bounds = array<i64: 1, 4, 8, 8, 192>}]} {
    %c0 = arith.constant 0 : index
    %c0_0 = arith.constant 0 : index
    %c0_1 = arith.constant 0 : index
    %c0_2 = arith.constant 0 : index
    %0 = vector.load %arg1[%c0, %c0_0, %c0_1, %c0_2] : memref<1x8x8x32xbf16, #tpu.memory_space<vmem>>, vector<1x8x8x32xbf16>
    %1 = vector.shape_cast %0 : vector<1x8x8x32xbf16> to vector<8x8x32xbf16>
    %2 = vector.shape_cast %1 : vector<8x8x32xbf16> to vector<64x32xbf16>
    %c0_3 = arith.constant 0 : index
    %c0_4 = arith.constant 0 : index
    %c0_5 = arith.constant 0 : index
    %3 = vector.load %arg2[%c0_3, %c0_4, %c0_5] : memref<1x32x192xbf16, #tpu.memory_space<vmem>>, vector<1x32x192xbf16>
    %4 = vector.shape_cast %3 : vector<1x32x192xbf16> to vector<32x192xbf16>
    %cst = arith.constant dense<0.000000e+00> : vector<64x192xf32>
    %5 = tpu.matmul %2, %4, %cst {dimension_numbers = #tpu.dot_dimension_numbers<[1], [0], [0], [1], [0, 0, 1, 1], [], []>} : vector<64x32xbf16>, vector<32x192xbf16>, vector<64x192xf32> -> vector<64x192xf32>
    %c0_6 = arith.constant 0 : index
    %c0_7 = arith.constant 0 : index
    %6 = vector.load %arg3[%c0_6, %c0_7] : memref<1x192xf32, #tpu.memory_space<vmem>>, vector<1x192xf32>
    %7 = vector.broadcast %6 : vector<1x192xf32> to vector<64x192xf32>
    %8 = arith.addf %5, %7 : vector<64x192xf32>
    %cst_8 = arith.constant 0.000000e+00 : f32
    %9 = vector.broadcast %cst_8 : f32 to vector<64x192xf32>
    %10 = arith.maximumf %8, %9 : vector<64x192xf32>
    %11 = vector.shape_cast %10 : vector<64x192xf32> to vector<8x8x192xf32>
    %12 = arith.truncf %11 : vector<8x8x192xf32> to vector<8x8x192xbf16>
    %c0_9 = arith.constant 0 : index
    %c0_10 = arith.constant 0 : index
    %c0_11 = arith.constant 0 : index
    %c0_12 = arith.constant 0 : index
    %c0_13 = arith.constant 0 : index
    %13 = vector.load %arg22[%c0_9, %c0_10, %c0_11, %c0_12, %c0_13] : memref<1x4x8x8x192xbf16, #tpu.memory_space<vmem>>, vector<1x1x8x8x192xbf16>
    %14 = vector.shape_cast %13 : vector<1x1x8x8x192xbf16> to vector<8x8x192xbf16>
    %15 = vector.shape_cast %12 : vector<8x8x192xbf16> to vector<1x1x8x8x192xbf16>
    tpu.vector_store %arg22[%c0_9, %c0_10, %c0_11, %c0_12, %c0_13], %15 {strides = array<i32>} : memref<1x4x8x8x192xbf16, #tpu.memory_space<vmem>>, vector<1x1x8x8x192xbf16>,
    %16 = vector.shape_cast %1 : vector<8x8x32xbf16> to vector<64x32xbf16>
    %c0_14 = arith.constant 0 : index
    %c0_15 = arith.constant 0 : index
    %c0_16 = arith.constant 0 : index
    %17 = vector.load %arg4[%c0_14, %c0_15, %c0_16] : memref<1x32x16xbf16, #tpu.memory_space<vmem>>, vector<1x32x16xbf16>
    %18 = vector.shape_cast %17 : vector<1x32x16xbf16> to vector<32x16xbf16>
    %cst_17 = arith.constant dense<0.000000e+00> : vector<64x16xf32>
    %19 = tpu.matmul %16, %18, %cst_17 {dimension_numbers = #tpu.dot_dimension_numbers<[1], [0], [0], [1], [0, 0, 1, 1], [], []>} : vector<64x32xbf16>, vector<32x16xbf16>, vector<64x16xf32> -> vector<64x16xf32>
    %c0_18 = arith.constant 0 : index
    %c0_19 = arith.constant 0 : index
    %20 = vector.load %arg5[%c0_18, %c0_19] : memref<1x16xf32, #tpu.memory_space<vmem>>, vector<1x16xf32>
    %21 = vector.broadcast %20 : vector<1x16xf32> to vector<64x16xf32>
    %22 = arith.addf %19, %21 : vector<64x16xf32>
    %cst_20 = arith.constant 0.000000e+00 : f32
    %23 = vector.broadcast %cst_20 : f32 to vector<64x16xf32>
    %24 = arith.maximumf %22, %23 : vector<64x16xf32>
    %25 = vector.shape_cast %24 : vector<64x16xf32> to vector<8x8x16xf32>
    %26 = arith.truncf %25 : vector<8x8x16xf32> to vector<8x8x16xbf16>
    %cst_21 = arith.constant 0.000000e+00 : bf16
    %27 = vector.broadcast %cst_21 : bf16 to vector<8x8x16xbf16>
    %28 = tpu.concatenate %27, %26, %27 in 1 : vector<8x8x16xbf16>, vector<8x8x16xbf16>, vector<8x8x16xbf16> -> vector<8x24x16xbf16>
    %cst_22 = arith.constant 0.000000e+00 : f32
    %29 = vector.broadcast %cst_22 : f32 to vector<64x16xf32>
    %30 = vector.extract_strided_slice %28 {offsets = [0, 5, 0], sizes = [8, 8, 16], strides = [1, 1, 1]} : vector<8x24x16xbf16> to vector<8x8x16xbf16>
    %31 = vector.shape_cast %30 : vector<8x8x16xbf16> to vector<64x16xbf16>
    %c0_23 = arith.constant 0 : index
    %c0_24 = arith.constant 0 : index
    %c0_25 = arith.constant 0 : index
    %32 = vector.load %arg6[%c0_23, %c0_24, %c0_25] : memref<7x16x16xbf16, #tpu.memory_space<vmem>>, vector<1x16x16xbf16>
    %33 = vector.shape_cast %32 : vector<1x16x16xbf16> to vector<16x16xbf16>
    %cst_26 = arith.constant dense<0.000000e+00> : vector<64x16xf32>
    %34 = tpu.matmul %31, %33, %cst_26 {dimension_numbers = #tpu.dot_dimension_numbers<[1], [0], [0], [1], [0, 0, 1, 1], [], []>} : vector<64x16xbf16>, vector<16x16xbf16>, vector<64x16xf32> -> vector<64x16xf32>
    %35 = arith.addf %29, %34 : vector<64x16xf32>
    %36 = vector.extract_strided_slice %28 {offsets = [0, 6, 0], sizes = [8, 8, 16], strides = [1, 1, 1]} : vector<8x24x16xbf16> to vector<8x8x16xbf16>
    %37 = vector.shape_cast %36 : vector<8x8x16xbf16> to vector<64x16xbf16>
    %c1 = arith.constant 1 : index
    %c0_27 = arith.constant 0 : index
    %c0_28 = arith.constant 0 : index
    %38 = vector.load %arg6[%c1, %c0_27, %c0_28] : memref<7x16x16xbf16, #tpu.memory_space<vmem>>, vector<1x16x16xbf16>
    %39 = vector.shape_cast %38 : vector<1x16x16xbf16> to vector<16x16xbf16>
    %cst_29 = arith.constant dense<0.000000e+00> : vector<64x16xf32>
    %40 = tpu.matmul %37, %39, %cst_29 {dimension_numbers = #tpu.dot_dimension_numbers<[1], [0], [0], [1], [0, 0, 1, 1], [], []>} : vector<64x16xbf16>, vector<16x16xbf16>, vector<64x16xf32> -> vector<64x16xf32>
    %41 = arith.addf %35, %40 : vector<64x16xf32>
    %42 = vector.extract_strided_slice %28 {offsets = [0, 7, 0], sizes = [8, 8, 16], strides = [1, 1, 1]} : vector<8x24x16xbf16> to vector<8x8x16xbf16>
    %43 = vector.shape_cast %42 : vector<8x8x16xbf16> to vector<64x16xbf16>
    %c2 = arith.constant 2 : index
    %c0_30 = arith.constant 0 : index
    %c0_31 = arith.constant 0 : index
    %44 = vector.load %arg6[%c2, %c0_30, %c0_31] : memref<7x16x16xbf16, #tpu.memory_space<vmem>>, vector<1x16x16xbf16>
    %45 = vector.shape_cast %44 : vector<1x16x16xbf16> to vector<16x16xbf16>
    %cst_32 = arith.constant dense<0.000000e+00> : vector<64x16xf32>
    %46 = tpu.matmul %43, %45, %cst_32 {dimension_numbers = #tpu.dot_dimension_numbers<[1], [0], [0], [1], [0, 0, 1, 1], [], []>} : vector<64x16xbf16>, vector<16x16xbf16>, vector<64x16xf32> -> vector<64x16xf32>
    %47 = arith.addf %41, %46 : vector<64x16xf32>
    %48 = vector.extract_strided_slice %28 {offsets = [0, 8, 0], sizes = [8, 8, 16], strides = [1, 1, 1]} : vector<8x24x16xbf16> to vector<8x8x16xbf16>
    %49 = vector.shape_cast %48 : vector<8x8x16xbf16> to vector<64x16xbf16>
    %c3 = arith.constant 3 : index
    %c0_33 = arith.constant 0 : index
    %c0_34 = arith.constant 0 : index
    %50 = vector.load %arg6[%c3, %c0_33, %c0_34] : memref<7x16x16xbf16, #tpu.memory_space<vmem>>, vector<1x16x16xbf16>
    %51 = vector.shape_cast %50 : vector<1x16x16xbf16> to vector<16x16xbf16>
    %cst_35 = arith.constant dense<0.000000e+00> : vector<64x16xf32>
    %52 = tpu.matmul %49, %51, %cst_35 {dimension_numbers = #tpu.dot_dimension_numbers<[1], [0], [0], [1], [0, 0, 1, 1], [], []>} : vector<64x16xbf16>, vector<16x16xbf16>, vector<64x16xf32> -> vector<64x16xf32>
    %53 = arith.addf %47, %52 : vector<64x16xf32>
    %54 = vector.extract_strided_slice %28 {offsets = [0, 9, 0], sizes = [8, 8, 16], strides = [1, 1, 1]} : vector<8x24x16xbf16> to vector<8x8x16xbf16>
    %55 = vector.shape_cast %54 : vector<8x8x16xbf16> to vector<64x16xbf16>
    %c4 = arith.constant 4 : index
    %c0_36 = arith.constant 0 : index
    %c0_37 = arith.constant 0 : index
    %56 = vector.load %arg6[%c4, %c0_36, %c0_37] : memref<7x16x16xbf16, #tpu.memory_space<vmem>>, vector<1x16x16xbf16>
    %57 = vector.shape_cast %56 : vector<1x16x16xbf16> to vector<16x16xbf16>
    %cst_38 = arith.constant dense<0.000000e+00> : vector<64x16xf32>
    %58 = tpu.matmul %55, %57, %cst_38 {dimension_numbers = #tpu.dot_dimension_numbers<[1], [0], [0], [1], [0, 0, 1, 1], [], []>} : vector<64x16xbf16>, vector<16x16xbf16>, vector<64x16xf32> -> vector<64x16xf32>
    %59 = arith.addf %53, %58 : vector<64x16xf32>
    %60 = vector.extract_strided_slice %28 {offsets = [0, 10, 0], sizes = [8, 8, 16], strides = [1, 1, 1]} : vector<8x24x16xbf16> to vector<8x8x16xbf16>
    %61 = vector.shape_cast %60 : vector<8x8x16xbf16> to vector<64x16xbf16>
    %c5 = arith.constant 5 : index
    %c0_39 = arith.constant 0 : index
    %c0_40 = arith.constant 0 : index
    %62 = vector.load %arg6[%c5, %c0_39, %c0_40] : memref<7x16x16xbf16, #tpu.memory_space<vmem>>, vector<1x16x16xbf16>
    %63 = vector.shape_cast %62 : vector<1x16x16xbf16> to vector<16x16xbf16>
    %cst_41 = arith.constant dense<0.000000e+00> : vector<64x16xf32>
    %64 = tpu.matmul %61, %63, %cst_41 {dimension_numbers = #tpu.dot_dimension_numbers<[1], [0], [0], [1], [0, 0, 1, 1], [], []>} : vector<64x16xbf16>, vector<16x16xbf16>, vector<64x16xf32> -> vector<64x16xf32>
    %65 = arith.addf %59, %64 : vector<64x16xf32>
    %66 = vector.extract_strided_slice %28 {offsets = [0, 11, 0], sizes = [8, 8, 16], strides = [1, 1, 1]} : vector<8x24x16xbf16> to vector<8x8x16xbf16>
    %67 = vector.shape_cast %66 : vector<8x8x16xbf16> to vector<64x16xbf16>
    %c6 = arith.constant 6 : index
    %c0_42 = arith.constant 0 : index
    %c0_43 = arith.constant 0 : index
    %68 = vector.load %arg6[%c6, %c0_42, %c0_43] : memref<7x16x16xbf16, #tpu.memory_space<vmem>>, vector<1x16x16xbf16>
    %69 = vector.shape_cast %68 : vector<1x16x16xbf16> to vector<16x16xbf16>
    %cst_44 = arith.constant dense<0.000000e+00> : vector<64x16xf32>
    %70 = tpu.matmul %67, %69, %cst_44 {dimension_numbers = #tpu.dot_dimension_numbers<[1], [0], [0], [1], [0, 0, 1, 1], [], []>} : vector<64x16xbf16>, vector<16x16xbf16>, vector<64x16xf32> -> vector<64x16xf32>
    %71 = arith.addf %65, %70 : vector<64x16xf32>
    %c0_45 = arith.constant 0 : index
    %c0_46 = arith.constant 0 : index
    %72 = vector.load %arg7[%c0_45, %c0_46] : memref<1x16xf32, #tpu.memory_space<vmem>>, vector<1x16xf32>
    %73 = vector.broadcast %72 : vector<1x16xf32> to vector<64x16xf32>
    %74 = arith.addf %71, %73 : vector<64x16xf32>
    %cst_47 = arith.constant 0.000000e+00 : f32
    %75 = vector.broadcast %cst_47 : f32 to vector<64x16xf32>
    %76 = arith.maximumf %74, %75 : vector<64x16xf32>
    %77 = vector.shape_cast %76 : vector<64x16xf32> to vector<8x8x16xf32>
    %78 = arith.truncf %77 : vector<8x8x16xf32> to vector<8x8x16xbf16>
    %cst_48 = arith.constant 0.000000e+00 : bf16
    %79 = vector.broadcast %cst_48 : bf16 to vector<3x8x16xbf16>
    %80 = tpu.concatenate %79, %78, %79 in 0 : vector<3x8x16xbf16>, vector<8x8x16xbf16>, vector<3x8x16xbf16> -> vector<14x8x16xbf16>
    %cst_49 = arith.constant 0.000000e+00 : f32
    %81 = vector.broadcast %cst_49 : f32 to vector<64x192xf32>
    %82 = vector.extract_strided_slice %80 {offsets = [0, 0, 0], sizes = [8, 8, 16], strides = [1, 1, 1]} : vector<14x8x16xbf16> to vector<8x8x16xbf16>
    %83 = vector.shape_cast %82 : vector<8x8x16xbf16> to vector<64x16xbf16>
    %c0_50 = arith.constant 0 : index
    %c0_51 = arith.constant 0 : index
    %c0_52 = arith.constant 0 : index
    %84 = vector.load %arg8[%c0_50, %c0_51, %c0_52] : memref<7x16x192xbf16, #tpu.memory_space<vmem>>, vector<1x16x192xbf16>
    %85 = vector.shape_cast %84 : vector<1x16x192xbf16> to vector<16x192xbf16>
    %cst_53 = arith.constant dense<0.000000e+00> : vector<64x192xf32>
    %86 = tpu.matmul %83, %85, %cst_53 {dimension_numbers = #tpu.dot_dimension_numbers<[1], [0], [0], [1], [0, 0, 1, 1], [], []>} : vector<64x16xbf16>, vector<16x192xbf16>, vector<64x192xf32> -> vector<64x192xf32>
    %87 = arith.addf %81, %86 : vector<64x192xf32>
    %88 = vector.extract_strided_slice %80 {offsets = [1, 0, 0], sizes = [8, 8, 16], strides = [1, 1, 1]} : vector<14x8x16xbf16> to vector<8x8x16xbf16>
    %89 = vector.shape_cast %88 : vector<8x8x16xbf16> to vector<64x16xbf16>
    %c1_54 = arith.constant 1 : index
    %c0_55 = arith.constant 0 : index
    %c0_56 = arith.constant 0 : index
    %90 = vector.load %arg8[%c1_54, %c0_55, %c0_56] : memref<7x16x192xbf16, #tpu.memory_space<vmem>>, vector<1x16x192xbf16>
    %91 = vector.shape_cast %90 : vector<1x16x192xbf16> to vector<16x192xbf16>
    %cst_57 = arith.constant dense<0.000000e+00> : vector<64x192xf32>
    %92 = tpu.matmul %89, %91, %cst_57 {dimension_numbers = #tpu.dot_dimension_numbers<[1], [0], [0], [1], [0, 0, 1, 1], [], []>} : vector<64x16xbf16>, vector<16x192xbf16>, vector<64x192xf32> -> vector<64x192xf32>
    %93 = arith.addf %87, %92 : vector<64x192xf32>
    %94 = vector.extract_strided_slice %80 {offsets = [2, 0, 0], sizes = [8, 8, 16], strides = [1, 1, 1]} : vector<14x8x16xbf16> to vector<8x8x16xbf16>
    %95 = vector.shape_cast %94 : vector<8x8x16xbf16> to vector<64x16xbf16>
    %c2_58 = arith.constant 2 : index
    %c0_59 = arith.constant 0 : index
    %c0_60 = arith.constant 0 : index
    %96 = vector.load %arg8[%c2_58, %c0_59, %c0_60] : memref<7x16x192xbf16, #tpu.memory_space<vmem>>, vector<1x16x192xbf16>
    %97 = vector.shape_cast %96 : vector<1x16x192xbf16> to vector<16x192xbf16>
    %cst_61 = arith.constant dense<0.000000e+00> : vector<64x192xf32>
    %98 = tpu.matmul %95, %97, %cst_61 {dimension_numbers = #tpu.dot_dimension_numbers<[1], [0], [0], [1], [0, 0, 1, 1], [], []>} : vector<64x16xbf16>, vector<16x192xbf16>, vector<64x192xf32> -> vector<64x192xf32>
    %99 = arith.addf %93, %98 : vector<64x192xf32>
    %100 = vector.extract_strided_slice %80 {offsets = [3, 0, 0], sizes = [8, 8, 16], strides = [1, 1, 1]} : vector<14x8x16xbf16> to vector<8x8x16xbf16>
    %101 = vector.shape_cast %100 : vector<8x8x16xbf16> to vector<64x16xbf16>
    %c3_62 = arith.constant 3 : index
    %c0_63 = arith.constant 0 : index
    %c0_64 = arith.constant 0 : index
    %102 = vector.load %arg8[%c3_62, %c0_63, %c0_64] : memref<7x16x192xbf16, #tpu.memory_space<vmem>>, vector<1x16x192xbf16>
    %103 = vector.shape_cast %102 : vector<1x16x192xbf16> to vector<16x192xbf16>
    %cst_65 = arith.constant dense<0.000000e+00> : vector<64x192xf32>
    %104 = tpu.matmul %101, %103, %cst_65 {dimension_numbers = #tpu.dot_dimension_numbers<[1], [0], [0], [1], [0, 0, 1, 1], [], []>} : vector<64x16xbf16>, vector<16x192xbf16>, vector<64x192xf32> -> vector<64x192xf32>
    %105 = arith.addf %99, %104 : vector<64x192xf32>
    %106 = vector.extract_strided_slice %80 {offsets = [4, 0, 0], sizes = [8, 8, 16], strides = [1, 1, 1]} : vector<14x8x16xbf16> to vector<8x8x16xbf16>
    %107 = vector.shape_cast %106 : vector<8x8x16xbf16> to vector<64x16xbf16>
    %c4_66 = arith.constant 4 : index
    %c0_67 = arith.constant 0 : index
    %c0_68 = arith.constant 0 : index
    %108 = vector.load %arg8[%c4_66, %c0_67, %c0_68] : memref<7x16x192xbf16, #tpu.memory_space<vmem>>, vector<1x16x192xbf16>
    %109 = vector.shape_cast %108 : vector<1x16x192xbf16> to vector<16x192xbf16>
    %cst_69 = arith.constant dense<0.000000e+00> : vector<64x192xf32>
    %110 = tpu.matmul %107, %109, %cst_69 {dimension_numbers = #tpu.dot_dimension_numbers<[1], [0], [0], [1], [0, 0, 1, 1], [], []>} : vector<64x16xbf16>, vector<16x192xbf16>, vector<64x192xf32> -> vector<64x192xf32>
    %111 = arith.addf %105, %110 : vector<64x192xf32>
    %112 = vector.extract_strided_slice %80 {offsets = [5, 0, 0], sizes = [8, 8, 16], strides = [1, 1, 1]} : vector<14x8x16xbf16> to vector<8x8x16xbf16>
    %113 = vector.shape_cast %112 : vector<8x8x16xbf16> to vector<64x16xbf16>
    %c5_70 = arith.constant 5 : index
    %c0_71 = arith.constant 0 : index
    %c0_72 = arith.constant 0 : index
    %114 = vector.load %arg8[%c5_70, %c0_71, %c0_72] : memref<7x16x192xbf16, #tpu.memory_space<vmem>>, vector<1x16x192xbf16>
    %115 = vector.shape_cast %114 : vector<1x16x192xbf16> to vector<16x192xbf16>
    %cst_73 = arith.constant dense<0.000000e+00> : vector<64x192xf32>
    %116 = tpu.matmul %113, %115, %cst_73 {dimension_numbers = #tpu.dot_dimension_numbers<[1], [0], [0], [1], [0, 0, 1, 1], [], []>} : vector<64x16xbf16>, vector<16x192xbf16>, vector<64x192xf32> -> vector<64x192xf32>
    %117 = arith.addf %111, %116 : vector<64x192xf32>
    %118 = vector.extract_strided_slice %80 {offsets = [6, 0, 0], sizes = [8, 8, 16], strides = [1, 1, 1]} : vector<14x8x16xbf16> to vector<8x8x16xbf16>
    %119 = vector.shape_cast %118 : vector<8x8x16xbf16> to vector<64x16xbf16>
    %c6_74 = arith.constant 6 : index
    %c0_75 = arith.constant 0 : index
    %c0_76 = arith.constant 0 : index
    %120 = vector.load %arg8[%c6_74, %c0_75, %c0_76] : memref<7x16x192xbf16, #tpu.memory_space<vmem>>, vector<1x16x192xbf16>
    %121 = vector.shape_cast %120 : vector<1x16x192xbf16> to vector<16x192xbf16>
    %cst_77 = arith.constant dense<0.000000e+00> : vector<64x192xf32>
    %122 = tpu.matmul %119, %121, %cst_77 {dimension_numbers = #tpu.dot_dimension_numbers<[1], [0], [0], [1], [0, 0, 1, 1], [], []>} : vector<64x16xbf16>, vector<16x192xbf16>, vector<64x192xf32> -> vector<64x192xf32>
    %123 = arith.addf %117, %122 : vector<64x192xf32>
    %c0_78 = arith.constant 0 : index
    %c0_79 = arith.constant 0 : index
    %124 = vector.load %arg9[%c0_78, %c0_79] : memref<1x192xf32, #tpu.memory_space<vmem>>, vector<1x192xf32>
    %125 = vector.broadcast %124 : vector<1x192xf32> to vector<64x192xf32>
    %126 = arith.addf %123, %125 : vector<64x192xf32>
    %cst_80 = arith.constant 0.000000e+00 : f32
    %127 = vector.broadcast %cst_80 : f32 to vector<64x192xf32>
    %128 = arith.maximumf %126, %127 : vector<64x192xf32>
    %129 = vector.shape_cast %128 : vector<64x192xf32> to vector<8x8x192xf32>
    %130 = arith.truncf %129 : vector<8x8x192xf32> to vector<8x8x192xbf16>
    %c0_81 = arith.constant 0 : index
    %c1_82 = arith.constant 1 : index
    %c0_83 = arith.constant 0 : index
    %c0_84 = arith.constant 0 : index
    %c0_85 = arith.constant 0 : index
    %131 = vector.load %arg22[%c0_81, %c1_82, %c0_83, %c0_84, %c0_85] : memref<1x4x8x8x192xbf16, #tpu.memory_space<vmem>>, vector<1x1x8x8x192xbf16>
    %132 = vector.shape_cast %131 : vector<1x1x8x8x192xbf16> to vector<8x8x192xbf16>
    %133 = vector.shape_cast %130 : vector<8x8x192xbf16> to vector<1x1x8x8x192xbf16>
    tpu.vector_store %arg22[%c0_81, %c1_82, %c0_83, %c0_84, %c0_85], %133 {strides = array<i32>} : memref<1x4x8x8x192xbf16, #tpu.memory_space<vmem>>, vector<1x1x8x8x192xbf16>,
    %134 = vector.shape_cast %1 : vector<8x8x32xbf16> to vector<64x32xbf16>
    %c0_86 = arith.constant 0 : index
    %c0_87 = arith.constant 0 : index
    %c0_88 = arith.constant 0 : index
    %135 = vector.load %arg10[%c0_86, %c0_87, %c0_88] : memref<1x32x16xbf16, #tpu.memory_space<vmem>>, vector<1x32x16xbf16>
    %136 = vector.shape_cast %135 : vector<1x32x16xbf16> to vector<32x16xbf16>
    %cst_89 = arith.constant dense<0.000000e+00> : vector<64x16xf32>
    %137 = tpu.matmul %134, %136, %cst_89 {dimension_numbers = #tpu.dot_dimension_numbers<[1], [0], [0], [1], [0, 0, 1, 1], [], []>} : vector<64x32xbf16>, vector<32x16xbf16>, vector<64x16xf32> -> vector<64x16xf32>
    %c0_90 = arith.constant 0 : index
    %c0_91 = arith.constant 0 : index
    %138 = vector.load %arg11[%c0_90, %c0_91] : memref<1x16xf32, #tpu.memory_space<vmem>>, vector<1x16xf32>
    %139 = vector.broadcast %138 : vector<1x16xf32> to vector<64x16xf32>
    %140 = arith.addf %137, %139 : vector<64x16xf32>
    %cst_92 = arith.constant 0.000000e+00 : f32
    %141 = vector.broadcast %cst_92 : f32 to vector<64x16xf32>
    %142 = arith.maximumf %140, %141 : vector<64x16xf32>
    %143 = vector.shape_cast %142 : vector<64x16xf32> to vector<8x8x16xf32>
    %144 = arith.truncf %143 : vector<8x8x16xf32> to vector<8x8x16xbf16>
    %cst_93 = arith.constant 0.000000e+00 : bf16
    %145 = vector.broadcast %cst_93 : bf16 to vector<3x8x16xbf16>
    %146 = tpu.concatenate %145, %144, %145 in 0 : vector<3x8x16xbf16>, vector<8x8x16xbf16>, vector<3x8x16xbf16> -> vector<14x8x16xbf16>
    %cst_94 = arith.constant 0.000000e+00 : f32
    %147 = vector.broadcast %cst_94 : f32 to vector<64x16xf32>
    %148 = vector.extract_strided_slice %146 {offsets = [0, 0, 0], sizes = [8, 8, 16], strides = [1, 1, 1]} : vector<14x8x16xbf16> to vector<8x8x16xbf16>
    %149 = vector.shape_cast %148 : vector<8x8x16xbf16> to vector<64x16xbf16>
    %c0_95 = arith.constant 0 : index
    %c0_96 = arith.constant 0 : index
    %c0_97 = arith.constant 0 : index
    %150 = vector.load %arg12[%c0_95, %c0_96, %c0_97] : memref<7x16x16xbf16, #tpu.memory_space<vmem>>, vector<1x16x16xbf16>
    %151 = vector.shape_cast %150 : vector<1x16x16xbf16> to vector<16x16xbf16>
    %cst_98 = arith.constant dense<0.000000e+00> : vector<64x16xf32>
    %152 = tpu.matmul %149, %151, %cst_98 {dimension_numbers = #tpu.dot_dimension_numbers<[1], [0], [0], [1], [0, 0, 1, 1], [], []>} : vector<64x16xbf16>, vector<16x16xbf16>, vector<64x16xf32> -> vector<64x16xf32>
    %153 = arith.addf %147, %152 : vector<64x16xf32>
    %154 = vector.extract_strided_slice %146 {offsets = [1, 0, 0], sizes = [8, 8, 16], strides = [1, 1, 1]} : vector<14x8x16xbf16> to vector<8x8x16xbf16>
    %155 = vector.shape_cast %154 : vector<8x8x16xbf16> to vector<64x16xbf16>
    %c1_99 = arith.constant 1 : index
    %c0_100 = arith.constant 0 : index
    %c0_101 = arith.constant 0 : index
    %156 = vector.load %arg12[%c1_99, %c0_100, %c0_101] : memref<7x16x16xbf16, #tpu.memory_space<vmem>>, vector<1x16x16xbf16>
    %157 = vector.shape_cast %156 : vector<1x16x16xbf16> to vector<16x16xbf16>
    %cst_102 = arith.constant dense<0.000000e+00> : vector<64x16xf32>
    %158 = tpu.matmul %155, %157, %cst_102 {dimension_numbers = #tpu.dot_dimension_numbers<[1], [0], [0], [1], [0, 0, 1, 1], [], []>} : vector<64x16xbf16>, vector<16x16xbf16>, vector<64x16xf32> -> vector<64x16xf32>
    %159 = arith.addf %153, %158 : vector<64x16xf32>
    %160 = vector.extract_strided_slice %146 {offsets = [2, 0, 0], sizes = [8, 8, 16], strides = [1, 1, 1]} : vector<14x8x16xbf16> to vector<8x8x16xbf16>
    %161 = vector.shape_cast %160 : vector<8x8x16xbf16> to vector<64x16xbf16>
    %c2_103 = arith.constant 2 : index
    %c0_104 = arith.constant 0 : index
    %c0_105 = arith.constant 0 : index
    %162 = vector.load %arg12[%c2_103, %c0_104, %c0_105] : memref<7x16x16xbf16, #tpu.memory_space<vmem>>, vector<1x16x16xbf16>
    %163 = vector.shape_cast %162 : vector<1x16x16xbf16> to vector<16x16xbf16>
    %cst_106 = arith.constant dense<0.000000e+00> : vector<64x16xf32>
    %164 = tpu.matmul %161, %163, %cst_106 {dimension_numbers = #tpu.dot_dimension_numbers<[1], [0], [0], [1], [0, 0, 1, 1], [], []>} : vector<64x16xbf16>, vector<16x16xbf16>, vector<64x16xf32> -> vector<64x16xf32>
    %165 = arith.addf %159, %164 : vector<64x16xf32>
    %166 = vector.extract_strided_slice %146 {offsets = [3, 0, 0], sizes = [8, 8, 16], strides = [1, 1, 1]} : vector<14x8x16xbf16> to vector<8x8x16xbf16>
    %167 = vector.shape_cast %166 : vector<8x8x16xbf16> to vector<64x16xbf16>
    %c3_107 = arith.constant 3 : index
    %c0_108 = arith.constant 0 : index
    %c0_109 = arith.constant 0 : index
    %168 = vector.load %arg12[%c3_107, %c0_108, %c0_109] : memref<7x16x16xbf16, #tpu.memory_space<vmem>>, vector<1x16x16xbf16>
    %169 = vector.shape_cast %168 : vector<1x16x16xbf16> to vector<16x16xbf16>
    %cst_110 = arith.constant dense<0.000000e+00> : vector<64x16xf32>
    %170 = tpu.matmul %167, %169, %cst_110 {dimension_numbers = #tpu.dot_dimension_numbers<[1], [0], [0], [1], [0, 0, 1, 1], [], []>} : vector<64x16xbf16>, vector<16x16xbf16>, vector<64x16xf32> -> vector<64x16xf32>
    %171 = arith.addf %165, %170 : vector<64x16xf32>
    %172 = vector.extract_strided_slice %146 {offsets = [4, 0, 0], sizes = [8, 8, 16], strides = [1, 1, 1]} : vector<14x8x16xbf16> to vector<8x8x16xbf16>
    %173 = vector.shape_cast %172 : vector<8x8x16xbf16> to vector<64x16xbf16>
    %c4_111 = arith.constant 4 : index
    %c0_112 = arith.constant 0 : index
    %c0_113 = arith.constant 0 : index
    %174 = vector.load %arg12[%c4_111, %c0_112, %c0_113] : memref<7x16x16xbf16, #tpu.memory_space<vmem>>, vector<1x16x16xbf16>
    %175 = vector.shape_cast %174 : vector<1x16x16xbf16> to vector<16x16xbf16>
    %cst_114 = arith.constant dense<0.000000e+00> : vector<64x16xf32>
    %176 = tpu.matmul %173, %175, %cst_114 {dimension_numbers = #tpu.dot_dimension_numbers<[1], [0], [0], [1], [0, 0, 1, 1], [], []>} : vector<64x16xbf16>, vector<16x16xbf16>, vector<64x16xf32> -> vector<64x16xf32>
    %177 = arith.addf %171, %176 : vector<64x16xf32>
    %178 = vector.extract_strided_slice %146 {offsets = [5, 0, 0], sizes = [8, 8, 16], strides = [1, 1, 1]} : vector<14x8x16xbf16> to vector<8x8x16xbf16>
    %179 = vector.shape_cast %178 : vector<8x8x16xbf16> to vector<64x16xbf16>
    %c5_115 = arith.constant 5 : index
    %c0_116 = arith.constant 0 : index
    %c0_117 = arith.constant 0 : index
    %180 = vector.load %arg12[%c5_115, %c0_116, %c0_117] : memref<7x16x16xbf16, #tpu.memory_space<vmem>>, vector<1x16x16xbf16>
    %181 = vector.shape_cast %180 : vector<1x16x16xbf16> to vector<16x16xbf16>
    %cst_118 = arith.constant dense<0.000000e+00> : vector<64x16xf32>
    %182 = tpu.matmul %179, %181, %cst_118 {dimension_numbers = #tpu.dot_dimension_numbers<[1], [0], [0], [1], [0, 0, 1, 1], [], []>} : vector<64x16xbf16>, vector<16x16xbf16>, vector<64x16xf32> -> vector<64x16xf32>
    %183 = arith.addf %177, %182 : vector<64x16xf32>
    %184 = vector.extract_strided_slice %146 {offsets = [6, 0, 0], sizes = [8, 8, 16], strides = [1, 1, 1]} : vector<14x8x16xbf16> to vector<8x8x16xbf16>
    %185 = vector.shape_cast %184 : vector<8x8x16xbf16> to vector<64x16xbf16>
    %c6_119 = arith.constant 6 : index
    %c0_120 = arith.constant 0 : index
    %c0_121 = arith.constant 0 : index
    %186 = vector.load %arg12[%c6_119, %c0_120, %c0_121] : memref<7x16x16xbf16, #tpu.memory_space<vmem>>, vector<1x16x16xbf16>
    %187 = vector.shape_cast %186 : vector<1x16x16xbf16> to vector<16x16xbf16>
    %cst_122 = arith.constant dense<0.000000e+00> : vector<64x16xf32>
    %188 = tpu.matmul %185, %187, %cst_122 {dimension_numbers = #tpu.dot_dimension_numbers<[1], [0], [0], [1], [0, 0, 1, 1], [], []>} : vector<64x16xbf16>, vector<16x16xbf16>, vector<64x16xf32> -> vector<64x16xf32>
    %189 = arith.addf %183, %188 : vector<64x16xf32>
    %c0_123 = arith.constant 0 : index
    %c0_124 = arith.constant 0 : index
    %190 = vector.load %arg13[%c0_123, %c0_124] : memref<1x16xf32, #tpu.memory_space<vmem>>, vector<1x16xf32>
    %191 = vector.broadcast %190 : vector<1x16xf32> to vector<64x16xf32>
    %192 = arith.addf %189, %191 : vector<64x16xf32>
    %cst_125 = arith.constant 0.000000e+00 : f32
    %193 = vector.broadcast %cst_125 : f32 to vector<64x16xf32>
    %194 = arith.maximumf %192, %193 : vector<64x16xf32>
    %195 = vector.shape_cast %194 : vector<64x16xf32> to vector<8x8x16xf32>
    %196 = arith.truncf %195 : vector<8x8x16xf32> to vector<8x8x16xbf16>
    %cst_126 = arith.constant 0.000000e+00 : bf16
    %197 = vector.broadcast %cst_126 : bf16 to vector<8x8x16xbf16>
    %198 = tpu.concatenate %197, %196, %197 in 1 : vector<8x8x16xbf16>, vector<8x8x16xbf16>, vector<8x8x16xbf16> -> vector<8x24x16xbf16>
    %cst_127 = arith.constant 0.000000e+00 : f32
    %199 = vector.broadcast %cst_127 : f32 to vector<64x16xf32>
    %200 = vector.extract_strided_slice %198 {offsets = [0, 5, 0], sizes = [8, 8, 16], strides = [1, 1, 1]} : vector<8x24x16xbf16> to vector<8x8x16xbf16>
    %201 = vector.shape_cast %200 : vector<8x8x16xbf16> to vector<64x16xbf16>
    %c0_128 = arith.constant 0 : index
    %c0_129 = arith.constant 0 : index
    %c0_130 = arith.constant 0 : index
    %202 = vector.load %arg14[%c0_128, %c0_129, %c0_130] : memref<7x16x16xbf16, #tpu.memory_space<vmem>>, vector<1x16x16xbf16>
    %203 = vector.shape_cast %202 : vector<1x16x16xbf16> to vector<16x16xbf16>
    %cst_131 = arith.constant dense<0.000000e+00> : vector<64x16xf32>
    %204 = tpu.matmul %201, %203, %cst_131 {dimension_numbers = #tpu.dot_dimension_numbers<[1], [0], [0], [1], [0, 0, 1, 1], [], []>} : vector<64x16xbf16>, vector<16x16xbf16>, vector<64x16xf32> -> vector<64x16xf32>
    %205 = arith.addf %199, %204 : vector<64x16xf32>
    %206 = vector.extract_strided_slice %198 {offsets = [0, 6, 0], sizes = [8, 8, 16], strides = [1, 1, 1]} : vector<8x24x16xbf16> to vector<8x8x16xbf16>
    %207 = vector.shape_cast %206 : vector<8x8x16xbf16> to vector<64x16xbf16>
    %c1_132 = arith.constant 1 : index
    %c0_133 = arith.constant 0 : index
    %c0_134 = arith.constant 0 : index
    %208 = vector.load %arg14[%c1_132, %c0_133, %c0_134] : memref<7x16x16xbf16, #tpu.memory_space<vmem>>, vector<1x16x16xbf16>
    %209 = vector.shape_cast %208 : vector<1x16x16xbf16> to vector<16x16xbf16>
    %cst_135 = arith.constant dense<0.000000e+00> : vector<64x16xf32>
    %210 = tpu.matmul %207, %209, %cst_135 {dimension_numbers = #tpu.dot_dimension_numbers<[1], [0], [0], [1], [0, 0, 1, 1], [], []>} : vector<64x16xbf16>, vector<16x16xbf16>, vector<64x16xf32> -> vector<64x16xf32>
    %211 = arith.addf %205, %210 : vector<64x16xf32>
    %212 = vector.extract_strided_slice %198 {offsets = [0, 7, 0], sizes = [8, 8, 16], strides = [1, 1, 1]} : vector<8x24x16xbf16> to vector<8x8x16xbf16>
    %213 = vector.shape_cast %212 : vector<8x8x16xbf16> to vector<64x16xbf16>
    %c2_136 = arith.constant 2 : index
    %c0_137 = arith.constant 0 : index
    %c0_138 = arith.constant 0 : index
    %214 = vector.load %arg14[%c2_136, %c0_137, %c0_138] : memref<7x16x16xbf16, #tpu.memory_space<vmem>>, vector<1x16x16xbf16>
    %215 = vector.shape_cast %214 : vector<1x16x16xbf16> to vector<16x16xbf16>
    %cst_139 = arith.constant dense<0.000000e+00> : vector<64x16xf32>
    %216 = tpu.matmul %213, %215, %cst_139 {dimension_numbers = #tpu.dot_dimension_numbers<[1], [0], [0], [1], [0, 0, 1, 1], [], []>} : vector<64x16xbf16>, vector<16x16xbf16>, vector<64x16xf32> -> vector<64x16xf32>
    %217 = arith.addf %211, %216 : vector<64x16xf32>
    %218 = vector.extract_strided_slice %198 {offsets = [0, 8, 0], sizes = [8, 8, 16], strides = [1, 1, 1]} : vector<8x24x16xbf16> to vector<8x8x16xbf16>
    %219 = vector.shape_cast %218 : vector<8x8x16xbf16> to vector<64x16xbf16>
    %c3_140 = arith.constant 3 : index
    %c0_141 = arith.constant 0 : index
    %c0_142 = arith.constant 0 : index
    %220 = vector.load %arg14[%c3_140, %c0_141, %c0_142] : memref<7x16x16xbf16, #tpu.memory_space<vmem>>, vector<1x16x16xbf16>
    %221 = vector.shape_cast %220 : vector<1x16x16xbf16> to vector<16x16xbf16>
    %cst_143 = arith.constant dense<0.000000e+00> : vector<64x16xf32>
    %222 = tpu.matmul %219, %221, %cst_143 {dimension_numbers = #tpu.dot_dimension_numbers<[1], [0], [0], [1], [0, 0, 1, 1], [], []>} : vector<64x16xbf16>, vector<16x16xbf16>, vector<64x16xf32> -> vector<64x16xf32>
    %223 = arith.addf %217, %222 : vector<64x16xf32>
    %224 = vector.extract_strided_slice %198 {offsets = [0, 9, 0], sizes = [8, 8, 16], strides = [1, 1, 1]} : vector<8x24x16xbf16> to vector<8x8x16xbf16>
    %225 = vector.shape_cast %224 : vector<8x8x16xbf16> to vector<64x16xbf16>
    %c4_144 = arith.constant 4 : index
    %c0_145 = arith.constant 0 : index
    %c0_146 = arith.constant 0 : index
    %226 = vector.load %arg14[%c4_144, %c0_145, %c0_146] : memref<7x16x16xbf16, #tpu.memory_space<vmem>>, vector<1x16x16xbf16>
    %227 = vector.shape_cast %226 : vector<1x16x16xbf16> to vector<16x16xbf16>
    %cst_147 = arith.constant dense<0.000000e+00> : vector<64x16xf32>
    %228 = tpu.matmul %225, %227, %cst_147 {dimension_numbers = #tpu.dot_dimension_numbers<[1], [0], [0], [1], [0, 0, 1, 1], [], []>} : vector<64x16xbf16>, vector<16x16xbf16>, vector<64x16xf32> -> vector<64x16xf32>
    %229 = arith.addf %223, %228 : vector<64x16xf32>
    %230 = vector.extract_strided_slice %198 {offsets = [0, 10, 0], sizes = [8, 8, 16], strides = [1, 1, 1]} : vector<8x24x16xbf16> to vector<8x8x16xbf16>
    %231 = vector.shape_cast %230 : vector<8x8x16xbf16> to vector<64x16xbf16>
    %c5_148 = arith.constant 5 : index
    %c0_149 = arith.constant 0 : index
    %c0_150 = arith.constant 0 : index
    %232 = vector.load %arg14[%c5_148, %c0_149, %c0_150] : memref<7x16x16xbf16, #tpu.memory_space<vmem>>, vector<1x16x16xbf16>
    %233 = vector.shape_cast %232 : vector<1x16x16xbf16> to vector<16x16xbf16>
    %cst_151 = arith.constant dense<0.000000e+00> : vector<64x16xf32>
    %234 = tpu.matmul %231, %233, %cst_151 {dimension_numbers = #tpu.dot_dimension_numbers<[1], [0], [0], [1], [0, 0, 1, 1], [], []>} : vector<64x16xbf16>, vector<16x16xbf16>, vector<64x16xf32> -> vector<64x16xf32>
    %235 = arith.addf %229, %234 : vector<64x16xf32>
    %236 = vector.extract_strided_slice %198 {offsets = [0, 11, 0], sizes = [8, 8, 16], strides = [1, 1, 1]} : vector<8x24x16xbf16> to vector<8x8x16xbf16>
    %237 = vector.shape_cast %236 : vector<8x8x16xbf16> to vector<64x16xbf16>
    %c6_152 = arith.constant 6 : index
    %c0_153 = arith.constant 0 : index
    %c0_154 = arith.constant 0 : index
    %238 = vector.load %arg14[%c6_152, %c0_153, %c0_154] : memref<7x16x16xbf16, #tpu.memory_space<vmem>>, vector<1x16x16xbf16>
    %239 = vector.shape_cast %238 : vector<1x16x16xbf16> to vector<16x16xbf16>
    %cst_155 = arith.constant dense<0.000000e+00> : vector<64x16xf32>
    %240 = tpu.matmul %237, %239, %cst_155 {dimension_numbers = #tpu.dot_dimension_numbers<[1], [0], [0], [1], [0, 0, 1, 1], [], []>} : vector<64x16xbf16>, vector<16x16xbf16>, vector<64x16xf32> -> vector<64x16xf32>
    %241 = arith.addf %235, %240 : vector<64x16xf32>
    %c0_156 = arith.constant 0 : index
    %c0_157 = arith.constant 0 : index
    %242 = vector.load %arg15[%c0_156, %c0_157] : memref<1x16xf32, #tpu.memory_space<vmem>>, vector<1x16xf32>
    %243 = vector.broadcast %242 : vector<1x16xf32> to vector<64x16xf32>
    %244 = arith.addf %241, %243 : vector<64x16xf32>
    %cst_158 = arith.constant 0.000000e+00 : f32
    %245 = vector.broadcast %cst_158 : f32 to vector<64x16xf32>
    %246 = arith.maximumf %244, %245 : vector<64x16xf32>
    %247 = vector.shape_cast %246 : vector<64x16xf32> to vector<8x8x16xf32>
    %248 = arith.truncf %247 : vector<8x8x16xf32> to vector<8x8x16xbf16>
    %cst_159 = arith.constant 0.000000e+00 : bf16
    %249 = vector.broadcast %cst_159 : bf16 to vector<3x8x16xbf16>
    %250 = tpu.concatenate %249, %248, %249 in 0 : vector<3x8x16xbf16>, vector<8x8x16xbf16>, vector<3x8x16xbf16> -> vector<14x8x16xbf16>
    %cst_160 = arith.constant 0.000000e+00 : f32
    %251 = vector.broadcast %cst_160 : f32 to vector<64x16xf32>
    %252 = vector.extract_strided_slice %250 {offsets = [0, 0, 0], sizes = [8, 8, 16], strides = [1, 1, 1]} : vector<14x8x16xbf16> to vector<8x8x16xbf16>
    %253 = vector.shape_cast %252 : vector<8x8x16xbf16> to vector<64x16xbf16>
    %c0_161 = arith.constant 0 : index
    %c0_162 = arith.constant 0 : index
    %c0_163 = arith.constant 0 : index
    %254 = vector.load %arg16[%c0_161, %c0_162, %c0_163] : memref<7x16x16xbf16, #tpu.memory_space<vmem>>, vector<1x16x16xbf16>
    %255 = vector.shape_cast %254 : vector<1x16x16xbf16> to vector<16x16xbf16>
    %cst_164 = arith.constant dense<0.000000e+00> : vector<64x16xf32>
    %256 = tpu.matmul %253, %255, %cst_164 {dimension_numbers = #tpu.dot_dimension_numbers<[1], [0], [0], [1], [0, 0, 1, 1], [], []>} : vector<64x16xbf16>, vector<16x16xbf16>, vector<64x16xf32> -> vector<64x16xf32>
    %257 = arith.addf %251, %256 : vector<64x16xf32>
    %258 = vector.extract_strided_slice %250 {offsets = [1, 0, 0], sizes = [8, 8, 16], strides = [1, 1, 1]} : vector<14x8x16xbf16> to vector<8x8x16xbf16>
    %259 = vector.shape_cast %258 : vector<8x8x16xbf16> to vector<64x16xbf16>
    %c1_165 = arith.constant 1 : index
    %c0_166 = arith.constant 0 : index
    %c0_167 = arith.constant 0 : index
    %260 = vector.load %arg16[%c1_165, %c0_166, %c0_167] : memref<7x16x16xbf16, #tpu.memory_space<vmem>>, vector<1x16x16xbf16>
    %261 = vector.shape_cast %260 : vector<1x16x16xbf16> to vector<16x16xbf16>
    %cst_168 = arith.constant dense<0.000000e+00> : vector<64x16xf32>
    %262 = tpu.matmul %259, %261, %cst_168 {dimension_numbers = #tpu.dot_dimension_numbers<[1], [0], [0], [1], [0, 0, 1, 1], [], []>} : vector<64x16xbf16>, vector<16x16xbf16>, vector<64x16xf32> -> vector<64x16xf32>
    %263 = arith.addf %257, %262 : vector<64x16xf32>
    %264 = vector.extract_strided_slice %250 {offsets = [2, 0, 0], sizes = [8, 8, 16], strides = [1, 1, 1]} : vector<14x8x16xbf16> to vector<8x8x16xbf16>
    %265 = vector.shape_cast %264 : vector<8x8x16xbf16> to vector<64x16xbf16>
    %c2_169 = arith.constant 2 : index
    %c0_170 = arith.constant 0 : index
    %c0_171 = arith.constant 0 : index
    %266 = vector.load %arg16[%c2_169, %c0_170, %c0_171] : memref<7x16x16xbf16, #tpu.memory_space<vmem>>, vector<1x16x16xbf16>
    %267 = vector.shape_cast %266 : vector<1x16x16xbf16> to vector<16x16xbf16>
    %cst_172 = arith.constant dense<0.000000e+00> : vector<64x16xf32>
    %268 = tpu.matmul %265, %267, %cst_172 {dimension_numbers = #tpu.dot_dimension_numbers<[1], [0], [0], [1], [0, 0, 1, 1], [], []>} : vector<64x16xbf16>, vector<16x16xbf16>, vector<64x16xf32> -> vector<64x16xf32>
    %269 = arith.addf %263, %268 : vector<64x16xf32>
    %270 = vector.extract_strided_slice %250 {offsets = [3, 0, 0], sizes = [8, 8, 16], strides = [1, 1, 1]} : vector<14x8x16xbf16> to vector<8x8x16xbf16>
    %271 = vector.shape_cast %270 : vector<8x8x16xbf16> to vector<64x16xbf16>
    %c3_173 = arith.constant 3 : index
    %c0_174 = arith.constant 0 : index
    %c0_175 = arith.constant 0 : index
    %272 = vector.load %arg16[%c3_173, %c0_174, %c0_175] : memref<7x16x16xbf16, #tpu.memory_space<vmem>>, vector<1x16x16xbf16>
    %273 = vector.shape_cast %272 : vector<1x16x16xbf16> to vector<16x16xbf16>
    %cst_176 = arith.constant dense<0.000000e+00> : vector<64x16xf32>
    %274 = tpu.matmul %271, %273, %cst_176 {dimension_numbers = #tpu.dot_dimension_numbers<[1], [0], [0], [1], [0, 0, 1, 1], [], []>} : vector<64x16xbf16>, vector<16x16xbf16>, vector<64x16xf32> -> vector<64x16xf32>
    %275 = arith.addf %269, %274 : vector<64x16xf32>
    %276 = vector.extract_strided_slice %250 {offsets = [4, 0, 0], sizes = [8, 8, 16], strides = [1, 1, 1]} : vector<14x8x16xbf16> to vector<8x8x16xbf16>
    %277 = vector.shape_cast %276 : vector<8x8x16xbf16> to vector<64x16xbf16>
    %c4_177 = arith.constant 4 : index
    %c0_178 = arith.constant 0 : index
    %c0_179 = arith.constant 0 : index
    %278 = vector.load %arg16[%c4_177, %c0_178, %c0_179] : memref<7x16x16xbf16, #tpu.memory_space<vmem>>, vector<1x16x16xbf16>
    %279 = vector.shape_cast %278 : vector<1x16x16xbf16> to vector<16x16xbf16>
    %cst_180 = arith.constant dense<0.000000e+00> : vector<64x16xf32>
    %280 = tpu.matmul %277, %279, %cst_180 {dimension_numbers = #tpu.dot_dimension_numbers<[1], [0], [0], [1], [0, 0, 1, 1], [], []>} : vector<64x16xbf16>, vector<16x16xbf16>, vector<64x16xf32> -> vector<64x16xf32>
    %281 = arith.addf %275, %280 : vector<64x16xf32>
    %282 = vector.extract_strided_slice %250 {offsets = [5, 0, 0], sizes = [8, 8, 16], strides = [1, 1, 1]} : vector<14x8x16xbf16> to vector<8x8x16xbf16>
    %283 = vector.shape_cast %282 : vector<8x8x16xbf16> to vector<64x16xbf16>
    %c5_181 = arith.constant 5 : index
    %c0_182 = arith.constant 0 : index
    %c0_183 = arith.constant 0 : index
    %284 = vector.load %arg16[%c5_181, %c0_182, %c0_183] : memref<7x16x16xbf16, #tpu.memory_space<vmem>>, vector<1x16x16xbf16>
    %285 = vector.shape_cast %284 : vector<1x16x16xbf16> to vector<16x16xbf16>
    %cst_184 = arith.constant dense<0.000000e+00> : vector<64x16xf32>
    %286 = tpu.matmul %283, %285, %cst_184 {dimension_numbers = #tpu.dot_dimension_numbers<[1], [0], [0], [1], [0, 0, 1, 1], [], []>} : vector<64x16xbf16>, vector<16x16xbf16>, vector<64x16xf32> -> vector<64x16xf32>
    %287 = arith.addf %281, %286 : vector<64x16xf32>
    %288 = vector.extract_strided_slice %250 {offsets = [6, 0, 0], sizes = [8, 8, 16], strides = [1, 1, 1]} : vector<14x8x16xbf16> to vector<8x8x16xbf16>
    %289 = vector.shape_cast %288 : vector<8x8x16xbf16> to vector<64x16xbf16>
    %c6_185 = arith.constant 6 : index
    %c0_186 = arith.constant 0 : index
    %c0_187 = arith.constant 0 : index
    %290 = vector.load %arg16[%c6_185, %c0_186, %c0_187] : memref<7x16x16xbf16, #tpu.memory_space<vmem>>, vector<1x16x16xbf16>
    %291 = vector.shape_cast %290 : vector<1x16x16xbf16> to vector<16x16xbf16>
    %cst_188 = arith.constant dense<0.000000e+00> : vector<64x16xf32>
    %292 = tpu.matmul %289, %291, %cst_188 {dimension_numbers = #tpu.dot_dimension_numbers<[1], [0], [0], [1], [0, 0, 1, 1], [], []>} : vector<64x16xbf16>, vector<16x16xbf16>, vector<64x16xf32> -> vector<64x16xf32>
    %293 = arith.addf %287, %292 : vector<64x16xf32>
    %c0_189 = arith.constant 0 : index
    %c0_190 = arith.constant 0 : index
    %294 = vector.load %arg17[%c0_189, %c0_190] : memref<1x16xf32, #tpu.memory_space<vmem>>, vector<1x16xf32>
    %295 = vector.broadcast %294 : vector<1x16xf32> to vector<64x16xf32>
    %296 = arith.addf %293, %295 : vector<64x16xf32>
    %cst_191 = arith.constant 0.000000e+00 : f32
    %297 = vector.broadcast %cst_191 : f32 to vector<64x16xf32>
    %298 = arith.maximumf %296, %297 : vector<64x16xf32>
    %299 = vector.shape_cast %298 : vector<64x16xf32> to vector<8x8x16xf32>
    %300 = arith.truncf %299 : vector<8x8x16xf32> to vector<8x8x16xbf16>
    %cst_192 = arith.constant 0.000000e+00 : bf16
    %301 = vector.broadcast %cst_192 : bf16 to vector<8x8x16xbf16>
    %302 = tpu.concatenate %301, %300, %301 in 1 : vector<8x8x16xbf16>, vector<8x8x16xbf16>, vector<8x8x16xbf16> -> vector<8x24x16xbf16>
    %cst_193 = arith.constant 0.000000e+00 : f32
    %303 = vector.broadcast %cst_193 : f32 to vector<64x192xf32>
    %304 = vector.extract_strided_slice %302 {offsets = [0, 5, 0], sizes = [8, 8, 16], strides = [1, 1, 1]} : vector<8x24x16xbf16> to vector<8x8x16xbf16>
    %305 = vector.shape_cast %304 : vector<8x8x16xbf16> to vector<64x16xbf16>
    %c0_194 = arith.constant 0 : index
    %c0_195 = arith.constant 0 : index
    %c0_196 = arith.constant 0 : index
    %306 = vector.load %arg18[%c0_194, %c0_195, %c0_196] : memref<7x16x192xbf16, #tpu.memory_space<vmem>>, vector<1x16x192xbf16>
    %307 = vector.shape_cast %306 : vector<1x16x192xbf16> to vector<16x192xbf16>
    %cst_197 = arith.constant dense<0.000000e+00> : vector<64x192xf32>
    %308 = tpu.matmul %305, %307, %cst_197 {dimension_numbers = #tpu.dot_dimension_numbers<[1], [0], [0], [1], [0, 0, 1, 1], [], []>} : vector<64x16xbf16>, vector<16x192xbf16>, vector<64x192xf32> -> vector<64x192xf32>
    %309 = arith.addf %303, %308 : vector<64x192xf32>
    %310 = vector.extract_strided_slice %302 {offsets = [0, 6, 0], sizes = [8, 8, 16], strides = [1, 1, 1]} : vector<8x24x16xbf16> to vector<8x8x16xbf16>
    %311 = vector.shape_cast %310 : vector<8x8x16xbf16> to vector<64x16xbf16>
    %c1_198 = arith.constant 1 : index
    %c0_199 = arith.constant 0 : index
    %c0_200 = arith.constant 0 : index
    %312 = vector.load %arg18[%c1_198, %c0_199, %c0_200] : memref<7x16x192xbf16, #tpu.memory_space<vmem>>, vector<1x16x192xbf16>
    %313 = vector.shape_cast %312 : vector<1x16x192xbf16> to vector<16x192xbf16>
    %cst_201 = arith.constant dense<0.000000e+00> : vector<64x192xf32>
    %314 = tpu.matmul %311, %313, %cst_201 {dimension_numbers = #tpu.dot_dimension_numbers<[1], [0], [0], [1], [0, 0, 1, 1], [], []>} : vector<64x16xbf16>, vector<16x192xbf16>, vector<64x192xf32> -> vector<64x192xf32>
    %315 = arith.addf %309, %314 : vector<64x192xf32>
    %316 = vector.extract_strided_slice %302 {offsets = [0, 7, 0], sizes = [8, 8, 16], strides = [1, 1, 1]} : vector<8x24x16xbf16> to vector<8x8x16xbf16>
    %317 = vector.shape_cast %316 : vector<8x8x16xbf16> to vector<64x16xbf16>
    %c2_202 = arith.constant 2 : index
    %c0_203 = arith.constant 0 : index
    %c0_204 = arith.constant 0 : index
    %318 = vector.load %arg18[%c2_202, %c0_203, %c0_204] : memref<7x16x192xbf16, #tpu.memory_space<vmem>>, vector<1x16x192xbf16>
    %319 = vector.shape_cast %318 : vector<1x16x192xbf16> to vector<16x192xbf16>
    %cst_205 = arith.constant dense<0.000000e+00> : vector<64x192xf32>
    %320 = tpu.matmul %317, %319, %cst_205 {dimension_numbers = #tpu.dot_dimension_numbers<[1], [0], [0], [1], [0, 0, 1, 1], [], []>} : vector<64x16xbf16>, vector<16x192xbf16>, vector<64x192xf32> -> vector<64x192xf32>
    %321 = arith.addf %315, %320 : vector<64x192xf32>
    %322 = vector.extract_strided_slice %302 {offsets = [0, 8, 0], sizes = [8, 8, 16], strides = [1, 1, 1]} : vector<8x24x16xbf16> to vector<8x8x16xbf16>
    %323 = vector.shape_cast %322 : vector<8x8x16xbf16> to vector<64x16xbf16>
    %c3_206 = arith.constant 3 : index
    %c0_207 = arith.constant 0 : index
    %c0_208 = arith.constant 0 : index
    %324 = vector.load %arg18[%c3_206, %c0_207, %c0_208] : memref<7x16x192xbf16, #tpu.memory_space<vmem>>, vector<1x16x192xbf16>
    %325 = vector.shape_cast %324 : vector<1x16x192xbf16> to vector<16x192xbf16>
    %cst_209 = arith.constant dense<0.000000e+00> : vector<64x192xf32>
    %326 = tpu.matmul %323, %325, %cst_209 {dimension_numbers = #tpu.dot_dimension_numbers<[1], [0], [0], [1], [0, 0, 1, 1], [], []>} : vector<64x16xbf16>, vector<16x192xbf16>, vector<64x192xf32> -> vector<64x192xf32>
    %327 = arith.addf %321, %326 : vector<64x192xf32>
    %328 = vector.extract_strided_slice %302 {offsets = [0, 9, 0], sizes = [8, 8, 16], strides = [1, 1, 1]} : vector<8x24x16xbf16> to vector<8x8x16xbf16>
    %329 = vector.shape_cast %328 : vector<8x8x16xbf16> to vector<64x16xbf16>
    %c4_210 = arith.constant 4 : index
    %c0_211 = arith.constant 0 : index
    %c0_212 = arith.constant 0 : index
    %330 = vector.load %arg18[%c4_210, %c0_211, %c0_212] : memref<7x16x192xbf16, #tpu.memory_space<vmem>>, vector<1x16x192xbf16>
    %331 = vector.shape_cast %330 : vector<1x16x192xbf16> to vector<16x192xbf16>
    %cst_213 = arith.constant dense<0.000000e+00> : vector<64x192xf32>
    %332 = tpu.matmul %329, %331, %cst_213 {dimension_numbers = #tpu.dot_dimension_numbers<[1], [0], [0], [1], [0, 0, 1, 1], [], []>} : vector<64x16xbf16>, vector<16x192xbf16>, vector<64x192xf32> -> vector<64x192xf32>
    %333 = arith.addf %327, %332 : vector<64x192xf32>
    %334 = vector.extract_strided_slice %302 {offsets = [0, 10, 0], sizes = [8, 8, 16], strides = [1, 1, 1]} : vector<8x24x16xbf16> to vector<8x8x16xbf16>
    %335 = vector.shape_cast %334 : vector<8x8x16xbf16> to vector<64x16xbf16>
    %c5_214 = arith.constant 5 : index
    %c0_215 = arith.constant 0 : index
    %c0_216 = arith.constant 0 : index
    %336 = vector.load %arg18[%c5_214, %c0_215, %c0_216] : memref<7x16x192xbf16, #tpu.memory_space<vmem>>, vector<1x16x192xbf16>
    %337 = vector.shape_cast %336 : vector<1x16x192xbf16> to vector<16x192xbf16>
    %cst_217 = arith.constant dense<0.000000e+00> : vector<64x192xf32>
    %338 = tpu.matmul %335, %337, %cst_217 {dimension_numbers = #tpu.dot_dimension_numbers<[1], [0], [0], [1], [0, 0, 1, 1], [], []>} : vector<64x16xbf16>, vector<16x192xbf16>, vector<64x192xf32> -> vector<64x192xf32>
    %339 = arith.addf %333, %338 : vector<64x192xf32>
    %340 = vector.extract_strided_slice %302 {offsets = [0, 11, 0], sizes = [8, 8, 16], strides = [1, 1, 1]} : vector<8x24x16xbf16> to vector<8x8x16xbf16>
    %341 = vector.shape_cast %340 : vector<8x8x16xbf16> to vector<64x16xbf16>
    %c6_218 = arith.constant 6 : index
    %c0_219 = arith.constant 0 : index
    %c0_220 = arith.constant 0 : index
    %342 = vector.load %arg18[%c6_218, %c0_219, %c0_220] : memref<7x16x192xbf16, #tpu.memory_space<vmem>>, vector<1x16x192xbf16>
    %343 = vector.shape_cast %342 : vector<1x16x192xbf16> to vector<16x192xbf16>
    %cst_221 = arith.constant dense<0.000000e+00> : vector<64x192xf32>
    %344 = tpu.matmul %341, %343, %cst_221 {dimension_numbers = #tpu.dot_dimension_numbers<[1], [0], [0], [1], [0, 0, 1, 1], [], []>} : vector<64x16xbf16>, vector<16x192xbf16>, vector<64x192xf32> -> vector<64x192xf32>
    %345 = arith.addf %339, %344 : vector<64x192xf32>
    %c0_222 = arith.constant 0 : index
    %c0_223 = arith.constant 0 : index
    %346 = vector.load %arg19[%c0_222, %c0_223] : memref<1x192xf32, #tpu.memory_space<vmem>>, vector<1x192xf32>
    %347 = vector.broadcast %346 : vector<1x192xf32> to vector<64x192xf32>
    %348 = arith.addf %345, %347 : vector<64x192xf32>
    %cst_224 = arith.constant 0.000000e+00 : f32
    %349 = vector.broadcast %cst_224 : f32 to vector<64x192xf32>
    %350 = arith.maximumf %348, %349 : vector<64x192xf32>
    %351 = vector.shape_cast %350 : vector<64x192xf32> to vector<8x8x192xf32>
    %352 = arith.truncf %351 : vector<8x8x192xf32> to vector<8x8x192xbf16>
    %c0_225 = arith.constant 0 : index
    %c2_226 = arith.constant 2 : index
    %c0_227 = arith.constant 0 : index
    %c0_228 = arith.constant 0 : index
    %c0_229 = arith.constant 0 : index
    %353 = vector.load %arg22[%c0_225, %c2_226, %c0_227, %c0_228, %c0_229] : memref<1x4x8x8x192xbf16, #tpu.memory_space<vmem>>, vector<1x1x8x8x192xbf16>
    %354 = vector.shape_cast %353 : vector<1x1x8x8x192xbf16> to vector<8x8x192xbf16>
    %355 = vector.shape_cast %352 : vector<8x8x192xbf16> to vector<1x1x8x8x192xbf16>
    tpu.vector_store %arg22[%c0_225, %c2_226, %c0_227, %c0_228, %c0_229], %355 {strides = array<i32>} : memref<1x4x8x8x192xbf16, #tpu.memory_space<vmem>>, vector<1x1x8x8x192xbf16>,
    %cst_230 = arith.constant 0.000000e+00 : bf16
    %356 = vector.broadcast %cst_230 : bf16 to vector<1x8x32xbf16>
    %357 = tpu.concatenate %356, %1, %356 in 0 : vector<1x8x32xbf16>, vector<8x8x32xbf16>, vector<1x8x32xbf16> -> vector<10x8x32xbf16>
    %cst_231 = arith.constant 0.000000e+00 : bf16
    %358 = vector.broadcast %cst_231 : bf16 to vector<10x8x32xbf16>
    %359 = tpu.concatenate %358, %357, %358 in 1 : vector<10x8x32xbf16>, vector<10x8x32xbf16>, vector<10x8x32xbf16> -> vector<10x24x32xbf16>
    %360 = vector.extract_strided_slice %359 {offsets = [0, 0, 0], sizes = [8, 24, 32], strides = [1, 1, 1]} : vector<10x24x32xbf16> to vector<8x24x32xbf16>
    %361 = arith.extf %360 : vector<8x24x32xbf16> to vector<8x24x32xf32>
    %362 = vector.extract_strided_slice %359 {offsets = [1, 0, 0], sizes = [8, 24, 32], strides = [1, 1, 1]} : vector<10x24x32xbf16> to vector<8x24x32xbf16>
    %363 = arith.extf %362 : vector<8x24x32xbf16> to vector<8x24x32xf32>
    %364 = arith.addf %361, %363 : vector<8x24x32xf32>
    %365 = vector.extract_strided_slice %359 {offsets = [2, 0, 0], sizes = [8, 24, 32], strides = [1, 1, 1]} : vector<10x24x32xbf16> to vector<8x24x32xbf16>
    %366 = arith.extf %365 : vector<8x24x32xbf16> to vector<8x24x32xf32>
    %367 = arith.addf %364, %366 : vector<8x24x32xf32>
    %368 = vector.extract_strided_slice %367 {offsets = [0, 7, 0], sizes = [8, 8, 32], strides = [1, 1, 1]} : vector<8x24x32xf32> to vector<8x8x32xf32>
    %369 = vector.extract_strided_slice %367 {offsets = [0, 8, 0], sizes = [8, 8, 32], strides = [1, 1, 1]} : vector<8x24x32xf32> to vector<8x8x32xf32>
    %370 = arith.addf %368, %369 : vector<8x8x32xf32>
    %371 = vector.extract_strided_slice %367 {offsets = [0, 9, 0], sizes = [8, 8, 32], strides = [1, 1, 1]} : vector<8x24x32xf32> to vector<8x8x32xf32>
    %372 = arith.addf %370, %371 : vector<8x8x32xf32>
    %373 = arith.truncf %372 : vector<8x8x32xf32> to vector<8x8x32xbf16>
    %374 = vector.shape_cast %373 : vector<8x8x32xbf16> to vector<64x32xbf16>
    %c0_232 = arith.constant 0 : index
    %c0_233 = arith.constant 0 : index
    %c0_234 = arith.constant 0 : index
    %375 = vector.load %arg20[%c0_232, %c0_233, %c0_234] : memref<1x32x192xbf16, #tpu.memory_space<vmem>>, vector<1x32x192xbf16>
    %376 = vector.shape_cast %375 : vector<1x32x192xbf16> to vector<32x192xbf16>
    %cst_235 = arith.constant dense<0.000000e+00> : vector<64x192xf32>
    %377 = tpu.matmul %374, %376, %cst_235 {dimension_numbers = #tpu.dot_dimension_numbers<[1], [0], [0], [1], [0, 0, 1, 1], [], []>} : vector<64x32xbf16>, vector<32x192xbf16>, vector<64x192xf32> -> vector<64x192xf32>
    %c0_236 = arith.constant 0 : index
    %c0_237 = arith.constant 0 : index
    %378 = vector.load %arg21[%c0_236, %c0_237] : memref<1x192xf32, #tpu.memory_space<vmem>>, vector<1x192xf32>
    %379 = vector.broadcast %378 : vector<1x192xf32> to vector<64x192xf32>
    %380 = arith.addf %377, %379 : vector<64x192xf32>
    %cst_238 = arith.constant 0.000000e+00 : f32
    %381 = vector.broadcast %cst_238 : f32 to vector<64x192xf32>
    %382 = arith.maximumf %380, %381 : vector<64x192xf32>
    %383 = vector.shape_cast %382 : vector<64x192xf32> to vector<8x8x192xf32>
    %384 = arith.truncf %383 : vector<8x8x192xf32> to vector<8x8x192xbf16>
    %c0_239 = arith.constant 0 : index
    %c3_240 = arith.constant 3 : index
    %c0_241 = arith.constant 0 : index
    %c0_242 = arith.constant 0 : index
    %c0_243 = arith.constant 0 : index
    %385 = vector.load %arg22[%c0_239, %c3_240, %c0_241, %c0_242, %c0_243] : memref<1x4x8x8x192xbf16, #tpu.memory_space<vmem>>, vector<1x1x8x8x192xbf16>
    %386 = vector.shape_cast %385 : vector<1x1x8x8x192xbf16> to vector<8x8x192xbf16>
    %387 = vector.shape_cast %384 : vector<8x8x192xbf16> to vector<1x1x8x8x192xbf16>
    tpu.vector_store %arg22[%c0_239, %c3_240, %c0_241, %c0_242, %c0_243], %387 {strides = array<i32>} : memref<1x4x8x8x192xbf16, #tpu.memory_space<vmem>>, vector<1x1x8x8x192xbf16>,
    return
  }
  func.func @transform_0(%arg0: i32) -> (i32, i32, i32, i32) {
    %c0_i32 = arith.constant 0 : i32
    %c0_i32_0 = arith.constant 0 : i32
    %c0_i32_1 = arith.constant 0 : i32
    %c0_i32_2 = arith.constant 0 : i32
    return %arg0, %c0_i32, %c0_i32_0, %c0_i32_1 : i32, i32, i32, i32
  }
  func.func @transform_1(%arg0: i32) -> (i32, i32, i32) {
    %c0_i32 = arith.constant 0 : i32
    %c0_i32_0 = arith.constant 0 : i32
    %c0_i32_1 = arith.constant 0 : i32
    %c0_i32_2 = arith.constant 0 : i32
    return %c0_i32, %c0_i32_0, %c0_i32_1 : i32, i32, i32
  }
  func.func @transform_2(%arg0: i32) -> (i32, i32) {
    %c0_i32 = arith.constant 0 : i32
    %c0_i32_0 = arith.constant 0 : i32
    %c0_i32_1 = arith.constant 0 : i32
    return %c0_i32, %c0_i32_0 : i32, i32
  }
  func.func @transform_3(%arg0: i32) -> (i32, i32, i32) {
    %c0_i32 = arith.constant 0 : i32
    %c0_i32_0 = arith.constant 0 : i32
    %c0_i32_1 = arith.constant 0 : i32
    %c0_i32_2 = arith.constant 0 : i32
    return %c0_i32, %c0_i32_0, %c0_i32_1 : i32, i32, i32
  }
  func.func @transform_4(%arg0: i32) -> (i32, i32) {
    %c0_i32 = arith.constant 0 : i32
    %c0_i32_0 = arith.constant 0 : i32
    %c0_i32_1 = arith.constant 0 : i32
    return %c0_i32, %c0_i32_0 : i32, i32
  }
  func.func @transform_5(%arg0: i32) -> (i32, i32, i32) {
    %c0_i32 = arith.constant 0 : i32
    %c0_i32_0 = arith.constant 0 : i32
    %c0_i32_1 = arith.constant 0 : i32
    %c0_i32_2 = arith.constant 0 : i32
    return %c0_i32, %c0_i32_0, %c0_i32_1 : i32, i32, i32
  }
  func.func @transform_6(%arg0: i32) -> (i32, i32) {
    %c0_i32 = arith.constant 0 : i32
    %c0_i32_0 = arith.constant 0 : i32
    %c0_i32_1 = arith.constant 0 : i32
    return %c0_i32, %c0_i32_0 : i32, i32
  }
  func.func @transform_7(%arg0: i32) -> (i32, i32, i32) {
    %c0_i32 = arith.constant 0 : i32
    %c0_i32_0 = arith.constant 0 : i32
    %c0_i32_1 = arith.constant 0 : i32
    %c0_i32_2 = arith.constant 0 : i32
    return %c0_i32, %c0_i32_0, %c0_i32_1 : i32, i32, i32
  }
  func.func @transform_8(%arg0: i32) -> (i32, i32) {
    %c0_i32 = arith.constant 0 : i32
    %c0_i32_0 = arith.constant 0 : i32
    %c0_i32_1 = arith.constant 0 : i32
    return %c0_i32, %c0_i32_0 : i32, i32
  }
  func.func @transform_9(%arg0: i32) -> (i32, i32, i32) {
    %c0_i32 = arith.constant 0 : i32
    %c0_i32_0 = arith.constant 0 : i32
    %c0_i32_1 = arith.constant 0 : i32
    %c0_i32_2 = arith.constant 0 : i32
    return %c0_i32, %c0_i32_0, %c0_i32_1 : i32, i32, i32
  }
  func.func @transform_10(%arg0: i32) -> (i32, i32) {
    %c0_i32 = arith.constant 0 : i32
    %c0_i32_0 = arith.constant 0 : i32
    %c0_i32_1 = arith.constant 0 : i32
    return %c0_i32, %c0_i32_0 : i32, i32
  }
  func.func @transform_11(%arg0: i32) -> (i32, i32, i32) {
    %c0_i32 = arith.constant 0 : i32
    %c0_i32_0 = arith.constant 0 : i32
    %c0_i32_1 = arith.constant 0 : i32
    %c0_i32_2 = arith.constant 0 : i32
    return %c0_i32, %c0_i32_0, %c0_i32_1 : i32, i32, i32
  }
  func.func @transform_12(%arg0: i32) -> (i32, i32) {
    %c0_i32 = arith.constant 0 : i32
    %c0_i32_0 = arith.constant 0 : i32
    %c0_i32_1 = arith.constant 0 : i32
    return %c0_i32, %c0_i32_0 : i32, i32
  }
  func.func @transform_13(%arg0: i32) -> (i32, i32, i32) {
    %c0_i32 = arith.constant 0 : i32
    %c0_i32_0 = arith.constant 0 : i32
    %c0_i32_1 = arith.constant 0 : i32
    %c0_i32_2 = arith.constant 0 : i32
    return %c0_i32, %c0_i32_0, %c0_i32_1 : i32, i32, i32
  }
  func.func @transform_14(%arg0: i32) -> (i32, i32) {
    %c0_i32 = arith.constant 0 : i32
    %c0_i32_0 = arith.constant 0 : i32
    %c0_i32_1 = arith.constant 0 : i32
    return %c0_i32, %c0_i32_0 : i32, i32
  }
  func.func @transform_15(%arg0: i32) -> (i32, i32, i32) {
    %c0_i32 = arith.constant 0 : i32
    %c0_i32_0 = arith.constant 0 : i32
    %c0_i32_1 = arith.constant 0 : i32
    %c0_i32_2 = arith.constant 0 : i32
    return %c0_i32, %c0_i32_0, %c0_i32_1 : i32, i32, i32
  }
  func.func @transform_16(%arg0: i32) -> (i32, i32) {
    %c0_i32 = arith.constant 0 : i32
    %c0_i32_0 = arith.constant 0 : i32
    %c0_i32_1 = arith.constant 0 : i32
    return %c0_i32, %c0_i32_0 : i32, i32
  }
  func.func @transform_17(%arg0: i32) -> (i32, i32, i32) {
    %c0_i32 = arith.constant 0 : i32
    %c0_i32_0 = arith.constant 0 : i32
    %c0_i32_1 = arith.constant 0 : i32
    %c0_i32_2 = arith.constant 0 : i32
    return %c0_i32, %c0_i32_0, %c0_i32_1 : i32, i32, i32
  }
  func.func @transform_18(%arg0: i32) -> (i32, i32) {
    %c0_i32 = arith.constant 0 : i32
    %c0_i32_0 = arith.constant 0 : i32
    %c0_i32_1 = arith.constant 0 : i32
    return %c0_i32, %c0_i32_0 : i32, i32
  }
  func.func @transform_19(%arg0: i32) -> (i32, i32, i32) {
    %c0_i32 = arith.constant 0 : i32
    %c0_i32_0 = arith.constant 0 : i32
    %c0_i32_1 = arith.constant 0 : i32
    %c0_i32_2 = arith.constant 0 : i32
    return %c0_i32, %c0_i32_0, %c0_i32_1 : i32, i32, i32
  }
  func.func @transform_20(%arg0: i32) -> (i32, i32) {
    %c0_i32 = arith.constant 0 : i32
    %c0_i32_0 = arith.constant 0 : i32
    %c0_i32_1 = arith.constant 0 : i32
    return %c0_i32, %c0_i32_0 : i32, i32
  }
  func.func @transform_21(%arg0: i32) -> (i32, i32, i32, i32, i32) {
    %c0_i32 = arith.constant 0 : i32
    %c0_i32_0 = arith.constant 0 : i32
    %c0_i32_1 = arith.constant 0 : i32
    %c0_i32_2 = arith.constant 0 : i32
    %c0_i32_3 = arith.constant 0 : i32
    return %arg0, %c0_i32, %c0_i32_0, %c0_i32_1, %c0_i32_2 : i32, i32, i32, i32, i32
  }
}

</mosaic_0001>

<bundles_post_ra>
// kernel: inception_c_forward.1
= control target key start
LH: loop header
LB: loop body
LE: loop exit
PB: predicated region body
PF: predicated region fallthrough
CT: control target
= control target key end

     0   :  { %s12907_s0 = inlined_call_operand.vmem [shape: bf16[2,8,8,32], index: 0, kind: input, shape index: {}]   ;;  %s12908_s1 = inlined_call_operand.hbm [shape: bf16[1,32,192], index: 1, kind: input, shape index: {}]   ;;  %s12909_s2 = inlined_call_operand.hbm [shape: f32[1,192], index: 2, kind: input, shape index: {}]   ;;  %s12910_s3 = inlined_call_operand.vmem [shape: bf16[1,32,16], index: 3, kind: input, shape index: {}]   ;;  %s12911_s4 = inlined_call_operand.vmem [shape: f32[1,16], index: 4, kind: input, shape index: {}]   ;;  %s12912_s5 = inlined_call_operand.hbm [shape: bf16[7,16,16], index: 5, kind: input, shape index: {}]   ;;  %s12913_s6 = inlined_call_operand.hbm [shape: f32[1,16], index: 6, kind: input, shape index: {}]   ;;  %s12914_s7 = inlined_call_operand.vmem [shape: bf16[7,16,192], index: 7, kind: input, shape index: {}]   ;;  %s12915_s8 = inlined_call_operand.hbm [shape: f32[1,192], index: 8, kind: input, shape index: {}]   ;;  %s12916_s9 = inlined_call_operand.vmem [shape: bf16[1,32,16], index: 9, kind: input, shape index: {}]   ;;  %s12917_s10 = inlined_call_operand.hbm [shape: f32[1,16], index: 10, kind: input, shape index: {}]   ;;  %s12918_s11 = inlined_call_operand.vmem [shape: bf16[7,16,16], index: 11, kind: input, shape index: {}]   ;;  %s12919_s12 = inlined_call_operand.hbm [shape: f32[1,16], index: 12, kind: input, shape index: {}]   ;;  %s12920_s13 = inlined_call_operand.hbm [shape: bf16[7,16,16], index: 13, kind: input, shape index: {}]   ;;  %s12921_s14 = inlined_call_operand.hbm [shape: f32[1,16], index: 14, kind: input, shape index: {}]   ;;  %s12922_s15 = inlined_call_operand.hbm [shape: bf16[7,16,16], index: 15, kind: input, shape index: {}]   ;;  %s12923_s16 = inlined_call_operand.vmem [shape: f32[1,16], index: 16, kind: input, shape index: {}]   ;;  %s12924_s17 = inlined_call_operand.vmem [shape: bf16[7,16,192], index: 17, kind: input, shape index: {}]   ;;  %s12925_s18 = inlined_call_operand.vmem [shape: f32[1,192], index: 18, kind: input, shape index: {}]   ;;  %s12926_s19 = inlined_call_operand.hbm [shape: bf16[1,32,192], index: 19, kind: input, shape index: {}]   ;;  %s12927_s20 = inlined_call_operand.vmem [shape: f32[1,192], index: 20, kind: input, shape index: {}]   ;;  %s12928_s21 = inlined_call_operand.vmem [shape: bf16[2,4,8,8,192], index: 21, kind: output, shape index: {}]  }
   0x1   :  { %13028 = sst [smem:[#allocation67_spill]] %s12907_s0 }
   0x2   :  { %13029 = sst [smem:[#allocation68_spill]] %s12908_s1 }
   0x3   :  { %13030 = sst [smem:[#allocation69_spill]] %s12909_s2 }
   0x4   :  { %13031 = sst [smem:[#allocation70_spill]] %s12910_s3 }
   0x5   :  { %13032 = sst [smem:[#allocation71_spill]] %s12911_s4 }
   0x6   :  { %13033 = sst [smem:[#allocation72_spill]] %s12912_s5 }
   0x7   :  { %13034 = sst [smem:[#allocation73_spill]] %s12913_s6 }
   0x8   :  { %13035 = sst [smem:[#allocation74_spill]] %s12917_s10 }
   0x9   :  { %13036 = sst [smem:[#allocation75_spill]] %s12920_s13 }
   0xa   :  { %13037 = sst [smem:[#allocation76_spill]] %s12922_s15 }
   0xb   :  { %13038 = sst [smem:[#allocation77_spill]] %s12923_s16 }
   0xc   :  { %13039 = sst [smem:[#allocation78_spill]] %s12925_s18 }
   0xd   :  { %13040 = sst [smem:[#allocation79_spill]] %s12927_s20 }
   0xe   :  { %26 = vsyncpa [#allocation3], 0 }
   0xf   :  { %27 = vsyncpa [#allocation5], 0 }
  0x10   :  { %28 = vsyncpa [#allocation8], 0 }
  0x11   :  { %29 = vsyncpa [#allocation11], 0 }
  0x12   :  { %30 = vsyncpa [#allocation14], 0 }
  0x13   :  { %31 = vsyncpa [#allocation17], 0  ;;  %s10004_s2 = smov 0  }
  0x14 LB: > { %13041 = sst [smem:[#allocation25_spill]] %s9876_s2  ;;  %s9878_s25 = smov [#allocation4]   ;;  %s9876_s2 = sphi %s10004_s2, %s37_s2  }
  0x15   : > { %s540_s26 = sshll.u32 %s9878_s25, 4  ;;  %s10010_s27 = sadd.s32 4294967295, %s9876_s2   ;;  %s10015_s26 = int_to_ptr.vmem [resolvable:$true] %s540_s26 }
  0x16   : > { %p7768_p0 = scmp.ge.s32.totalorder %s9876_s2, 1  ;;  %p514_p1 = scmp.lt.s32.totalorder %s9876_s2, 3 }
  0x17   : > { %p12934_p2 = scmp.eq.s32.totalorder %s10010_s27, 0  ;;  %s9879_s28 = smov [#allocation7]  }
  0x18   : > { %p10017_p3 = pnand %p7768_p0, %p514_p1  ;;  %s570_s29 = sshll.u32 %s9879_s28, 4  ;;  %s10023_s29 = int_to_ptr.vmem [resolvable:$true] %s570_s29 }
  0x19   : > { %s9880_s0 = smov [#allocation10]   ;;  %s9881_s5 = smov [#allocation13]  }
  0x1a   : > { %s13042_s3 = scalar_select %p10017_p3, 1, 0 }
  0x1b   : > { %p9368_p4 = pneg %p10017_p3  ;;  %s598_s4 = sshll.u32 %s9880_s0, 4  ;;  %s10031_s4 = int_to_ptr.vmem [resolvable:$true] %s598_s4 }
  0x1c   : > { %s10033_s22 = sshll.u32 %s9881_s5, 4  ;;  %s13044_s24 = sld [smem:[#allocation69_spill]]  ;;  %s623_s22 = int_to_ptr.vmem [resolvable:$true] %s10033_s22 }
  0x1d   : > { %p10027_p5 = pnand %p12934_p2, %p9368_p4 }
  0x1f   : > { %p10043_p7 = pneg %p10027_p5 }
  0x22   : > { %s9538_s25 = scalar_lea.hbm %s13044_s24, 32 }
  0x23   : > { %p9539_p6 = scmp.ne.s32.totalorder %s13044_s24, %s9538_s25  ;;  %p9545_p10 = scmp.lt.u32.totalorder %s9538_s25, %s13044_s24 }
  0x25   : > { %p9541_p8 = pnand %p10043_p7, %p9539_p6 }
  0x27   : > { %p9542_p9 = pneg %p9541_p8 }
  0x29   : > { %p9547_p11 = pnand %p9545_p10, %p9542_p9 }
  0x2b   : > { %9550 = shalt.err (!%p9547_p11)
}
  0x2c   : > { %s9551_s2 = scalar_lea.vmem %s10015_s26, 32  ;;  %p9559_p1 = scmp.lt.s32.totalorder %s10015_s26, %s10015_s26 }
  0x2d   : > { %p9552_p12 = scmp.ne.s32.totalorder %s10015_s26, %s9551_s2  ;;  %p9560_p4 = scmp.lt.s32.totalorder %s9551_s2, %s9551_s2 }
  0x2f   : > { %p9554_p13 = pnand %p9552_p12, %p10043_p7  ;;  %p9561_p6 = por %p9560_p4, %p9559_p1 }
  0x31   : > { %p9555_p0 = pneg %p9554_p13 }
  0x33   : > { %p9562_p8 = pnand %p9561_p6, %p9555_p0 }
  0x35   : > { %9565 = shalt.err (!%p9562_p8)
}
  0x36   : > { %9374 = dma.hbm_to_vmem [thread:$0]  (!%p10027_p5), %s13044_s24, 32, %s10015_s26, [#allocation5]  }
  0x37   : > { %s13046_s6 = sld [smem:[#allocation73_spill]] }
  0x3d   : > { %s9566_s28 = scalar_lea.hbm %s13046_s6, 16 }
  0x3e   : > { %p9567_p9 = scmp.ne.s32.totalorder %s13046_s6, %s9566_s28  ;;  %p9573_p12 = scmp.lt.u32.totalorder %s9566_s28, %s13046_s6 }
  0x40   : > { %p9569_p10 = pnand %p9567_p9, %p10043_p7 }
  0x42   : > { %p9570_p11 = pneg %p9569_p10 }
  0x44   : > { %p9575_p13 = pnand %p9573_p12, %p9570_p11 }
  0x46   : > { %9578 = shalt.err (!%p9575_p13)
}
  0x47   : > { %s9579_s26 = scalar_lea.vmem %s10023_s29, 16  ;;  %s9586_s20 = scalar_lea.vmem %s10023_s29, 32 }
  0x48   : > { %p9580_p0 = scmp.ne.s32.totalorder %s10023_s29, %s9579_s26  ;;  %p9587_p6 = scmp.lt.s32.totalorder %s10023_s29, %s10023_s29 }
  0x49   : > { %p9588_p8 = scmp.lt.s32.totalorder %s9586_s20, %s9579_s26 }
  0x4a   : > { %p9582_p1 = pnand %p9580_p0, %p10043_p7 }
  0x4b   : > { %p9589_p9 = por %p9588_p8, %p9587_p6 }
  0x4c   : > { %p9583_p4 = pneg %p9582_p1 }
  0x4e   : > { %p9590_p10 = pnand %p9589_p9, %p9583_p4 }
  0x50   : > { %9593 = shalt.err (!%p9590_p10)
}
  0x51   : > { %9380 = dma.hbm_to_vmem [thread:$0]  (!%p10027_p5), %s13046_s6, 16, %s10023_s29, [#allocation8]  }
  0x52   : > { %s13047_s10 = sld [smem:[#allocation74_spill]] }
  0x58   : > { %s9594_s25 = scalar_lea.hbm %s13047_s10, 16 }
  0x59   : > { %p9595_p11 = scmp.ne.s32.totalorder %s13047_s10, %s9594_s25  ;;  %p9601_p0 = scmp.lt.u32.totalorder %s9594_s25, %s13047_s10 }
  0x5b   : > { %p9597_p12 = pnand %p9595_p11, %p10043_p7 }
  0x5d   : > { %p9598_p13 = pneg %p9597_p12 }
  0x5f   : > { %p9603_p1 = pnand %p9601_p0, %p9598_p13 }
  0x61   : > { %9606 = shalt.err (!%p9603_p1)
}
  0x62   : > { %s9607_s29 = scalar_lea.vmem %s10031_s4, 16  ;;  %s9614_s20 = scalar_lea.vmem %s10031_s4, 32 }
  0x63   : > { %p9608_p4 = scmp.ne.s32.totalorder %s10031_s4, %s9607_s29  ;;  %p9615_p9 = scmp.lt.s32.totalorder %s10031_s4, %s10031_s4 }
  0x64   : > { %p9616_p10 = scmp.lt.s32.totalorder %s9614_s20, %s9607_s29 }
  0x65   : > { %p9610_p6 = pnand %p9608_p4, %p10043_p7 }
  0x66   : > { %p9617_p11 = por %p9616_p10, %p9615_p9 }
  0x67   : > { %p9611_p8 = pneg %p9610_p6 }
  0x69   : > { %p9618_p12 = pnand %p9617_p11, %p9611_p8 }
  0x6b   : > { %9621 = shalt.err (!%p9618_p12)
}
  0x6c   : > { %9386 = dma.hbm_to_vmem [thread:$0]  (!%p10027_p5), %s13047_s10, 16, %s10031_s4, [#allocation11]  }
  0x6d   : > { %s13048_s13 = sld [smem:[#allocation75_spill]] }
  0x73   : > { %s9622_s25 = scalar_lea.hbm %s13048_s13, 896 }
  0x74   : > { %p9623_p13 = scmp.ne.s32.totalorder %s13048_s13, %s9622_s25  ;;  %p9629_p4 = scmp.lt.u32.totalorder %s9622_s25, %s13048_s13 }
  0x76   : > { %p9625_p0 = pnand %p9623_p13, %p10043_p7 }
  0x78   : > { %p9626_p1 = pneg %p9625_p0 }
  0x7a   : > { %p9631_p6 = pnand %p9629_p4, %p9626_p1 }
  0x7c   : > { %9634 = shalt.err (!%p9631_p6)
}
  0x7d   : > { %s9635_s29 = scalar_lea.vmem %s623_s22, 896  ;;  %p9643_p11 = scmp.lt.s32.totalorder %s623_s22, %s623_s22 }
  0x7e   : > { %p9636_p8 = scmp.ne.s32.totalorder %s623_s22, %s9635_s29  ;;  %p9644_p12 = scmp.lt.s32.totalorder %s9635_s29, %s9635_s29 }
  0x80   : > { %p9638_p9 = pnand %p9636_p8, %p10043_p7  ;;  %p9645_p2 = por %p9644_p12, %p9643_p11 }
  0x82   : > { %p9639_p10 = pneg %p9638_p9 }
  0x84   : > { %p9646_p3 = pnand %p9645_p2, %p9639_p10 }
  0x86   : > { %9649 = shalt.err (!%p9646_p3)
}
  0x87   : > { %s12937_s4 = smov 64   ;;  %s12938_s20 = smov 4  }
  0x88   : > { %9392 = dma.hbm_to_vmem [thread:$0]  (!%p10027_p5), %s13048_s13, 896, %s623_s22, [#allocation14], %s12937_s4, %s12937_s4, %s12938_s20  }
  0x89   : > { %s9884_s23 = smov [#allocation16]   ;;  %s9885_s25 = smov [#allocation2]  }
  0x8a   : > { %s646_s1 = sshll.u32 %s9884_s23, 4  ;;  %s526_s28 = sshll.u32 %s9885_s25, 4  ;;  %s647_s1 = int_to_ptr.vmem [resolvable:$true] %s646_s1  ;;  %s527_s28 = int_to_ptr.vmem [resolvable:$true] %s526_s28 }
  0x8b   : > { %s13049_s15 = sld [smem:[#allocation76_spill]] }
  0x91   : > { %s9650_s26 = scalar_lea.hbm %s13049_s15, 896 }
  0x92   : > { %p9651_p2 = scmp.ne.s32.totalorder %s13049_s15, %s9650_s26  ;;  %p9657_p0 = scmp.lt.u32.totalorder %s9650_s26, %s13049_s15 }
  0x94   : > { %p9653_p3 = pnand %p9651_p2, %p10043_p7 }
  0x96   : > { %p9654_p13 = pneg %p9653_p3 }
  0x98   : > { %p9659_p1 = pnand %p9657_p0, %p9654_p13 }
  0x9a   : > { %9662 = shalt.err (!%p9659_p1)
}
  0x9b   : > { %s9663_s22 = scalar_lea.vmem %s647_s1, 896  ;;  %p9671_p9 = scmp.lt.s32.totalorder %s647_s1, %s647_s1 }
  0x9c   : > { %p9664_p4 = scmp.ne.s32.totalorder %s647_s1, %s9663_s22  ;;  %p9672_p10 = scmp.lt.s32.totalorder %s9663_s22, %s9663_s22 }
  0x9e   : > { %p9666_p6 = pnand %p9664_p4, %p10043_p7  ;;  %p9673_p11 = por %p9672_p10, %p9671_p9 }
  0xa0   : > { %p9667_p8 = pneg %p9666_p6 }
  0xa2   : > { %p9674_p12 = pnand %p9673_p11, %p9667_p8 }
  0xa4   : > { %9677 = shalt.err (!%p9674_p12)
}
  0xa5   : > { %9398 = dma.hbm_to_vmem [thread:$0]  (!%p10027_p5), %s13049_s15, 896, %s647_s1, [#allocation17], %s12937_s4, %s12937_s4, %s12938_s20  }
  0xa6   : > { %s13050_s18 = sld [smem:[#allocation68_spill]] }
  0xac   : > { %s9678_s23 = scalar_lea.hbm %s13050_s18, 512 }
  0xad   : > { %p9679_p2 = scmp.ne.s32.totalorder %s13050_s18, %s9678_s23  ;;  %p9685_p0 = scmp.lt.u32.totalorder %s9678_s23, %s13050_s18 }
  0xaf   : > { %p9681_p3 = pnand %p9679_p2, %p10043_p7 }
  0xb1   : > { %p9682_p13 = pneg %p9681_p3 }
  0xb3   : > { %p9687_p1 = pnand %p9685_p0, %p9682_p13 }
  0xb5   : > { %9690 = shalt.err (!%p9687_p1)
}
  0xb6   : > { %s9691_s29 = scalar_lea.vmem %s527_s28, 512  ;;  %p9699_p9 = scmp.lt.s32.totalorder %s527_s28, %s527_s28 }
  0xb7   : > { %p9692_p4 = scmp.ne.s32.totalorder %s527_s28, %s9691_s29  ;;  %p9700_p10 = scmp.lt.s32.totalorder %s9691_s29, %s9691_s29 }
  0xb9   : > { %p9694_p6 = pnand %p9692_p4, %p10043_p7  ;;  %p9701_p11 = por %p9700_p10, %p9699_p9 }
  0xbb   : > { %p9695_p8 = pneg %p9694_p6 }
  0xbd   : > { %p9702_p12 = pnand %p9701_p11, %p9695_p8 }
  0xbf   : > { %9705 = shalt.err (!%p9702_p12)
}
  0xc0   : > { %s9886_s1 = smov 128   ;;  %s9887_s22 = smov 8  }
  0xc1   : > { %9371 = dma.hbm_to_vmem [thread:$0]  (!%p10027_p5), %s13050_s18, 512, %s527_s28, [#allocation3], %s9886_s1, %s9886_s1, %s9887_s22  }
  0xc2   : > { %s9888_s24 = smov [#allocation6]   ;;  %s9889_s23 = smov [#allocation9]  }
  0xc3   : > { %s556_s16 = sshll.u32 %s9888_s24, 4  ;;  %s584_s25 = sshll.u32 %s9889_s23, 4  ;;  %s557_s16 = int_to_ptr.vmem [resolvable:$true] %s556_s16  ;;  %s585_s25 = int_to_ptr.vmem [resolvable:$true] %s584_s25 }
  0xc4   : > { %s13051_s26 = sld [smem:[#allocation72_spill]] }
  0xca   : > { %s9706_s29 = scalar_lea.hbm %s13051_s26, 896 }
  0xcb   : > { %p9707_p2 = scmp.ne.s32.totalorder %s13051_s26, %s9706_s29  ;;  %p9713_p0 = scmp.lt.u32.totalorder %s9706_s29, %s13051_s26 }
  0xcd   : > { %p9709_p3 = pnand %p9707_p2, %p10043_p7 }
  0xcf   : > { %p9710_p13 = pneg %p9709_p3 }
  0xd1   : > { %p9715_p1 = pnand %p9713_p0, %p9710_p13 }
  0xd3   : > { %9718 = shalt.err (!%p9715_p1)
}
  0xd4   : > { %s9719_s28 = scalar_lea.vmem %s557_s16, 896  ;;  %p9727_p9 = scmp.lt.s32.totalorder %s557_s16, %s557_s16 }
  0xd5   : > { %p9720_p4 = scmp.ne.s32.totalorder %s557_s16, %s9719_s28  ;;  %p9728_p10 = scmp.lt.s32.totalorder %s9719_s28, %s9719_s28 }
  0xd7   : > { %p9722_p6 = pnand %p9720_p4, %p10043_p7  ;;  %p9729_p11 = por %p9728_p10, %p9727_p9 }
  0xd9   : > { %p9723_p8 = pneg %p9722_p6 }
  0xdb   : > { %p9730_p12 = pnand %p9729_p11, %p9723_p8 }
  0xdd   : > { %9733 = shalt.err (!%p9730_p12)
}
  0xde   : > { %s13052_s4 = smov 4   ;;  %s13053_s20 = smov 64  }
  0xdf   : > { %9377 = dma.hbm_to_vmem [thread:$0]  (!%p10027_p5), %s13051_s26, 896, %s557_s16, [#allocation5], %s13053_s20, %s13053_s20, %s13052_s4  }
  0xe0   : > { %s9734_s24 = scalar_lea.hbm %s12915_s8, 32 }
  0xe1   : > { %p9735_p2 = scmp.ne.s32.totalorder %s12915_s8, %s9734_s24  ;;  %p9741_p0 = scmp.lt.u32.totalorder %s9734_s24, %s12915_s8 }
  0xe3   : > { %p9737_p3 = pnand %p9735_p2, %p10043_p7 }
  0xe5   : > { %p9738_p13 = pneg %p9737_p3 }
  0xe7   : > { %p9743_p1 = pnand %p9741_p0, %p9738_p13 }
  0xe9   : > { %9746 = shalt.err (!%p9743_p1)
}
  0xea   : > { %s9747_s28 = scalar_lea.vmem %s585_s25, 32  ;;  %p9755_p9 = scmp.lt.s32.totalorder %s585_s25, %s585_s25 }
  0xeb   : > { %p9748_p4 = scmp.ne.s32.totalorder %s585_s25, %s9747_s28  ;;  %p9756_p10 = scmp.lt.s32.totalorder %s9747_s28, %s9747_s28 }
  0xed   : > { %p9750_p6 = pnand %p9748_p4, %p10043_p7  ;;  %p9757_p11 = por %p9756_p10, %p9755_p9 }
  0xef   : > { %p9751_p8 = pneg %p9750_p6 }
  0xf1   : > { %p9758_p12 = pnand %p9757_p11, %p9751_p8 }
  0xf3   : > { %9761 = shalt.err (!%p9758_p12)
}
  0xf4   : > { %9383 = dma.hbm_to_vmem [thread:$0]  (!%p10027_p5), %s12915_s8, 32, %s585_s25, [#allocation8]  }
  0xf5   : > { %s9890_s20 = smov [#allocation12]   ;;  %s9891_s15 = smov [#allocation15]  }
  0xf6   : > { %s612_s13 = sshll.u32 %s9890_s20, 4  ;;  %s636_s6 = sshll.u32 %s9891_s15, 4  ;;  %s613_s13 = int_to_ptr.vmem [resolvable:$true] %s612_s13  ;;  %s637_s6 = int_to_ptr.vmem [resolvable:$true] %s636_s6 }
  0xf7   : > { %s9762_s23 = scalar_lea.hbm %s12919_s12, 16 }
  0xf8   : > { %p9763_p2 = scmp.ne.s32.totalorder %s12919_s12, %s9762_s23  ;;  %p9769_p0 = scmp.lt.u32.totalorder %s9762_s23, %s12919_s12 }
  0xfa   : > { %p9765_p3 = pnand %p9763_p2, %p10043_p7 }
  0xfc   : > { %p9766_p13 = pneg %p9765_p3 }
  0xfe   : > { %p9771_p1 = pnand %p9769_p0, %p9766_p13 }
 0x100   : > { %9774 = shalt.err (!%p9771_p1)
}
 0x101   : > { %s9775_s25 = scalar_lea.vmem %s613_s13, 16  ;;  %s9782_s16 = scalar_lea.vmem %s613_s13, 32 }
 0x102   : > { %p9776_p4 = scmp.ne.s32.totalorder %s613_s13, %s9775_s25  ;;  %p9783_p9 = scmp.lt.s32.totalorder %s613_s13, %s613_s13 }
 0x103   : > { %p9784_p10 = scmp.lt.s32.totalorder %s9782_s16, %s9775_s25 }
 0x104   : > { %p9778_p6 = pnand %p9776_p4, %p10043_p7 }
 0x105   : > { %p9785_p11 = por %p9784_p10, %p9783_p9 }
 0x106   : > { %p9779_p8 = pneg %p9778_p6 }
 0x108   : > { %p9786_p12 = pnand %p9785_p11, %p9779_p8 }
 0x10a   : > { %9789 = shalt.err (!%p9786_p12)
}
 0x10b   : > { %9389 = dma.hbm_to_vmem [thread:$0]  (!%p10027_p5), %s12919_s12, 16, %s613_s13, [#allocation11]  }
 0x10c   : > { %s9790_s24 = scalar_lea.hbm %s12921_s14, 16 }
 0x10d   : > { %p9791_p2 = scmp.ne.s32.totalorder %s12921_s14, %s9790_s24  ;;  %p9797_p0 = scmp.lt.u32.totalorder %s9790_s24, %s12921_s14 }
 0x10f   : > { %p9793_p3 = pnand %p9791_p2, %p10043_p7 }
 0x111   : > { %p9794_p13 = pneg %p9793_p3 }
 0x113   : > { %p9799_p1 = pnand %p9797_p0, %p9794_p13 }
 0x115   : > { %9802 = shalt.err (!%p9799_p1)
}
 0x116   : > { %s9803_s28 = scalar_lea.vmem %s637_s6, 16  ;;  %s9810_s13 = scalar_lea.vmem %s637_s6, 32 }
 0x117   : > { %p9804_p4 = scmp.ne.s32.totalorder %s637_s6, %s9803_s28  ;;  %p9811_p9 = scmp.lt.s32.totalorder %s637_s6, %s637_s6 }
 0x118   : > { %p9812_p10 = scmp.lt.s32.totalorder %s9810_s13, %s9803_s28 }
 0x119   : > { %p9806_p6 = pnand %p9804_p4, %p10043_p7 }
 0x11a   : > { %p9813_p11 = por %p9812_p10, %p9811_p9 }
 0x11b   : > { %p9807_p8 = pneg %p9806_p6 }
 0x11d   : > { %p9814_p12 = pnand %p9813_p11, %p9807_p8 }
 0x11f   : > { %9817 = shalt.err (!%p9814_p12)
}
 0x120   : > { %9395 = dma.hbm_to_vmem [thread:$0]  (!%p10027_p5), %s12921_s14, 16, %s637_s6, [#allocation14]  }
 0x121   : > { %s9892_s4 = smov [#allocation18]   ;;  %s9818_s24 = scalar_lea.hbm %s12926_s19, 512 }
 0x122   : > { %s668_s20 = sshll.u32 %s9892_s4, 4  ;;  %p9819_p2 = scmp.ne.s32.totalorder %s12926_s19, %s9818_s24  ;;  %s669_s20 = int_to_ptr.vmem [resolvable:$true] %s668_s20 }
 0x123   : > { %p9825_p0 = scmp.lt.u32.totalorder %s9818_s24, %s12926_s19 }
 0x124   : > { %p9821_p3 = pnand %p9819_p2, %p10043_p7 }
 0x126   : > { %p9822_p13 = pneg %p9821_p3 }
 0x128   : > { %p9827_p1 = pnand %p9825_p0, %p9822_p13 }
 0x12a   : > { %9830 = shalt.err (!%p9827_p1)
}
 0x12b   : > { %s9831_s6 = scalar_lea.vmem %s669_s20, 512  ;;  %p9839_p9 = scmp.lt.s32.totalorder %s669_s20, %s669_s20 }
 0x12c   : > { %p9832_p4 = scmp.ne.s32.totalorder %s669_s20, %s9831_s6  ;;  %p9840_p10 = scmp.lt.s32.totalorder %s9831_s6, %s9831_s6 }
 0x12e   : > { %p9834_p6 = pnand %p9832_p4, %p10043_p7  ;;  %p9841_p11 = por %p9840_p10, %p9839_p9 }
 0x130   : > { %p9835_p8 = pneg %p9834_p6 }
 0x132   : > { %p9842_p12 = pnand %p9841_p11, %p9835_p8 }
 0x134   : > { %9845 = shalt.err (!%p9842_p12)
}
 0x135   : > { %9401 = dma.hbm_to_vmem [thread:$0]  (!%p10027_p5), %s12926_s19, 512, %s669_s20, [#allocation17], %s9886_s1, %s9886_s1, %s9887_s22  }
 0x136   : > { %p13054_p2 = scmp.ne.s32.totalorder %s13042_s3, 0 }
 0x138   : > { %695 = sbr.rel (%p13054_p2) target bundleno = 2673 (0xa71), region = 104 }
 0x13f   : > { %p13055_p7 = scmp.eq.s32.totalorder %s10010_s27, 0 }
 0x141   : > { %9851 = dma.done.wait (%p13055_p7), [#allocation3], 512   ;;  %p13056_p3 = pmov %p13055_p7 }
 0x143   : > { %9853 = vsyncadd (%p13056_p3), [#allocation3], 4294966784  ;;  %p13057_p13 = pmov %p13056_p3 }
 0x144   : > { %p13058_p0 = pmov %p13056_p3 }
 0x145   : > { %9855 = dma.done.wait (%p13057_p13), [#allocation5], 928  }
 0x146   : > { %9857 = vsyncadd (%p13058_p0), [#allocation5], 4294966368  ;;  %p13059_p1 = pmov %p13058_p0 }
 0x147   : > { %p13060_p5 = pmov %p13058_p0 }
 0x148   : > { %9859 = dma.done.wait (%p13059_p1), [#allocation8], 48  }
 0x149   : > { %9861 = vsyncadd (%p13060_p5), [#allocation8], 4294967248  ;;  %p13061_p4 = pmov %p13058_p0 }
 0x14a   : > { %p13062_p6 = pmov %p13058_p0 }
 0x14b   : > { %9863 = dma.done.wait (%p13061_p4), [#allocation11], 32  }
 0x14c   : > { %9865 = vsyncadd (%p13062_p6), [#allocation11], 4294967264  ;;  %p13063_p8 = pmov %p13058_p0 }
 0x14d   : > { %p13064_p9 = pmov %p13058_p0 }
 0x14e   : > { %9867 = dma.done.wait (%p13063_p8), [#allocation14], 912  }
 0x14f   : > { %9869 = vsyncadd (%p13064_p9), [#allocation14], 4294966384  ;;  %p13065_p10 = pmov %p13058_p0 }
 0x150   : > { %p13066_p11 = pmov %p13058_p0 }
 0x151   : > { %9871 = dma.done.wait (%p13065_p10), [#allocation17], 1408  }
 0x152   : > { %9873 = vsyncadd (%p13066_p11), [#allocation17], 4294965888  ;;  %p795_p12 = scmp.lt.s32.totalorder %s10010_s27, 1  ;;  %v12945_v0 = vmov 0   ;;  %s13067_s1 = sld [smem:[#allocation67_spill]]  ;;  %vm1036_vm0 = vcmask 1043456  }
 0x153   : > { %915 = vmatprep.mubr.bf16.mxu1 %v12945_v0  ;;  %2584 = vmatprep.mubr.bf16.mxu0 %v12945_v0  ;;  %v7050_v1 = vrot.slane %v12945_v0, 4  ;;  %v9448_v2 = vld [vmem:[#allocation2 + $0x4] ss:$8 sps:$4 sm:$0xff]   ;;  %v9450_v3 = vld [vmem:[#allocation2] ss:$8 sps:$4 sm:$0xff]   ;;  %s13069_s4 = sld [smem:[#allocation70_spill]] }
 0x154   : > { %s13321_s27 = smov (!%p795_p12, %s10010_s27), 1  ;;  %883 = vmatprep.subr.bf16.mxu1 %v9448_v2  ;;  %v9451_v5 = vld [vmem:[#allocation2 + $0x14] ss:$8 sps:$4 sm:$0xff]   ;;  %v9453_v6 = vld [vmem:[#allocation2 + $0x10] ss:$8 sps:$4 sm:$0xff]   ;;  %vm870_vm1 = vcmask 261120  }
 0x155   : > { %s8413_s3 = sshll.u32 %s13321_s27, 5  ;;  %v10312_v4 = vsel %vm1036_vm0, 0, %v7050_v1  ;;  %884 = vmatpush1.bf16.msra.mxu1 %v9450_v3  ;;  %s8414_s10 = sshll.u32 %s13321_s27, 8  ;;  %vm1037_vm2 = vcmask 523268   ;;  %vm1224_vm4 = vsmask.f32 1280 }
 0x156   : > { %13068 = vst [vmem:[#allocation26_spill] sm:$0xff] %v10312_v4  ;;  %885 = vmatprep.subr.bf16.mxu1 %v9451_v5  ;;  %v12939_v11 = vunpack.c.l.bf16 %v10312_v4  ;;  %v12940_v12 = vunpack.c.h.bf16 %v10312_v4  ;;  %s10426_s5 = scalar_lea.vmem %s12928_s21, %s8414_s10  ;;  %vm10429_vm3 = vmor %vm1037_vm2, %vm1036_vm0  ;;  %s13095_s29 = sld [smem:[#allocation71_spill]]  ;;  %vm1225_vm5 = vsmask.f32 5392  ;;  %vm1373_vm6 = vcmask 1040384  }
 0x157   : > { %vm1374_vm7 = vcmask 1044484   ;;  %vm1602_vm8 = vsmask.f32 256  ;;  %vm1603_vm9 = vsmask.f32 4368  ;;  %vm10549_vm12 = vmor %vm1224_vm4, %vm1225_vm5  ;;  %vm1429_vm13 = vcmask 130048  }
 0x158   : > { %s10309_s22 = scalar_lea.vmem %s13067_s1, %s8413_s3  ;;  %vm10520_vm10 = vmor %vm1373_vm6, %vm1374_vm7  ;;  %vm1852_vm14 = vsmask.f32 3328  ;;  %vm1853_vm15 = vsmask.f32 7440  ;;  %vm2005_vm2 = vcmask 1042432   ;;  %vm2006_vm4 = vcmask 1046532  }
 0x159   : > { %v806_v7 = vld [vmem:[%s10309_s22] sm:$0xf]  ;;  %v807_v8 = vld [vmem:[%s10309_s22 + $0x4] sm:$0xf]  ;;  %v808_v14 = vld [vmem:[%s10309_s22 + $0x8] sm:$0xf]  ;;  %886 = vmatpush1.bf16.msra.mxu1 %v9453_v6 }
 0x15a   : > { %v7051_v9 = vrot.slane %v806_v7, 4  ;;  %v7052_v10 = vrot.slane %v807_v8, 4  ;;  %v9455_v13 = vld [vmem:[%s13069_s4] sm:$0xff]   ;;  %v7053_v16 = vrot.slane %v808_v14, 4  ;;  %v10323_v17 = vcombine.low %v806_v7, %v807_v8  ;;  %v809_v21 = vld [vmem:[%s10309_s22 + $0xc] sm:$0xf]  ;;  %vm10541_vm11 = vmor %vm1602_vm8, %vm1603_vm9 }
 0x15b   : > { %v7054_v24 = vrot.slane %v809_v21, 4  ;;  %8636 = vmatprep.subr.bf16.mxu1 %v9455_v13  ;;  %v810_v29 = vld [vmem:[%s10309_s22 + $0x10] sm:$0xf]  ;;  %v9458_v30 = vld [vmem:[%s13069_s4 + $0x8] sm:$0xff]   ;;  %v811_v39 = vld [vmem:[%s10309_s22 + $0x14] sm:$0xf]  ;;  %v10353_v53 = vcombine.low %v808_v14, %v809_v21 }
 0x15c   : > { %v7063_v15 = vsel %vm1036_vm0, 0, %v7051_v9  ;;  %13070 = vst [vmem:[#allocation27_spill] sm:$0xff] %v10323_v17  ;;  %v7066_v18 = vsel %vm1036_vm0, 0, %v7052_v10  ;;  %v7069_v25 = vsel %vm1036_vm0, 0, %v7053_v16  ;;  %7805 = vmatmul.mubr.msk.bf16.vlgmr.msra.gmra.mrb[0].mxu1 %vm870_vm1, %v10323_v17  ;;  %v7055_v43 = vrot.slane %v810_v29, 4  ;;  %vm10869_vm5 = vmor %vm1852_vm14, %vm1853_vm15  ;;  %s13227_s6 = sld [smem:[#allocation77_spill]] }
 0x15d   : > { %v7089_v19 = vunpack.c.l.bf16 %v7063_v15  ;;  %v7090_v20 = vunpack.c.h.bf16 %v7063_v15  ;;  %v7091_v22 = vunpack.c.l.bf16 %v7066_v18  ;;  %v7092_v23 = vunpack.c.h.bf16 %v7066_v18  ;;  %8637 = vmatpush3.bf16.msra.mxu1 %v9455_v13  ;;  %925 = vmatprep.mubr.bf16.mxu1 %v12945_v0  ;;  %13075 = vst [vmem:[#allocation32_spill] sm:$0xff] %v10353_v53  ;;  %v812_v7 = vld [vmem:[%s10309_s22 + $0x18] sm:$0xf]  ;;  %v813_v8 = vld [vmem:[%s10309_s22 + $0x1c] sm:$0xf]  ;;  %vm10902_vm6 = vmor %vm2005_vm2, %vm2006_vm4  ;;  %s13314_s22 = sld [smem:[#allocation79_spill]] }
 0x15e   : > { %v7093_v28 = vunpack.c.l.bf16 %v7069_v25  ;;  %v7072_v33 = vsel %vm1036_vm0, 0, %v7054_v24  ;;  %v7094_v34 = vunpack.c.h.bf16 %v7069_v25  ;;  %8638 = vmatprep.subr.bf16.mxu1 %v9458_v30  ;;  %v7056_v51 = vrot.slane %v811_v39, 4  ;;  %s13318_s20 = sld [smem:[#allocation78_spill]] }
 0x15f   : > { %v7105_v26 = vadd.f32 %v7089_v19, %v12939_v11  ;;  %v7106_v27 = vadd.f32 %v7090_v20, %v12940_v12  ;;  %v7108_v31 = vadd.f32 %v7091_v22, %v7089_v19  ;;  %v7109_v32 = vadd.f32 %v7092_v23, %v7090_v20 }
 0x160   : > { %v7095_v37 = vunpack.c.l.bf16 %v7072_v33  ;;  %v7096_v38 = vunpack.c.h.bf16 %v7072_v33  ;;  %v7110_v40 = vadd.f32 %v7093_v28, %v7091_v22  ;;  %v7111_v41 = vadd.f32 %v7094_v34, %v7092_v23 }
 0x161   : > { %v7122_v35 = vadd.f32 %v7105_v26, %v7091_v22  ;;  %v10339_v36 = vadd.f32 %v7106_v27, %v7092_v23  ;;  %v7125_v42 = vadd.f32 %v7108_v31, %v7093_v28  ;;  %v10345_v48 = vadd.f32 %v7109_v32, %v7094_v34  ;;  %8639 = vmatpush3.bf16.msra.mxu1 %v9458_v30 }
 0x162   : > { %v7112_v46 = vadd.f32 %v7095_v37, %v7093_v28  ;;  %v7113_v47 = vadd.f32 %v7096_v38, %v7094_v34  ;;  %v10347_v49 = vadd.f32 %v7110_v40, %v7095_v37  ;;  %v10349_v50 = vadd.f32 %v7111_v41, %v7096_v38  ;;  %v9460_v34 = vld [vmem:[#allocation6 + $0x8] sm:$0xff]   ;;  %v818_v40 = vld [vmem:[#allocation4] sm:$0x3] }
 0x163   : > { %13071 = vst [vmem:[#allocation28_spill] sm:$0xff] %v10339_v36  ;;  %v12944_v44 = vrot.slane %v10339_v36, 1  ;;  %v12943_v45 = vrot.slane %v10339_v36, 2  ;;  %13072 = vst [vmem:[#allocation29_spill] sm:$0xff] %v10345_v48  ;;  %v7075_v54 = vsel %vm1036_vm0, 0, %v7055_v43  ;;  %v12942_v55 = vrot.slane %v10345_v48, 1  ;;  %8648 = vmatprep.subr.bf16.mxu1 %v9460_v34 }
 0x164   : > { %13073 = vst [vmem:[#allocation30_spill] sm:$0xff] %v10347_v49  ;;  %13074 = vst [vmem:[#allocation31_spill] sm:$0xff] %v10349_v50  ;;  %v7078_v56 = vsel %vm1036_vm0, 0, %v7056_v51  ;;  %v7097_v58 = vunpack.c.l.bf16 %v7075_v54  ;;  %v7098_v59 = vunpack.c.h.bf16 %v7075_v54  ;;  %v12941_v62 = vrot.slane %v10345_v48, 2  ;;  %7806 = vmatmul.mubr.msk.bf16.gmra.mrb[4].mxu1 %vm870_vm1, %v10353_v53 }
 0x165   : > { %v7163_v52 = vadd.f32 %v12944_v44, %v7122_v35  ;;  %v7099_v60 = vunpack.c.l.bf16 %v7078_v56  ;;  %v7165_v61 = vadd.f32 %v12942_v55, %v7125_v42  ;;  %v7100_v63 = vunpack.c.h.bf16 %v7078_v56  ;;  %935 = vmatprep.mubr.bf16.mxu1 %v12945_v0  ;;  %v10413_v35 = vld [vmem:[#allocation6] sm:$0xff]  }
 0x166   : > { %v7114_v1 = vadd.f32 %v7097_v58, %v7095_v37  ;;  %v7115_v2 = vadd.f32 %v7098_v59, %v7096_v38  ;;  %v10374_v9 = vadd.f32 %v7112_v46, %v7097_v58  ;;  %v10376_v10 = vadd.f32 %v7113_v47, %v7098_v59 }
 0x167   : > { %v10360_v57 = vadd.f32 %v12943_v45, %v7163_v52  ;;  %v10369_v3 = vadd.f32 %v12941_v62, %v7165_v61  ;;  %v7116_v5 = vadd.f32 %v7099_v60, %v7097_v58  ;;  %v7117_v6 = vadd.f32 %v7100_v63, %v7098_v59 }
 0x168   : > { %13078 = vst [vmem:[#allocation35_spill] sm:$0xff] %v10374_v9  ;;  %13079 = vst [vmem:[#allocation36_spill] sm:$0xff] %v10376_v10  ;;  %v10378_v13 = vadd.f32 %v7114_v1, %v7099_v60  ;;  %v10380_v14 = vadd.f32 %v7115_v2, %v7100_v63  ;;  %v10382_v15 = vcombine.low %v810_v29, %v811_v39  ;;  %v7057_v16 = vrot.slane %v812_v7, 4 }
 0x169   : > { %13076 = vst [vmem:[#allocation33_spill] sm:$0xff] %v10360_v57  ;;  %13077 = vst [vmem:[#allocation34_spill] sm:$0xff] %v10369_v3  ;;  %v7058_v18 = vrot.slane %v813_v8, 4  ;;  %v10401_v33 = vcombine.low %v812_v7, %v813_v8  ;;  %v820_v37 = vlaneseq  ;;  %vm2139_vm7 = vsmask.f32 2304 }
 0x16a   : > { %13080 = vst [vmem:[#allocation37_spill] sm:$0xff] %v10378_v13  ;;  %13081 = vst [vmem:[#allocation38_spill] sm:$0xff] %v10380_v14  ;;  %v7081_v19 = vsel %vm1036_vm0, 0, %v7057_v16  ;;  %vm2140_vm8 = vsmask.f32 6416  ;;  %vm7180_vm14 = vcmask 1045504  }
 0x16b   : > { %13082 = vst [vmem:[#allocation39_spill] sm:$0xff] %v10382_v15  ;;  %v7084_v20 = vsel %vm1036_vm0, 0, %v7058_v18  ;;  %v7101_v21 = vunpack.c.l.bf16 %v7081_v19  ;;  %v7102_v22 = vunpack.c.h.bf16 %v7081_v19  ;;  %13089 = vst [vmem:[#allocation46_spill] sm:$0xff] %v10401_v33  ;;  %v821_v38 = vshrl.u32 %v820_v37, 7 }
 0x16c   : > { %v7103_v23 = vunpack.c.l.bf16 %v7084_v20  ;;  %7807 = vmatmul.mubr.msk.bf16.gmra.mrb[8].mxu1 %vm870_vm1, %v10382_v15  ;;  %v7104_v24 = vunpack.c.h.bf16 %v7084_v20  ;;  %vm11012_vm9 = vmor %vm2139_vm7, %vm2140_vm8 }
 0x16d   : > { %945 = vmatprep.mubr.bf16.mxu1 %v12945_v0  ;;  %v7118_v25 = vadd.f32 %v7101_v21, %v7099_v60  ;;  %v7119_v26 = vadd.f32 %v7102_v22, %v7100_v63  ;;  %v10391_v28 = vadd.f32 %v7116_v5, %v7101_v21  ;;  %v10395_v30 = vadd.f32 %v7117_v6, %v7102_v22 }
 0x16e   : > { %v10389_v27 = vadd.f32 %v7103_v23, %v7101_v21  ;;  %v10393_v29 = vadd.f32 %v7104_v24, %v7102_v22  ;;  %v10416_v39 = vsub.s32 0, %v821_v38  ;;  %v10418_v41 = vsub.s32 1, %v821_v38 }
 0x16f   : > { %13084 = vst [vmem:[#allocation41_spill] sm:$0xff] %v10391_v28  ;;  %13086 = vst [vmem:[#allocation43_spill] sm:$0xff] %v10395_v30  ;;  %v10397_v31 = vadd.f32 %v7118_v25, %v7103_v23  ;;  %v10399_v32 = vadd.f32 %v7119_v26, %v7104_v24  ;;  %v13092_v63 = vmov 0 }
 0x170   : > { %13083 = vst [vmem:[#allocation40_spill] sm:$0xff] %v10389_v27  ;;  %13085 = vst [vmem:[#allocation42_spill] sm:$0xff] %v10393_v29  ;;  %v823_v42 = vrot.slane %v818_v40, %v10416_v39  ;;  %v827_v43 = vrot.slane %v818_v40, %v10418_v41  ;;  %v13093_v63 = vsel %vm10429_vm3, 4294967295, %v13092_v63 }
 0x171   : > { %13087 = vst [vmem:[#allocation44_spill] sm:$0xff] %v10397_v31  ;;  %13088 = vst [vmem:[#allocation45_spill] sm:$0xff] %v10399_v32 }
 0x172   : > { %13090 = vst [vmem:[#allocation47_spill] sm:$0xff] %v10416_v39  ;;  %13091 = vst [vmem:[#allocation48_spill] sm:$0xff] %v10418_v41 }
 0x173   : > { %13094 = vst [vmem:[#allocation49_spill] sm:$0xff] %v13093_v63 }
 0x174   : > { %7808 = vmatmul.mubr.msk.bf16.gmra.mrb[12].mxu1 %vm870_vm1, %v10401_v33 }
 0x175   : > { %8640 = vmatprep.mubr.msk.bf16.mxu1 %vm870_vm1, %v10323_v17 }
 0x17c   : > { %8641 = vmatmul.mubr.msk.bf16.vlgmr.msra.gmra.mrb[16].mxu1 %vm870_vm1, %v10353_v53  ;;  %v10687_v53 = vld [vmem:[#allocation6 + $0x10] sm:$0xff]  }
 0x17d   : > { %8644 = vmatprep.mubr.msk.bf16.mxu1 %vm870_vm1, %v10382_v15  ;;  %8649 = vmatpush3.bf16.msra.mxu1 %v9460_v34 }
 0x17e   : > { %8658 = vmatprep.subr.bf16.mxu1 %v10413_v35 }
 0x184   : > { %8645 = vmatmul.mubr.msk.bf16.gmra.mrb[20].mxu1 %vm870_vm1, %v10401_v33 }
 0x22f   : > { %v917_v46 = vpop.f32.mrb[0].mxu1 }
 0x230   : > { %v918_v47 = vadd.f32 %v917_v46, %v823_v42  ;;  %v919_v51 = vpop.f32.mrb[1].mxu1 }
 0x231   : > { %v920_v52 = vadd.f32 %v919_v51, %v827_v43  ;;  %v921_v54 = vpop.f32.mrb[2].mxu1 }
 0x232   : > { %v956_v56 = vmax.f32 %v918_v47, 0.0  ;;  %v922_v58 = vadd.f32 %v921_v54, %v823_v42  ;;  %v923_v59 = vpop.f32.mrb[3].mxu1 }
 0x233   : > { %v957_v60 = vmax.f32 %v920_v52, 0.0  ;;  %v924_v61 = vadd.f32 %v923_v59, %v827_v43 }
 0x234   : > { %v958_v1 = vmax.f32 %v922_v58, 0.0 }
 0x235   : > { %v8415_v2 = vpack.c.bf16 %v957_v60, %v956_v56  ;;  %v959_v5 = vmax.f32 %v924_v61, 0.0 }
 0x237   : > { %1039 = vst.msk [vmem:[%s10426_s5] sm:$0xff] %vm10429_vm3, %v8415_v2  ;;  %v8416_v6 = vpack.c.bf16 %v959_v5, %v958_v1  ;;  %v927_v7 = vpop.f32.mrb[4].mxu1 }
 0x238   : > { %v928_v8 = vadd.f32 %v927_v7, %v823_v42  ;;  %v929_v16 = vpop.f32.mrb[5].mxu1 }
 0x239   : > { %1040 = vst.msk [vmem:[%s10426_s5 + $0x8] sm:$0xff] %vm10429_vm3, %v8416_v6  ;;  %v930_v18 = vadd.f32 %v929_v16, %v827_v43  ;;  %v931_v19 = vpop.f32.mrb[6].mxu1 }
 0x23a   : > { %v960_v20 = vmax.f32 %v928_v8, 0.0  ;;  %v932_v21 = vadd.f32 %v931_v19, %v823_v42  ;;  %v933_v22 = vpop.f32.mrb[7].mxu1 }
 0x23b   : > { %v961_v23 = vmax.f32 %v930_v18, 0.0  ;;  %v934_v24 = vadd.f32 %v933_v22, %v827_v43 }
 0x23c   : > { %v962_v25 = vmax.f32 %v932_v21, 0.0 }
 0x23d   : > { %v8417_v26 = vpack.c.bf16 %v961_v23, %v960_v20  ;;  %v963_v34 = vmax.f32 %v934_v24, 0.0 }
 0x23f   : > { %1041 = vst.msk [vmem:[%s10426_s5 + $0x10] sm:$0xff] %vm10429_vm3, %v8417_v26  ;;  %v8418_v37 = vpack.c.bf16 %v963_v34, %v962_v25  ;;  %v937_v38 = vpop.f32.mrb[8].mxu1  ;;  %v10454_v26 = vld [vmem:[%s13095_s29] ss:$0 sm:$0xff]  ;;  %v10458_v34 = vcombine.low %v12945_v0, %v12945_v0 }
 0x240   : > { %v938_v40 = vadd.f32 %v937_v38, %v823_v42  ;;  %v939_v46 = vpop.f32.mrb[9].mxu1 }
 0x241   : > { %1042 = vst.msk [vmem:[%s10426_s5 + $0x18] sm:$0xff] %vm10429_vm3, %v8418_v37  ;;  %v940_v47 = vadd.f32 %v939_v46, %v827_v43  ;;  %v941_v51 = vpop.f32.mrb[10].mxu1  ;;  %13096 = vst [vmem:[#allocation50_spill] sm:$0xff] %v10458_v34  ;;  %v2146_v46 = vshrl.u32 %v10458_v34, 16 }
 0x242   : > { %v964_v52 = vmax.f32 %v938_v40, 0.0  ;;  %v942_v54 = vadd.f32 %v941_v51, %v823_v42  ;;  %v943_v56 = vpop.f32.mrb[11].mxu1  ;;  %v1860_v40 = vshll.u32 %v10458_v34, 16 }
 0x243   : > { %v965_v58 = vmax.f32 %v940_v47, 0.0  ;;  %v944_v59 = vadd.f32 %v943_v56, %v827_v43 }
 0x244   : > { %v966_v60 = vmax.f32 %v942_v54, 0.0 }
 0x245   : > { %v8419_v61 = vpack.c.bf16 %v965_v58, %v964_v52  ;;  %v967_v1 = vmax.f32 %v944_v59, 0.0 }
 0x247   : > { %1043 = vst.msk [vmem:[%s10426_s5 + $0x20] sm:$0xff] %vm10429_vm3, %v8419_v61  ;;  %v8420_v2 = vpack.c.bf16 %v967_v1, %v966_v60  ;;  %v947_v5 = vpop.f32.mrb[12].mxu1  ;;  %v2148_v1 = vrot.slane %v2146_v46, 5 }
 0x248   : > { %v948_v6 = vadd.f32 %v947_v5, %v823_v42  ;;  %v949_v7 = vpop.f32.mrb[13].mxu1 }
 0x249   : > { %1044 = vst.msk [vmem:[%s10426_s5 + $0x28] sm:$0xff] %vm10429_vm3, %v8420_v2  ;;  %v950_v8 = vadd.f32 %v949_v7, %v827_v43  ;;  %v951_v16 = vpop.f32.mrb[14].mxu1  ;;  %v2149_v2 = vrot.slane %v1860_v40, 6 }
 0x24a   : > { %v968_v18 = vmax.f32 %v948_v6, 0.0  ;;  %v952_v19 = vadd.f32 %v951_v16, %v823_v42  ;;  %v953_v20 = vpop.f32.mrb[15].mxu1 }
 0x24b   : > { %v969_v21 = vmax.f32 %v950_v8, 0.0  ;;  %v954_v22 = vadd.f32 %v953_v20, %v827_v43  ;;  %v10472_v20 = vrot.slane %v1860_v40, 5 }
 0x24c   : > { %v970_v23 = vmax.f32 %v952_v19, 0.0 }
 0x24d   : > { %v8421_v24 = vpack.c.bf16 %v969_v21, %v968_v18  ;;  %v971_v25 = vmax.f32 %v954_v22, 0.0  ;;  %13097 = vst [vmem:[#allocation51_spill] sm:$0xff] %v10472_v20  ;;  %v10475_v21 = vrot.slane %v10458_v34, 5 }
 0x24f   : > { %1045 = vst.msk [vmem:[%s10426_s5 + $0x30] sm:$0xff] %vm10429_vm3, %v8421_v24  ;;  %v8422_v42 = vpack.c.bf16 %v971_v25, %v970_v23  ;;  %v8642_v37 = vpop.f32.mrb[16].mxu1  ;;  %13098 = vst [vmem:[#allocation52_spill] sm:$0xff] %v10475_v21 }
 0x250   : > { %v1113_v38 = vadd.f32 %v8642_v37, %v10454_v26  ;;  %v1104_v43 = vpop.f32.mrb[17].mxu1 }
 0x251   : > { %1046 = vst.msk [vmem:[%s10426_s5 + $0x38] sm:$0xff] %vm10429_vm3, %v8422_v42  ;;  %v1105_v47 = vadd.f32 %v10454_v26, %v1104_v43  ;;  %v8643_v51 = vpop.f32.mrb[18].mxu1  ;;  %v10485_v42 = vor.u32 %v2149_v2, %v2148_v1 }
 0x252   : > { %v1137_v52 = vmax.f32 %v1113_v38, 0.0  ;;  %v1116_v54 = vadd.f32 %v8643_v51, %v10454_v26  ;;  %v1107_v56 = vpop.f32.mrb[19].mxu1 }
 0x253   : > { %v1135_v58 = vmax.f32 %v1105_v47, 0.0  ;;  %v1108_v59 = vadd.f32 %v10454_v26, %v1107_v56  ;;  %13100 = vst [vmem:[#allocation54_spill] sm:$0xff] %v10485_v42 }
 0x254   : > { %v1145_v60 = vpack.c.bf16 %v1137_v52, %v1137_v52  ;;  %v1138_v61 = vmax.f32 %v1116_v54, 0.0 }
 0x255   : > { %v1143_v5 = vpack.c.bf16 %v1135_v58, %v1135_v58  ;;  %v1136_v6 = vmax.f32 %v1108_v59, 0.0 }
 0x256   : > { %v1161_v7 = vrot.slane %v1145_v60, 4  ;;  %v1146_v8 = vpack.c.bf16 %v1138_v61, %v1138_v61 }
 0x257   : > { %v1159_v16 = vrot.slane %v1143_v5, 4  ;;  %v1144_v18 = vpack.c.bf16 %v1136_v6, %v1136_v6  ;;  %v8646_v19 = vpop.f32.mrb[20].mxu1 }
 0x258   : > { %v10478_v22 = vsel %vm1036_vm0, 0, %v1161_v7  ;;  %v1162_v23 = vrot.slane %v1146_v8, 4  ;;  %v10481_v24 = vadd.f32 %v8646_v19, %v10454_v26  ;;  %v10483_v25 = vpop.f32.mrb[21].mxu1 }
 0x259   : > { %13099 = vst [vmem:[#allocation53_spill] sm:$0xff] %v10478_v22  ;;  %v7828_v37 = vcombine.low %v10478_v22, %v10478_v22  ;;  %v10491_v38 = vcombine.high %v10478_v22, %v10478_v22  ;;  %v10494_v43 = vsel %vm1036_vm0, 0, %v1159_v16  ;;  %v1160_v40 = vrot.slane %v1144_v18, 4  ;;  %v10496_v46 = vpop.f32.mrb[22].mxu1 }
 0x25a   : > { %13102 = vst [vmem:[#allocation56_spill] sm:$0xff] %v10494_v43  ;;  %v10500_v47 = vcombine.low %v10494_v43, %v10494_v43  ;;  %v10504_v51 = vcombine.high %v10494_v43, %v10494_v43  ;;  %v10507_v52 = vsel %vm1036_vm0, 0, %v1162_v23  ;;  %v10510_v56 = vpop.f32.mrb[23].mxu1  ;;  %v13115_v49 = vmax.f32 %v10481_v24, 0.0 }
 0x25b   : > { %13101 = vst [vmem:[#allocation55_spill] sm:$0xff] %v10491_v38  ;;  %13104 = vst [vmem:[#allocation58_spill] sm:$0xff] %v10507_v52  ;;  %v1264_v58 = vshrl.u32 %v7828_v37, 16  ;;  %v1267_v59 = vshll.u32 %v7828_v37, 16  ;;  %v10513_v60 = vshrl.u32 %v10491_v38, 16  ;;  %v10516_v61 = vshll.u32 %v10491_v38, 16 }
 0x25c   : > { %13103 = vst [vmem:[#allocation57_spill] sm:$0xff] %v10504_v51  ;;  %v7842_v2 = vrot.slane %v7828_v37, 11  ;;  %v1386_v5 = vrot.slane %v10491_v38, 7  ;;  %v1228_v7 = vshrl.u32 %v10500_v47, 16  ;;  %v10561_v44 = vshrl.u32 %v10504_v51, 16 }
 0x25d   : > { %v1266_v8 = vrot.slane %v1264_v58, 6  ;;  %v1269_v16 = vrot.slane %v1267_v59, 7  ;;  %v1275_v18 = vrot.slane %v10513_v60, 6  ;;  %v1278_v19 = vrot.slane %v10516_v61, 7 }
 0x25e   : > { %v10531_v23 = vsel %vm10520_vm10, %v7842_v2, %v1386_v5  ;;  %v10533_v11 = vrot.slane %v1264_v58, 11  ;;  %v1617_v37 = vrot.slane %v10513_v60, 7  ;;  %v10564_v0 = vshll.u32 %v10504_v51, 16 }
 0x25f   : > { %v1270_v62 = vor.u32 %v1269_v16, %v1266_v8  ;;  %v10537_v55 = vor.u32 %v1278_v19, %v1275_v18  ;;  %v1230_v16 = vrot.slane %v1228_v7, 6  ;;  %v1231_v18 = vshll.u32 %v10500_v47, 16 }
 0x260   : > { %v10554_v5 = vor.u32 %v1617_v37, %v10516_v61  ;;  %v10571_v8 = vrot.slane %v1228_v7, 11  ;;  %v10581_v12 = vcombine.high %v10507_v52, %v10507_v52  ;;  %v10586_v37 = vsel %vm1036_vm0, 0, %v1160_v40 }
 0x261   : > { %v10558_v19 = vrot.slane %v1270_v62, 4  ;;  %v1233_v6 = vrot.slane %v1231_v18, 7  ;;  %v7830_v62 = vcombine.low %v10507_v52, %v10507_v52  ;;  %13112 = vst [vmem:[#allocation60_spill] sm:$0xff] %v10586_v37  ;;  %v7826_v40 = vcombine.low %v10586_v37, %v10586_v37 }
 0x262   : > { %13111 = vst [vmem:[#allocation59_spill] sm:$0xff] %v10581_v12  ;;  %v10589_v32 = vshrl.u32 %v10581_v12, 16  ;;  %v10592_v27 = vshll.u32 %v10581_v12, 16  ;;  %v1390_v45 = vrot.slane %v10581_v12, 7  ;;  %v1132_v50 = vadd.f32 %v10496_v46, %v10454_v26 }
 0x263   : > { %v1234_v7 = vor.u32 %v1233_v6, %v1230_v16  ;;  %v1282_v18 = vshrl.u32 %v7830_v62, 16  ;;  %v1285_v54 = vshll.u32 %v7830_v62, 16  ;;  %v7843_v31 = vrot.slane %v7830_v62, 11 }
 0x264   : > { %13113 = vst [vmem:[#allocation61_spill] sm:$0xff] %v10592_v27  ;;  %v1293_v6 = vrot.slane %v10589_v32, 6  ;;  %v1296_v16 = vrot.slane %v10592_v27, 7  ;;  %v1622_v14 = vrot.slane %v10589_v32, 7  ;;  %v1249_v28 = vshll.u32 %v7826_v40, 16 }
 0x265   : > { %v1284_v13 = vrot.slane %v1282_v18, 6  ;;  %v1287_v30 = vrot.slane %v1285_v54, 7  ;;  %v10596_v2 = vrot.slane %v1282_v18, 11  ;;  %v10604_v62 = vsel %vm10520_vm10, %v7843_v31, %v1390_v45 }
 0x266   : > { %v10611_v4 = vor.u32 %v1296_v16, %v1293_v6  ;;  %v10614_v9 = vor.u32 %v1622_v14, %v10592_v27  ;;  %v7841_v16 = vrot.slane %v7826_v40, 11  ;;  %v1251_v54 = vrot.slane %v1249_v28, 7 }
 0x267   : > { %v1288_v29 = vor.u32 %v1287_v30, %v1284_v13  ;;  %v10622_v13 = vcombine.high %v10586_v37, %v10586_v37  ;;  %v1246_v30 = vshrl.u32 %v7826_v40, 16  ;;  %v1124_v45 = vadd.f32 %v10454_v26, %v10510_v56 }
 0x268   : > { %v1378_v28 = vrot.slane %v10504_v51, 7  ;;  %v10656_v48 = vrot.slane %v1234_v7, 4  ;;  %v1142_v46 = vmax.f32 %v1132_v50, 0.0  ;;  %v13118_v56 = vrot.slane %v10500_v47, 11 }
 0x269   : > { %v10618_v31 = vrot.slane %v1288_v29, 4  ;;  %13114 = vst [vmem:[#allocation62_spill] sm:$0xff] %v10622_v13  ;;  %v1149_v29 = vpack.c.bf16 %v13115_v49, %v13115_v49  ;;  %v1248_v18 = vrot.slane %v1246_v30, 6  ;;  %v10638_v10 = vshrl.u32 %v10622_v13, 16 }
 0x26a   : > { %v10641_v40 = vshll.u32 %v10622_v13, 16  ;;  %v10643_v6 = vrot.slane %v1246_v30, 11  ;;  %v1121_v49 = vadd.f32 %v10454_v26, %v10483_v25  ;;  %v1382_v30 = vrot.slane %v10622_v13, 7 }
 0x26b   : > { %v1165_v14 = vrot.slane %v1149_v29, 4  ;;  %v1252_v24 = vor.u32 %v1251_v54, %v1248_v18  ;;  %v1140_v18 = vmax.f32 %v1124_v45, 0.0  ;;  %v1150_v45 = vpack.c.bf16 %v1142_v46, %v1142_v46 }
 0x26c   : > { %v1139_v57 = vmax.f32 %v1121_v49, 0.0  ;;  %v1383_v29 = vsel %vm10520_vm10, %v7841_v16, %v1382_v30  ;;  %v13121_v13 = vrot.slane %v10561_v44, 6  ;;  %v1257_v27 = vrot.slane %v10638_v10, 6 }
 0x26d   : > { %v10653_v3 = vsel %vm1036_vm0, 0, %v1165_v14  ;;  %v1379_v14 = vsel %vm10520_vm10, %v13118_v56, %v1378_v28  ;;  %v1148_v47 = vpack.c.bf16 %v1140_v18, %v1140_v18  ;;  %v1166_v7 = vrot.slane %v1150_v45, 4 }
 0x26e   : > { %13116 = vst [vmem:[#allocation63_spill] sm:$0xff] %v10653_v3  ;;  %v7836_v25 = vcombine.low %v10653_v3, %v10653_v3  ;;  %v10662_v54 = vcombine.high %v10653_v3, %v10653_v3  ;;  %v1147_v26 = vpack.c.bf16 %v1139_v57, %v1139_v57  ;;  %v7848_v16 = vcombine.low %v1379_v14, %v1383_v29 }
 0x26f   : > { %v1164_v33 = vrot.slane %v1148_v47, 4  ;;  %v1242_v18 = vrot.slane %v10564_v0, 7  ;;  %v13120_v29 = vcombine.low %v10531_v23, %v10604_v62 }
 0x270   : > { %13117 = vst [vmem:[#allocation64_spill] sm:$0xff] %v10662_v54  ;;  %v1336_v49 = vshrl.u32 %v7836_v25, 16  ;;  %v1339_v36 = vshll.u32 %v7836_v25, 16  ;;  %v10672_v63 = vshrl.u32 %v10662_v54, 16  ;;  %v10675_v41 = vshll.u32 %v10662_v54, 16  ;;  %8650 = vmatprep.mubr.msk.bf16.mxu1 %vm1429_vm13, %v7848_v16 }
 0x271   : > { %v7846_v50 = vrot.slane %v7836_v25, 11  ;;  %v1163_v57 = vrot.slane %v1147_v26, 4  ;;  %v1402_v15 = vrot.slane %v10662_v54, 7  ;;  %v10700_v26 = vsel %vm1036_vm0, 0, %v1166_v7  ;;  %8651 = vmatmul.mubr.msk.bf16.vlgmr.msra.gmra.mrb[24].mxu1 %vm1429_vm13, %v13120_v29 }
 0x272   : > { %v10677_v39 = vrot.slane %v1336_v49, 6  ;;  %v10679_v28 = vrot.slane %v1339_v36, 7  ;;  %v10681_v56 = vrot.slane %v1336_v49, 11  ;;  %13119 = vst [vmem:[#allocation65_spill] sm:$0xff] %v10700_v26  ;;  %v10703_v14 = vsel %vm1036_vm0, 0, %v1164_v33  ;;  %8659 = vmatpush3.bf16.msra.mxu1 %v10413_v35 }
 0x273   : > { %v10684_v30 = vsel %vm1036_vm0, 0, %v1163_v57  ;;  %v10711_v49 = vsel %vm10520_vm10, %v7846_v50, %v1402_v15  ;;  %v10713_v57 = vrot.slane %v1252_v24, 4  ;;  %v7838_v23 = vcombine.low %v10700_v26, %v10700_v26  ;;  %8668 = vmatprep.subr.bf16.mxu1 %v10687_v53 }
 0x274   : > { %v7832_v46 = vcombine.low %v10684_v30, %v10684_v30  ;;  %v10695_v36 = vcombine.high %v10684_v30, %v10684_v30  ;;  %v10726_v15 = vcombine.high %v10700_v26, %v10700_v26  ;;  %v7834_v35 = vcombine.low %v10703_v14, %v10703_v14 }
 0x275   : > { %v1357_v25 = vshll.u32 %v7838_v23, 16  ;;  %v7847_v22 = vrot.slane %v7838_v23, 11  ;;  %v10743_v62 = vcombine.high %v10703_v14, %v10703_v14  ;;  %v1243_v51 = vor.u32 %v1242_v18, %v13121_v13 }
 0x276   : > { %v1300_v45 = vshrl.u32 %v7832_v46, 16  ;;  %v1303_v47 = vshll.u32 %v7832_v46, 16  ;;  %v10716_v16 = vshrl.u32 %v10695_v36, 16  ;;  %v10719_v7 = vshll.u32 %v10695_v36, 16 }
 0x277   : > { %v7844_v33 = vrot.slane %v7832_v46, 11  ;;  %v1354_v46 = vshrl.u32 %v7838_v23, 16  ;;  %v10736_v17 = vshrl.u32 %v10726_v15, 16  ;;  %v10739_v34 = vshll.u32 %v10726_v15, 16 }
 0x278   : > { %v1302_v24 = vrot.slane %v1300_v45, 6  ;;  %v1305_v50 = vrot.slane %v1303_v47, 7  ;;  %v10731_v29 = vrot.slane %v1300_v45, 11  ;;  %v1318_v47 = vshrl.u32 %v7834_v35, 16 }
 0x279   : > { %v1356_v45 = vrot.slane %v1354_v46, 6  ;;  %v1359_v26 = vrot.slane %v1357_v25, 7  ;;  %v10745_v3 = vrot.slane %v1354_v46, 11  ;;  %v1321_v37 = vshll.u32 %v7834_v35, 16 }
 0x27a   : > { %v1306_v52 = vor.u32 %v1305_v50, %v1302_v24  ;;  %v1320_v43 = vrot.slane %v1318_v47, 6  ;;  %v10748_v42 = vshrl.u32 %v10743_v62, 16  ;;  %v10751_v54 = vshll.u32 %v10743_v62, 16 }
 0x27b   : > { %v7845_v12 = vrot.slane %v7834_v35, 11  ;;  %v1360_v24 = vor.u32 %v1359_v26, %v1356_v45  ;;  %v1323_v23 = vrot.slane %v1321_v37, 7  ;;  %v10753_v50 = vrot.slane %v1318_v47, 11 }
 0x27c   : > { %v1394_v25 = vrot.slane %v10695_v36, 7  ;;  %v1398_v46 = vrot.slane %v10743_v62, 7  ;;  %v1406_v21 = vrot.slane %v10726_v15, 7  ;;  %v1260_v26 = vrot.slane %v10641_v40, 7 }
 0x27d   : > { %v1324_v20 = vor.u32 %v1323_v23, %v1320_v43  ;;  %v13122_v37 = vsel %vm10549_vm12, %v10618_v31, %v10611_v4  ;;  %v13123_v35 = vsel %vm10549_vm12, %v10558_v19, %v10537_v55  ;;  %v1244_v18 = vsel %vm10549_vm12, %v10656_v48, %v1243_v51 }
 0x27e   : > { %v7858_v47 = vcombine.low %v13123_v35, %v13122_v37  ;;  %v1395_v45 = vsel %vm10520_vm10, %v7844_v33, %v1394_v25  ;;  %v1399_v43 = vsel %vm10520_vm10, %v7845_v12, %v1398_v46  ;;  %v1407_v13 = vsel %vm10520_vm10, %v7847_v22, %v1406_v21 }
 0x27f   : > { %v7850_v4 = vcombine.low %v1395_v45, %v1399_v43  ;;  %v7851_v31 = vcombine.low %v10711_v49, %v1407_v13  ;;  %v1261_v23 = vor.u32 %v1260_v26, %v1257_v27  ;;  %v1307_v38 = vrot.slane %v1306_v52, 4 }
 0x280   : > { %v1311_v55 = vrot.slane %v10716_v16, 6  ;;  %v1314_v19 = vrot.slane %v10719_v7, 7  ;;  %v1325_v33 = vrot.slane %v1324_v20, 4  ;;  %v1329_v25 = vrot.slane %v10748_v42, 6 }
 0x281   : > { %8654 = vmatprep.mubr.msk.bf16.mxu1 %vm1429_vm13, %v7850_v4  ;;  %v1262_v12 = vsel %vm10549_vm12, %v10713_v57, %v1261_v23  ;;  %v1332_v48 = vrot.slane %v10751_v54, 7  ;;  %v13124_v21 = vor.u32 %v10679_v28, %v10677_v39  ;;  %v1347_v22 = vrot.slane %v10672_v63, 6 }
 0x282   : > { %8655 = vmatmul.mubr.msk.bf16.gmra.mrb[28].mxu1 %vm1429_vm13, %v7851_v31  ;;  %v7857_v20 = vcombine.low %v1244_v18, %v1262_v12  ;;  %v1315_v51 = vor.u32 %v1314_v19, %v1311_v55  ;;  %v1350_v52 = vrot.slane %v10675_v41, 7  ;;  %v1361_v49 = vrot.slane %v1360_v24, 4  ;;  %v10835_v12 = vld [vmem:[#allocation6 + $0x18] sm:$0xff]  }
 0x283   : > { %v1343_v27 = vrot.slane %v13124_v21, 4  ;;  %v1333_v46 = vor.u32 %v1332_v48, %v1329_v25  ;;  %v1365_v57 = vrot.slane %v10736_v17, 6  ;;  %v1368_v26 = vrot.slane %v10739_v34, 7 }
 0x284   : > { %v1607_v37 = vrot.slane %v10561_v44, 7  ;;  %8660 = vmatprep.mubr.msk.bf16.mxu1 %vm1429_vm13, %v7857_v20  ;;  %v1316_v39 = vsel %vm10549_vm12, %v1307_v38, %v1315_v51  ;;  %v1351_v28 = vor.u32 %v1350_v52, %v1347_v22  ;;  %v1612_v35 = vrot.slane %v10638_v10, 7 }
 0x285   : > { %v13125_v24 = vsel %vm10541_vm11, %v10596_v2, %v10614_v9  ;;  %v13126_v45 = vsel %vm10541_vm11, %v10533_v11, %v10554_v5  ;;  %v1334_v13 = vsel %vm10549_vm12, %v1325_v33, %v1333_v46  ;;  %v1369_v18 = vor.u32 %v1368_v26, %v1365_v57 }
 0x286   : > { %v10815_v43 = vcombine.low %v13126_v45, %v13125_v24  ;;  %v1608_v38 = vor.u32 %v1607_v37, %v10564_v0  ;;  %v1627_v4 = vrot.slane %v10716_v16, 7  ;;  %v7859_v31 = vcombine.low %v1316_v39, %v1334_v13 }
 0x287   : > { %v1352_v9 = vsel %vm10549_vm12, %v1343_v27, %v1351_v28  ;;  %v1613_v2 = vor.u32 %v1612_v35, %v10641_v40  ;;  %v1632_v11 = vrot.slane %v10748_v42, 7  ;;  %v1370_v5 = vsel %vm10549_vm12, %v1361_v49, %v1369_v18  ;;  %v13133_v28 = vld [vmem:[#allocation61_spill] sm:$0xff] }
 0x288   : > { %v1609_v23 = vsel %vm10541_vm11, %v10571_v8, %v1608_v38  ;;  %v1628_v55 = vor.u32 %v1627_v4, %v10719_v7  ;;  %v1637_v19 = vrot.slane %v10672_v63, 7  ;;  %v7860_v33 = vcombine.low %v1352_v9, %v1370_v5  ;;  %v13135_v5 = vld [vmem:[#allocation51_spill] sm:$0xff] }
 0x289   : > { %v1614_v25 = vsel %vm10541_vm11, %v10643_v6, %v1613_v2  ;;  %v1633_v48 = vor.u32 %v1632_v11, %v10751_v54  ;;  %v1642_v21 = vrot.slane %v10736_v17, 7  ;;  %v1855_v20 = vrot.slane %v10561_v44, 4 }
 0x28a   : > { %v7874_v27 = vcombine.low %v1609_v23, %v1614_v25  ;;  %v1629_v8 = vsel %vm10541_vm11, %v10731_v29, %v1628_v55  ;;  %v1638_v22 = vor.u32 %v1637_v19, %v10675_v41  ;;  %8661 = vmatmul.mubr.msk.bf16.vlgmr.msra.gmra.mrb[24].mxu1 %vm1429_vm13, %v7858_v47  ;;  %v1856_v52 = vrot.slane %v10564_v0, 5 }
 0x28b   : > { %v1634_v6 = vsel %vm10541_vm11, %v10753_v50, %v1633_v48  ;;  %v1643_v51 = vor.u32 %v1642_v21, %v10739_v34  ;;  %v1864_v49 = vrot.slane %v10638_v10, 4  ;;  %8664 = vmatprep.mubr.msk.bf16.mxu1 %vm1429_vm13, %v7859_v31  ;;  %8669 = vmatpush3.bf16.msra.mxu1 %v10687_v53  ;;  %v1865_v46 = vrot.slane %v10641_v40, 5 }
 0x28c   : > { %v10853_v29 = vcombine.low %v1629_v8, %v1634_v6  ;;  %v1639_v47 = vsel %vm10541_vm11, %v10681_v56, %v1638_v22  ;;  %v13127_v50 = vrot.slane %v10513_v60, 4  ;;  %v13128_v57 = vrot.slane %v10516_v61, 5  ;;  %8678 = vmatprep.subr.bf16.mxu1 %v10835_v12 }
 0x28d   : > { %v1644_v37 = vsel %vm10541_vm11, %v10745_v3, %v1643_v51  ;;  %v13129_v53 = vmov 0  ;;  %v1857_v56 = vor.u32 %v1856_v52, %v1855_v20  ;;  %v13132_v39 = vrot.slane %v10589_v32, 4 }
 0x28e   : > { %v1871_v26 = vor.u32 %v13128_v57, %v13127_v50  ;;  %v13130_v53 = vsel %vm10869_vm5, 4294967295, %v13129_v53  ;;  %v13134_v35 = vrot.slane %v13133_v28, 5  ;;  %v1879_v45 = vrot.slane %v10716_v16, 4 }
 0x28f   : > { %13131 = vst [vmem:[#allocation66_spill] sm:$0xff] %v13130_v53  ;;  %v10878_v13 = vcombine.low %v1639_v47, %v1644_v37  ;;  %v1866_v18 = vor.u32 %v1865_v46, %v1864_v49  ;;  %v1880_v3 = vrot.slane %v10719_v7, 5  ;;  %v1858_v4 = vrot.slane %v1857_v56, 4  ;;  %v13140_v56 = vld [vmem:[#allocation62_spill] sm:$0xff] }
 0x290   : > { %v1876_v24 = vor.u32 %v13134_v35, %v13132_v39  ;;  %v1872_v38 = vrot.slane %v1871_v26, 4  ;;  %v1884_v9 = vrot.slane %v10748_v42, 4  ;;  %v1885_v2 = vrot.slane %v10751_v54, 5  ;;  %v13139_v26 = vld [vmem:[#allocation57_spill] sm:$0xff]  ;;  %v13141_v35 = vld [vmem:[#allocation52_spill] sm:$0xff] }
 0x291   : > { %v1867_v11 = vrot.slane %v1866_v18, 4  ;;  %v1881_v55 = vor.u32 %v1880_v3, %v1879_v45  ;;  %v1889_v19 = vrot.slane %v10672_v63, 4  ;;  %v10892_v25 = vsel %vm10869_vm5, %v1858_v4, %v13135_v5  ;;  %v13144_v3 = vld [vmem:[#allocation59_spill] sm:$0xff] }
 0x292   : > { %v1877_v31 = vrot.slane %v1876_v24, 4  ;;  %v10886_v23 = vsel %vm10869_vm5, %v1872_v38, %v13135_v5  ;;  %v1886_v21 = vor.u32 %v1885_v2, %v1884_v9  ;;  %v1890_v8 = vrot.slane %v10675_v41, 5  ;;  %8665 = vmatmul.mubr.msk.bf16.gmra.mrb[28].mxu1 %vm1429_vm13, %v7860_v33  ;;  %v13142_v33 = vld [vmem:[#allocation55_spill] sm:$0xff] }
 0x293   : > { %v13136_v22 = vmov 0  ;;  %v10909_v20 = vsel %vm10869_vm5, %v1867_v11, %v13135_v5  ;;  %v1882_v51 = vrot.slane %v1881_v55, 4  ;;  %v1894_v52 = vrot.slane %v10736_v17, 4  ;;  %8670 = vmatprep.mubr.msk.bf16.mxu1 %vm1429_vm13, %v7874_v27 }
 0x294   : > { %v10897_v48 = vsel %vm10869_vm5, %v1877_v31, %v13135_v5  ;;  %v13137_v22 = vsel %vm10902_vm6, 4294967295, %v13136_v22  ;;  %v7893_v49 = vcombine.low %v10892_v25, %v10909_v20  ;;  %v1887_v47 = vrot.slane %v1886_v21, 4  ;;  %v13166_v25 = vld [vmem:[#allocation50_spill] sm:$0xff]  ;;  %v9472_v20 = vld [vmem:[%s12914_s7 + $0x4] ss:$8 sps:$4 sm:$0xff]  }
 0x295   : > { %13138 = vst [vmem:[#allocation61_spill] sm:$0xff] %v13137_v22  ;;  %v7894_v6 = vcombine.low %v10886_v23, %v10897_v48  ;;  %v1891_v46 = vor.u32 %v1890_v8, %v1889_v19  ;;  %v1895_v50 = vrot.slane %v10739_v34, 5  ;;  %v10922_v57 = vsel %vm10869_vm5, %v1882_v51, %v13135_v5  ;;  %v9470_v48 = vld [vmem:[%s12914_s7] ss:$8 sps:$4 sm:$0xff]  }
 0x296   : > { %v7902_v37 = vrot.slane %v13139_v26, 9  ;;  %v7903_v39 = vrot.slane %v13140_v56, 9  ;;  %v13143_v24 = vrot.slane %v13142_v33, 9  ;;  %v10936_v27 = vsel %vm10869_vm5, %v1887_v47, %v13135_v5  ;;  %v13146_v47 = vld [vmem:[#allocation64_spill] sm:$0xff] }
 0x297   : > { %v1892_v18 = vrot.slane %v1891_v46, 4  ;;  %v1896_v38 = vor.u32 %v1895_v50, %v1894_v52  ;;  %v13145_v4 = vrot.slane %v13144_v3, 9  ;;  %v7895_v9 = vcombine.low %v10922_v57, %v10936_v27  ;;  %v9476_v57 = vld [vmem:[%s12916_s9] sm:$0xff]   ;;  %v7928_v27 = vld [vmem:[#allocation7] ss:$0 sm:$0xff] }
 0x298   : > { %v10931_v45 = vsel %vm10902_vm6, %v13143_v24, %v13141_v35  ;;  %v10950_v2 = vsel %vm10902_vm6, %v7902_v37, %v13141_v35  ;;  %v10955_v11 = vsel %vm10902_vm6, %v7903_v39, %v13141_v35  ;;  %v7906_v51 = vrot.slane %v10695_v36, 9  ;;  %v9464_v37 = vld [vmem:[#allocation6 + $0x20] sm:$0xff]  }
 0x299   : > { %v10943_v31 = vsel %vm10902_vm6, %v13145_v4, %v13141_v35  ;;  %v10962_v19 = vsel %vm10869_vm5, %v1892_v18, %v13135_v5  ;;  %v1897_v21 = vrot.slane %v1896_v38, 4  ;;  %v7910_v8 = vcombine.low %v10950_v2, %v10955_v11 }
 0x29a   : > { %v7911_v55 = vcombine.low %v10931_v45, %v10943_v31  ;;  %v7907_v52 = vrot.slane %v10743_v62, 9  ;;  %v7908_v46 = vrot.slane %v13146_v47, 9  ;;  %v7909_v50 = vrot.slane %v10726_v15, 9  ;;  %8671 = vmatmul.mubr.msk.bf16.vlgmr.msra.gmra.mrb[24].mxu1 %vm1429_vm13, %v10815_v43  ;;  %v9479_v45 = vld [vmem:[%s12914_s7 + $0x34] ss:$8 sps:$4 sm:$0xff]  }
 0x29b   : > { %v2142_v26 = vrot.slane %v10561_v44, 5  ;;  %v10974_v56 = vsel %vm10869_vm5, %v1897_v21, %v13135_v5  ;;  %v10979_v39 = vsel %vm10902_vm6, %v7906_v51, %v13141_v35  ;;  %v2143_v36 = vrot.slane %v10564_v0, 6  ;;  %8674 = vmatprep.mubr.msk.bf16.mxu1 %vm1429_vm13, %v10853_v29  ;;  %8679 = vmatpush3.bf16.msra.mxu1 %v10835_v12 }
 0x29c   : > { %v2152_v62 = vrot.slane %v10638_v10, 5  ;;  %v7896_v15 = vcombine.low %v10962_v19, %v10974_v56  ;;  %v10988_v44 = vsel %vm10902_vm6, %v7907_v52, %v13141_v35  ;;  %v10993_v33 = vsel %vm10902_vm6, %v7908_v46, %v13141_v35  ;;  %8688 = vmatprep.subr.bf16.mxu1 %v9464_v37 }
 0x29d   : > { %v10998_v24 = vsel %vm10902_vm6, %v7909_v50, %v13141_v35  ;;  %v7912_v0 = vcombine.low %v10979_v39, %v10988_v44  ;;  %v2144_v18 = vor.u32 %v2143_v36, %v2142_v26  ;;  %v2153_v38 = vrot.slane %v10641_v40, 6 }
 0x29e   : > { %v7913_v10 = vcombine.low %v10993_v33, %v10998_v24  ;;  %v13147_v3 = vmov 0  ;;  %v13150_v43 = vrot.slane %v10513_v60, 5  ;;  %v13151_v4 = vrot.slane %v10516_v61, 6 }
 0x29f   : > { %v13148_v3 = vsel %vm11012_vm9, 4294967295, %v13147_v3  ;;  %v13152_v21 = vrot.slane %v10589_v32, 5  ;;  %v13153_v40 = vrot.slane %v13133_v28, 6  ;;  %v2167_v29 = vrot.slane %v10716_v16, 5  ;;  %v13154_v32 = vld [vmem:[#allocation54_spill] sm:$0xff] }
 0x2a0   : > { %13149 = vst [vmem:[#allocation57_spill] sm:$0xff] %v13148_v3  ;;  %v2159_v19 = vor.u32 %v13151_v4, %v13150_v43  ;;  %v2168_v12 = vrot.slane %v10719_v7, 6  ;;  %v2145_v52 = vrot.slane %v2144_v18, 4  ;;  %v2154_v47 = vor.u32 %v2153_v38, %v2152_v62 }
 0x2a1   : > { %v2164_v51 = vor.u32 %v13153_v40, %v13152_v21  ;;  %v2172_v46 = vrot.slane %v10748_v42, 5  ;;  %v2173_v50 = vrot.slane %v10751_v54, 6  ;;  %v2177_v56 = vrot.slane %v10672_v63, 5  ;;  %v13156_v21 = vld [vmem:[#allocation60_spill] sm:$0xff] }
 0x2a2   : > { %v2160_v60 = vrot.slane %v2159_v19, 4  ;;  %v2169_v61 = vor.u32 %v2168_v12, %v2167_v29  ;;  %v2151_v28 = vsel %vm11012_vm9, %v2145_v52, %v13154_v32  ;;  %v2155_v39 = vrot.slane %v2154_v47, 4  ;;  %8675 = vmatmul.mubr.msk.bf16.gmra.mrb[28].mxu1 %vm1429_vm13, %v10878_v13  ;;  %v13155_v19 = vld [vmem:[#allocation56_spill] sm:$0xff] }
 0x2a3   : > { %v2165_v26 = vrot.slane %v2164_v51, 4  ;;  %v2174_v16 = vor.u32 %v2173_v50, %v2172_v46  ;;  %v2178_v7 = vrot.slane %v10675_v41, 6  ;;  %v2182_v62 = vrot.slane %v10736_v17, 5  ;;  %v9465_v47 = vld [vmem:[#allocation6 + $0x28] sm:$0xff]  }
 0x2a4   : > { %v2161_v36 = vsel %vm11012_vm9, %v2160_v60, %v13154_v32  ;;  %v2170_v54 = vrot.slane %v2169_v61, 4  ;;  %v2156_v63 = vsel %vm11012_vm9, %v2155_v39, %v13154_v32  ;;  %v2183_v41 = vrot.slane %v10739_v34, 6  ;;  %v13158_v50 = vld [vmem:[#allocation53_spill] sm:$0xff]  ;;  %v13159_v60 = vld [vmem:[#allocation58_spill] sm:$0xff] }
 0x2a5   : > { %v2166_v42 = vsel %vm11012_vm9, %v2165_v26, %v13154_v32  ;;  %v2175_v18 = vrot.slane %v2174_v16, 4  ;;  %v2179_v38 = vor.u32 %v2178_v7, %v2177_v56  ;;  %v7919_v43 = vcombine.low %v2151_v28, %v2156_v63  ;;  %v13162_v56 = vld [vmem:[#allocation63_spill] sm:$0xff]  ;;  %v13163_v28 = vld [vmem:[#allocation65_spill] sm:$0xff] }
 0x2a6   : > { %v7920_v44 = vcombine.low %v2161_v36, %v2166_v42  ;;  %v2171_v4 = vsel %vm11012_vm9, %v2170_v54, %v13154_v32  ;;  %v13157_v40 = vcombine.high %v13155_v19, %v13156_v21  ;;  %v2184_v12 = vor.u32 %v2183_v41, %v2182_v62  ;;  %v9466_v16 = vld [vmem:[#allocation6 + $0x30] sm:$0xff]  }
 0x2a7   : > { %v2176_v17 = vsel %vm11012_vm9, %v2175_v18, %v13154_v32  ;;  %v2180_v29 = vrot.slane %v2179_v38, 4  ;;  %v13160_v26 = vcombine.high %v13158_v50, %v13159_v60  ;;  %v13161_v61 = vcombine.high %v10684_v30, %v10703_v14  ;;  %v9469_v30 = vld [vmem:[%s12914_s7 + $0x14] ss:$8 sps:$4 sm:$0xff]   ;;  %v9467_v14 = vld [vmem:[%s12914_s7 + $0x10] ss:$8 sps:$4 sm:$0xff]  }
 0x2a8   : > { %8680 = vmatprep.mubr.msk.bf16.mxu1 %vm1429_vm13, %v13157_v40  ;;  %v7921_v51 = vcombine.low %v2171_v4, %v2176_v17  ;;  %v2185_v34 = vrot.slane %v2184_v12, 4  ;;  %v13164_v39 = vcombine.high %v13162_v56, %v13163_v28  ;;  %v13165_v23 = vmov 0   ;;  %v9481_v50 = vld [vmem:[%s12914_s7 + $0x40] ss:$8 sps:$4 sm:$0xff]   ;;  %v9486_v60 = vld [vmem:[%s12914_s7 + $0x54] ss:$8 sps:$4 sm:$0xff]  }
 0x2a9   : > { %v2181_v13 = vsel %vm11012_vm9, %v2180_v29, %v13154_v32  ;;  %v13169_v56 = vld [vmem:[#allocation39_spill] sm:$0xff]  ;;  %v9484_v28 = vld [vmem:[%s12914_s7 + $0x50] ss:$8 sps:$4 sm:$0xff]  }
 0x2aa   : > { %v2186_v52 = vsel %vm11012_vm9, %v2185_v34, %v13154_v32  ;;  %8681 = vmatmul.mubr.msk.bf16.vlgmr.msra.gmra.mrb[24].mxu1 %vm1429_vm13, %v13160_v26  ;;  %v13167_v26 = vld [vmem:[#allocation27_spill] sm:$0xff] }
 0x2ab   : > { %v7922_v46 = vcombine.low %v2181_v13, %v2186_v52  ;;  %8684 = vmatprep.mubr.msk.bf16.mxu1 %vm1429_vm13, %v13161_v61  ;;  %8689 = vmatpush3.bf16.msra.mxu1 %v9464_v37  ;;  %v13168_v61 = vld [vmem:[#allocation32_spill] sm:$0xff] }
 0x2ac   : > { %8698 = vmatprep.subr.bf16.mxu1 %v9465_v47 }
 0x2b2   : > { %8685 = vmatmul.mubr.msk.bf16.gmra.mrb[28].mxu1 %vm1429_vm13, %v13164_v39  ;;  %v9489_v39 = vld [vmem:[%s12914_s7 + $0x64] ss:$8 sps:$4 sm:$0xff]  }
 0x2b3   : > { %8690 = vmatprep.mubr.msk.bf16.mxu1 %vm1429_vm13, %v7893_v49  ;;  %v9475_v49 = vld [vmem:[%s12914_s7 + $0x20] ss:$8 sps:$4 sm:$0xff]  }
 0x2ba   : > { %8691 = vmatmul.mubr.msk.bf16.vlgmr.msra.gmra.mrb[24].mxu1 %vm1429_vm13, %v7894_v6  ;;  %v9473_v6 = vld [vmem:[%s12914_s7 + $0x24] ss:$8 sps:$4 sm:$0xff]  }
 0x2bb   : > { %8694 = vmatprep.mubr.msk.bf16.mxu1 %vm1429_vm13, %v7895_v9  ;;  %8699 = vmatpush3.bf16.msra.mxu1 %v9465_v47 }
 0x2bc   : > { %8708 = vmatprep.subr.bf16.mxu1 %v9466_v16  ;;  %2552 = vmatprep.subr.bf16.mxu0 %v9473_v6  ;;  %v9491_v6 = vld [vmem:[%s12918_s11] sm:$0xff]  }
 0x2bd   : > { %2553 = vmatpush1.bf16.msra.mxu0 %v9475_v49 }
 0x2be   : > { %2660 = vmatprep.subr.bf16.mxu0 %v9479_v45 }
 0x2c2   : > { %8695 = vmatmul.mubr.msk.bf16.gmra.mrb[28].mxu1 %vm1429_vm13, %v7896_v15 }
 0x2c3   : > { %8700 = vmatprep.mubr.msk.bf16.mxu1 %vm1429_vm13, %v7910_v8 }
 0x2ca   : > { %8701 = vmatmul.mubr.msk.bf16.vlgmr.msra.gmra.mrb[24].mxu1 %vm1429_vm13, %v7911_v55 }
 0x2cb   : > { %8704 = vmatprep.mubr.msk.bf16.mxu1 %vm1429_vm13, %v7912_v0  ;;  %8709 = vmatpush3.bf16.msra.mxu1 %v9466_v16  ;;  %v13170_v16 = vld [vmem:[#allocation46_spill] sm:$0xff] }
 0x2cc   : > { %2365 = vmatprep.subr.bf16.mxu1 %v9469_v30 }
 0x2d2   : > { %8705 = vmatmul.mubr.msk.bf16.gmra.mrb[28].mxu1 %vm1429_vm13, %v7913_v10 }
 0x2d3   : > { %8710 = vmatprep.mubr.msk.bf16.mxu1 %vm1429_vm13, %v7919_v43  ;;  %v9483_v43 = vld [vmem:[%s12914_s7 + $0x44] ss:$8 sps:$4 sm:$0xff]  }
 0x2da   : > { %8711 = vmatmul.mubr.msk.bf16.vlgmr.msra.gmra.mrb[24].mxu1 %vm1429_vm13, %v7920_v44  ;;  %v9477_v44 = vld [vmem:[%s12914_s7 + $0x30] ss:$8 sps:$4 sm:$0xff]  }
 0x2db   : > { %8714 = vmatprep.mubr.msk.bf16.mxu1 %vm1429_vm13, %v7921_v51  ;;  %2366 = vmatpush1.bf16.msra.mxu1 %v9467_v14 }
 0x2dc   : > { %2460 = vmatprep.subr.bf16.mxu1 %v9472_v20  ;;  %v9490_v20 = vld [vmem:[%s12918_s11 + $0x8] sm:$0xff]  }
 0x2e2   : > { %8715 = vmatmul.mubr.msk.bf16.gmra.mrb[28].mxu1 %vm1429_vm13, %v7922_v46  ;;  %v9480_v46 = vld [vmem:[%s12916_s9 + $0x8] sm:$0xff]  }
 0x2e3   : > { %2397 = vmatprep.mubr.bf16.mxu1 %v13165_v23 }
 0x2ea   : > { %7936 = vmatmul.mubr.msk.bf16.vlgmr.msra.gmra.mrb[32].mxu1 %vm1429_vm13, %v13166_v25 }
 0x2eb   : > { %2407 = vmatprep.mubr.bf16.mxu1 %v13165_v23  ;;  %2461 = vmatpush1.bf16.msra.mxu1 %v9470_v48  ;;  %v9487_v48 = vld [vmem:[%s12914_s7 + $0x60] ss:$8 sps:$4 sm:$0xff]  }
 0x2ec   : > { %8718 = vmatprep.subr.bf16.mxu1 %v9476_v57 }
 0x3ad   : > { %v8712_v31 = vpop.f32.mrb[24].mxu1 }
 0x3ae   : > { %v2302_v9 = vadd.f32 %v8712_v31, %v7928_v27  ;;  %v2254_v2 = vpop.f32.mrb[25].mxu1 }
 0x3af   : > { %v2300_v11 = vadd.f32 %v7928_v27, %v2254_v2  ;;  %v8713_v55 = vpop.f32.mrb[26].mxu1 }
 0x3b0   : > { %v2303_v8 = vadd.f32 %v8713_v55, %v7928_v27  ;;  %v2257_v37 = vpop.f32.mrb[27].mxu1  ;;  %v2310_v24 = vmax.f32 %v2302_v9, 0.0 }
 0x3b1   : > { %v2308_v15 = vmax.f32 %v2300_v11, 0.0  ;;  %v2301_v33 = vadd.f32 %v7928_v27, %v2257_v37 }
 0x3b2   : > { %v2311_v0 = vmax.f32 %v2303_v8, 0.0 }
 0x3b3   : > { %v2316_v10 = vpack.c.bf16 %v2308_v15, %v2308_v15  ;;  %v2309_v7 = vmax.f32 %v2301_v33, 0.0 }
 0x3b4   : > { %v11132_v36 = vpack.c.bf16 %v2311_v0, %v2310_v24 }
 0x3b5   : > { %v7940_v42 = vcombine.low %v13165_v23, %v2316_v10  ;;  %v8423_v54 = vpack.c.bf16 %v2309_v7, %v2308_v15  ;;  %v11135_v62 = vpack.c.bf16 %v2310_v24, %v2309_v7  ;;  %v8716_v63 = vpop.f32.mrb[28].mxu1  ;;  %v9497_v15 = vld [vmem:[#allocation13 + $0x8] sm:$0xff]  }
 0x3b6   : > { %v2306_v18 = vadd.f32 %v8716_v63, %v7928_v27  ;;  %v2270_v38 = vpop.f32.mrb[29].mxu1 }
 0x3b7   : > { %v2304_v41 = vadd.f32 %v7928_v27, %v2270_v38  ;;  %v8717_v4 = vpop.f32.mrb[30].mxu1  ;;  %7937 = vmatmul.mubr.msk.bf16.gmra.mrb[36].mxu1 %vm1429_vm13, %v8423_v54  ;;  %7954 = vmatmul.mubr.msk.bf16.vlgmr.msra.gmra.mrb[0].mxu0 %vm1429_vm13, %v7940_v42 }
 0x3b8   : > { %v2307_v17 = vadd.f32 %v8717_v4, %v7928_v27  ;;  %v2273_v19 = vpop.f32.mrb[31].mxu1  ;;  %2417 = vmatprep.mubr.bf16.mxu1 %v13165_v23  ;;  %2594 = vmatprep.mubr.bf16.mxu0 %v13165_v23  ;;  %v2314_v51 = vmax.f32 %v2306_v18, 0.0 }
 0x3b9   : > { %v2312_v21 = vmax.f32 %v2304_v41, 0.0  ;;  %v2305_v40 = vadd.f32 %v7928_v27, %v2273_v19  ;;  %2661 = vmatpush1.bf16.msra.mxu0 %v9477_v44 }
 0x3ba   : > { %v2315_v29 = vmax.f32 %v2307_v17, 0.0  ;;  %2766 = vmatprep.subr.bf16.mxu0 %v9483_v43 }
 0x3bb   : > { %v11147_v12 = vpack.c.bf16 %v2312_v21, %v2311_v0  ;;  %v2313_v34 = vmax.f32 %v2305_v40, 0.0 }
 0x3bc   : > { %v8429_v13 = vpack.c.bf16 %v2315_v29, %v2314_v51  ;;  %v2323_v30 = vpack.c.bf16 %v2315_v29, %v2315_v29 }
 0x3bd   : > { %v8425_v52 = vpack.c.bf16 %v2313_v34, %v2312_v21  ;;  %v11149_v47 = vpack.c.bf16 %v2314_v51, %v2313_v34 }
 0x3be   : > { %v7969_v14 = vcombine.low %v2323_v30, %v13165_v23 }
 0x3bf   : > { %7938 = vmatmul.mubr.msk.bf16.gmra.mrb[40].mxu1 %vm1429_vm13, %v11132_v36  ;;  %7955 = vmatmul.mubr.msk.bf16.gmra.mrb[4].mxu0 %vm1429_vm13, %v11135_v62 }
 0x3c0   : > { %2427 = vmatprep.mubr.bf16.mxu1 %v13165_v23  ;;  %2604 = vmatprep.mubr.bf16.mxu0 %v13165_v23 }
 0x3c7   : > { %7939 = vmatmul.mubr.msk.bf16.gmra.mrb[44].mxu1 %vm1429_vm13, %v8425_v52  ;;  %7956 = vmatmul.mubr.msk.bf16.gmra.mrb[8].mxu0 %vm1429_vm13, %v11147_v12 }
 0x3c8   : > { %2492 = vmatprep.mubr.bf16.mxu1 %v13165_v23  ;;  %2614 = vmatprep.mubr.bf16.mxu0 %v13165_v23 }
 0x3cf   : > { %7945 = vmatmul.mubr.msk.bf16.vlgmr.msra.gmra.mrb[32].mxu1 %vm1429_vm13, %v13166_v25  ;;  %7957 = vmatmul.mubr.msk.bf16.gmra.mrb[12].mxu0 %vm1429_vm13, %v11149_v47 }
 0x3d0   : > { %8719 = vmatpush3.bf16.msra.mxu1 %v9476_v57  ;;  %2502 = vmatprep.mubr.bf16.mxu1 %v13165_v23 }
 0x3d1   : > { %2692 = vmatprep.mubr.bf16.mxu0 %v13165_v23  ;;  %8720 = vmatprep.subr.bf16.mxu1 %v9480_v46 }
 0x3d4   : > { %8721 = vmatpush3.bf16.msra.mxu1 %v9480_v46 }
 0x3d5   : > { %8730 = vmatprep.subr.bf16.mxu1 %v9490_v20 }
 0x3d7   : > { %7946 = vmatmul.mubr.msk.bf16.gmra.mrb[36].mxu1 %vm1429_vm13, %v7940_v42  ;;  %7963 = vmatmul.mubr.msk.bf16.vlgmr.msra.gmra.mrb[0].mxu0 %vm1429_vm13, %v8423_v54 }
 0x3d8   : > { %2512 = vmatprep.mubr.bf16.mxu1 %v13165_v23  ;;  %2702 = vmatprep.mubr.bf16.mxu0 %v13165_v23 }
 0x3d9   : > { %2767 = vmatpush1.bf16.msra.mxu0 %v9481_v50 }
 0x3da   : > { %2868 = vmatprep.subr.bf16.mxu0 %v9486_v60 }
 0x3df   : > { %7947 = vmatmul.mubr.msk.bf16.gmra.mrb[40].mxu1 %vm1429_vm13, %v11135_v62  ;;  %7964 = vmatmul.mubr.msk.bf16.gmra.mrb[4].mxu0 %vm1429_vm13, %v11132_v36 }
 0x3e0   : > { %2522 = vmatprep.mubr.bf16.mxu1 %v13165_v23  ;;  %2712 = vmatprep.mubr.bf16.mxu0 %v13165_v23 }
 0x3e7   : > { %7948 = vmatmul.mubr.msk.bf16.gmra.mrb[44].mxu1 %vm1429_vm13, %v11147_v12  ;;  %7965 = vmatmul.mubr.msk.bf16.gmra.mrb[8].mxu0 %vm1429_vm13, %v8425_v52 }
 0x3e8   : > { %2722 = vmatprep.mubr.bf16.mxu0 %v13165_v23  ;;  %8722 = vmatprep.mubr.msk.bf16.mxu1 %vm870_vm1, %v13167_v26 }
 0x3ef   : > { %7966 = vmatmul.mubr.msk.bf16.gmra.mrb[12].mxu0 %vm1429_vm13, %v8429_v13  ;;  %8723 = vmatmul.mubr.msk.bf16.vlgmr.msra.gmra.mrb[48].mxu1 %vm870_vm1, %v13168_v61 }
 0x3f0   : > { %2798 = vmatprep.mubr.bf16.mxu0 %v13165_v23  ;;  %8726 = vmatprep.mubr.msk.bf16.mxu1 %vm870_vm1, %v13169_v56 }
 0x3f1   : > { %8731 = vmatpush3.bf16.msra.mxu1 %v9490_v20 }
 0x3f2   : > { %8740 = vmatprep.subr.bf16.mxu1 %v9491_v6 }
 0x3f7   : > { %7972 = vmatmul.mubr.msk.bf16.vlgmr.msra.gmra.mrb[0].mxu0 %vm1429_vm13, %v11135_v62  ;;  %8727 = vmatmul.mubr.msk.bf16.gmra.mrb[52].mxu1 %vm870_vm1, %v13170_v16 }
 0x3f8   : > { %2808 = vmatprep.mubr.bf16.mxu0 %v13165_v23  ;;  %2869 = vmatpush1.bf16.msra.mxu0 %v9484_v28 }
 0x3f9   : > { %2970 = vmatprep.subr.bf16.mxu0 %v9489_v39  ;;  %8732 = vmatprep.mubr.msk.bf16.mxu1 %vm1429_vm13, %v13166_v25 }
 0x3ff   : > { %7973 = vmatmul.mubr.msk.bf16.gmra.mrb[4].mxu0 %vm1429_vm13, %v11147_v12 }
 0x400   : > { %2818 = vmatprep.mubr.bf16.mxu0 %v13165_v23 }
 0x407   : > { %7974 = vmatmul.mubr.msk.bf16.gmra.mrb[8].mxu0 %vm1429_vm13, %v11149_v47 }
 0x408   : > { %2828 = vmatprep.mubr.bf16.mxu0 %v13165_v23 }
 0x40f   : > { %7975 = vmatmul.mubr.msk.bf16.gmra.mrb[12].mxu0 %vm1429_vm13, %v7969_v14 }
 0x410   : > { %2900 = vmatprep.mubr.bf16.mxu0 %v13165_v23 }
 0x417   : > { %7980 = vmatmul.mubr.msk.bf16.vlgmr.msra.gmra.mrb[0].mxu0 %vm1429_vm13, %v11132_v36  ;;  %v8008_v36 = vld [vmem:[#allocation10] ss:$0 sm:$0xff] }
 0x418   : > { %2910 = vmatprep.mubr.bf16.mxu0 %v13165_v23  ;;  %2971 = vmatpush1.bf16.msra.mxu0 %v9487_v48 }
 0x419   : > { %8800 = vmatprep.subr.bf16.mxu0 %v9497_v15 }
 0x41f   : > { %7981 = vmatmul.mubr.msk.bf16.gmra.mrb[4].mxu0 %vm1429_vm13, %v8425_v52 }
 0x420   : > { %2920 = vmatprep.mubr.bf16.mxu0 %v13165_v23 }
 0x427   : > { %7982 = vmatmul.mubr.msk.bf16.gmra.mrb[8].mxu0 %vm1429_vm13, %v8429_v13 }
 0x428   : > { %2930 = vmatprep.mubr.bf16.mxu0 %v13165_v23 }
 0x42f   : > { %7983 = vmatmul.mubr.msk.bf16.gmra.mrb[12].mxu0 %vm1429_vm13, %v13166_v25 }
 0x430   : > { %3002 = vmatprep.mubr.bf16.mxu0 %v13165_v23 }
 0x437   : > { %7988 = vmatmul.mubr.msk.bf16.vlgmr.msra.gmra.mrb[0].mxu0 %vm1429_vm13, %v11147_v12  ;;  %v9492_v12 = vld [vmem:[%s12918_s11 + $0x10] sm:$0xff]  }
 0x438   : > { %3012 = vmatprep.mubr.bf16.mxu0 %v13165_v23  ;;  %8801 = vmatpush3.bf16.msra.mxu0 %v9497_v15  ;;  %v9494_v15 = vld [vmem:[%s12918_s11 + $0x20] sm:$0xff]  }
 0x43f   : > { %7989 = vmatmul.mubr.msk.bf16.gmra.mrb[4].mxu0 %vm1429_vm13, %v11149_v47 }
 0x440   : > { %3022 = vmatprep.mubr.bf16.mxu0 %v13165_v23 }
 0x447   : > { %7990 = vmatmul.mubr.msk.bf16.gmra.mrb[8].mxu0 %vm1429_vm13, %v7969_v14 }
 0x448   : > { %3032 = vmatprep.mubr.bf16.mxu0 %v13165_v23 }
 0x44f   : > { %7991 = vmatmul.mubr.msk.bf16.gmra.mrb[12].mxu0 %vm1429_vm13, %v13166_v25 }
 0x4a2   : > { %v11250_v49 = vpop.f32.mrb[32].mxu1 }
 0x4a3   : > { %v11252_v57 = vpop.f32.mrb[33].mxu1 }
 0x4a4   : > { %v11254_v45 = vpop.f32.mrb[34].mxu1 }
 0x4a5   : > { %v11256_v27 = vpop.f32.mrb[35].mxu1 }
 0x4aa   : > { %v11258_v31 = vpop.f32.mrb[36].mxu1 }
 0x4ab   : > { %v11260_v9 = vpop.f32.mrb[37].mxu1 }
 0x4ac   : > { %v11262_v2 = vpop.f32.mrb[38].mxu1 }
 0x4ad   : > { %v11264_v11 = vpop.f32.mrb[39].mxu1 }
 0x4b2   : > { %v11266_v55 = vpop.f32.mrb[40].mxu1 }
 0x4b3   : > { %v11268_v8 = vpop.f32.mrb[41].mxu1 }
 0x4b4   : > { %v11270_v37 = vpop.f32.mrb[42].mxu1 }
 0x4b5   : > { %v11272_v33 = vpop.f32.mrb[43].mxu1 }
 0x4ba   : > { %v11274_v24 = vpop.f32.mrb[44].mxu1 }
 0x4bb   : > { %v11276_v0 = vpop.f32.mrb[45].mxu1 }
 0x4bc   : > { %v11278_v10 = vpop.f32.mrb[46].mxu1 }
 0x4bd   : > { %v11280_v7 = vpop.f32.mrb[47].mxu1 }
 0x4c2   : > { %v8724_v42 = vpop.f32.mrb[48].mxu1 }
 0x4c3   : > { %v3242_v54 = vadd.f32 %v8724_v42, %v8008_v36  ;;  %v3233_v62 = vpop.f32.mrb[49].mxu1  ;;  %v3059_v42 = vld [vmem:[#allocation9] sm:$0x3] }
 0x4c4   : > { %v3234_v63 = vadd.f32 %v8008_v36, %v3233_v62  ;;  %v8725_v44 = vpop.f32.mrb[50].mxu1 }
 0x4c5   : > { %v3245_v18 = vadd.f32 %v8725_v44, %v8008_v36  ;;  %v3236_v38 = vpop.f32.mrb[51].mxu1  ;;  %v3266_v41 = vmax.f32 %v3242_v54, 0.0  ;;  %v13171_v54 = vld [vmem:[#allocation47_spill] sm:$0xff]  ;;  %v13172_v44 = vld [vmem:[#allocation48_spill] sm:$0xff] }
 0x4c6   : > { %v3237_v43 = vadd.f32 %v8008_v36, %v3236_v38  ;;  %v3264_v17 = vmax.f32 %v3234_v63, 0.0  ;;  %v11331_v62 = vrot.slane %v3059_v42, %v13171_v54  ;;  %v9496_v38 = vld [vmem:[%s12918_s11 + $0x30] sm:$0xff]  }
 0x4c7   : > { %v3267_v4 = vmax.f32 %v3245_v18, 0.0  ;;  %v11334_v18 = vrot.slane %v3059_v42, %v13172_v44 }
 0x4c8   : > { %v3265_v19 = vmax.f32 %v3237_v43, 0.0  ;;  %v3272_v48 = vpack.c.bf16 %v3264_v17, %v3264_v17 }
 0x4c9   : > { %v11282_v21 = vpack.c.bf16 %v3267_v4, %v3266_v41 }
 0x4ca   : > { %v8438_v40 = vpack.c.bf16 %v3265_v19, %v3264_v17  ;;  %v8441_v51 = vpack.c.bf16 %v3266_v41, %v3265_v19  ;;  %v8728_v29 = vpop.f32.mrb[52].mxu1  ;;  %v8025_v20 = vcombine.low %v13165_v23, %v3272_v48 }
 0x4cb   : > { %v3258_v34 = vadd.f32 %v8728_v29, %v8008_v36  ;;  %v3249_v13 = vpop.f32.mrb[53].mxu1 }
 0x4cc   : > { %v3250_v52 = vadd.f32 %v8008_v36, %v3249_v13  ;;  %v8729_v47 = vpop.f32.mrb[54].mxu1  ;;  %8733 = vmatmul.mubr.msk.bf16.vlgmr.msra.gmra.mrb[56].mxu1 %vm1429_vm13, %v8438_v40 }
 0x4cd   : > { %v3261_v46 = vadd.f32 %v8729_v47, %v8008_v36  ;;  %v3252_v50 = vpop.f32.mrb[55].mxu1  ;;  %8736 = vmatprep.mubr.msk.bf16.mxu1 %vm1429_vm13, %v11282_v21  ;;  %8741 = vmatpush3.bf16.msra.mxu1 %v9491_v6  ;;  %v3270_v61 = vmax.f32 %v3258_v34, 0.0  ;;  %v9493_v6 = vld [vmem:[%s12918_s11 + $0x18] sm:$0xff]  }
 0x4ce   : > { %v3268_v60 = vmax.f32 %v3250_v52, 0.0  ;;  %v3253_v26 = vadd.f32 %v8008_v36, %v3252_v50  ;;  %8750 = vmatprep.subr.bf16.mxu1 %v9492_v12  ;;  %v9495_v36 = vld [vmem:[%s12918_s11 + $0x28] sm:$0xff]  }
 0x4cf   : > { %v3271_v56 = vmax.f32 %v3261_v46, 0.0 }
 0x4d0   : > { %v11290_v28 = vpack.c.bf16 %v3268_v60, %v3267_v4  ;;  %v3269_v39 = vmax.f32 %v3253_v26, 0.0 }
 0x4d1   : > { %v11292_v16 = vpack.c.bf16 %v3271_v56, %v3270_v61  ;;  %v3279_v29 = vpack.c.bf16 %v3271_v56, %v3271_v56 }
 0x4d2   : > { %v11294_v30 = vpack.c.bf16 %v3269_v39, %v3268_v60  ;;  %v11296_v14 = vpack.c.bf16 %v3270_v61, %v3269_v39 }
 0x4d4   : > { %8737 = vmatmul.mubr.msk.bf16.gmra.mrb[60].mxu1 %vm1429_vm13, %v11294_v30 }
 0x4d5   : > { %8742 = vmatprep.mubr.msk.bf16.mxu1 %vm1429_vm13, %v13166_v25 }
 0x4dc   : > { %8743 = vmatmul.mubr.msk.bf16.vlgmr.msra.gmra.mrb[56].mxu1 %vm1429_vm13, %v8025_v20 }
 0x4dd   : > { %8746 = vmatprep.mubr.msk.bf16.mxu1 %vm1429_vm13, %v8441_v51  ;;  %8751 = vmatpush3.bf16.msra.mxu1 %v9492_v12 }
 0x4de   : > { %8760 = vmatprep.subr.bf16.mxu1 %v9493_v6 }
 0x4e4   : > { %8747 = vmatmul.mubr.msk.bf16.gmra.mrb[60].mxu1 %vm1429_vm13, %v11290_v28 }
 0x4e5   : > { %8752 = vmatprep.mubr.msk.bf16.mxu1 %vm1429_vm13, %v8025_v20 }
 0x4ec   : > { %8753 = vmatmul.mubr.msk.bf16.vlgmr.msra.gmra.mrb[56].mxu1 %vm1429_vm13, %v8441_v51 }
 0x4ed   : > { %8756 = vmatprep.mubr.msk.bf16.mxu1 %vm1429_vm13, %v11290_v28  ;;  %8761 = vmatpush3.bf16.msra.mxu1 %v9493_v6 }
 0x4ee   : > { %8770 = vmatprep.subr.bf16.mxu1 %v9494_v15 }
 0x4f4   : > { %8757 = vmatmul.mubr.msk.bf16.gmra.mrb[60].mxu1 %vm1429_vm13, %v11296_v14 }
 0x4f5   : > { %8762 = vmatprep.mubr.msk.bf16.mxu1 %vm1429_vm13, %v8438_v40 }
 0x4fc   : > { %8763 = vmatmul.mubr.msk.bf16.vlgmr.msra.gmra.mrb[56].mxu1 %vm1429_vm13, %v11282_v21 }
 0x4fd   : > { %8766 = vmatprep.mubr.msk.bf16.mxu1 %vm1429_vm13, %v11294_v30  ;;  %8771 = vmatpush3.bf16.msra.mxu1 %v9494_v15 }
 0x4fe   : > { %8780 = vmatprep.subr.bf16.mxu1 %v9495_v36 }
 0x504   : > { %8767 = vmatmul.mubr.msk.bf16.gmra.mrb[60].mxu1 %vm1429_vm13, %v11292_v16 }
 0x505   : > { %8772 = vmatprep.mubr.msk.bf16.mxu1 %vm1429_vm13, %v8441_v51 }
 0x50a   : > { %v3004_v63 = vpop.f32.mrb[0].mxu0 }
 0x50b   : > { %v8940_v43 = vadd.f32 %v3004_v63, %v11250_v49  ;;  %v3006_v41 = vpop.f32.mrb[1].mxu0 }
 0x50c   : > { %v8941_v4 = vadd.f32 %v3006_v41, %v11252_v57  ;;  %v3008_v17 = vpop.f32.mrb[2].mxu0  ;;  %8773 = vmatmul.mubr.msk.bf16.vlgmr.msra.gmra.mrb[56].mxu1 %vm1429_vm13, %v11290_v28 }
 0x50d   : > { %v3071_v19 = vadd.f32 %v8940_v43, %v11331_v62  ;;  %v8942_v40 = vadd.f32 %v3008_v17, %v11254_v45  ;;  %v3010_v51 = vpop.f32.mrb[3].mxu0  ;;  %8776 = vmatprep.mubr.msk.bf16.mxu1 %vm1429_vm13, %v11296_v14  ;;  %8781 = vmatpush3.bf16.msra.mxu1 %v9495_v36  ;;  %v11352_v45 = vcombine.low %v3279_v29, %v13165_v23 }
 0x50e   : > { %v3072_v49 = vadd.f32 %v8941_v4, %v11334_v18  ;;  %v8943_v12 = vadd.f32 %v3010_v51, %v11256_v27  ;;  %8790 = vmatprep.subr.bf16.mxu1 %v9496_v38 }
 0x50f   : > { %v3087_v57 = vmax.f32 %v3071_v19, 0.0  ;;  %v3073_v34 = vadd.f32 %v8942_v40, %v11331_v62 }
 0x510   : > { %v3088_v13 = vmax.f32 %v3072_v49, 0.0  ;;  %v3074_v52 = vadd.f32 %v8943_v12, %v11334_v18 }
 0x511   : > { %v3089_v47 = vmax.f32 %v3073_v34, 0.0 }
 0x512   : > { %v8430_v46 = vpack.c.bf16 %v3088_v13, %v3087_v57  ;;  %v3090_v50 = vmax.f32 %v3074_v52, 0.0  ;;  %v3014_v60 = vpop.f32.mrb[4].mxu0 }
 0x513   : > { %v8944_v26 = vadd.f32 %v3014_v60, %v11258_v31  ;;  %v3016_v61 = vpop.f32.mrb[5].mxu0 }
 0x514   : > { %8000 = vst.msk [vmem:[%s10426_s5 + $0x40] sm:$0xff] %vm10429_vm3, %v8430_v46  ;;  %v8431_v27 = vpack.c.bf16 %v3090_v50, %v3089_v47  ;;  %v8945_v39 = vadd.f32 %v3016_v61, %v11260_v9  ;;  %v3018_v48 = vpop.f32.mrb[6].mxu0  ;;  %8777 = vmatmul.mubr.msk.bf16.gmra.mrb[60].mxu1 %vm1429_vm13, %v11352_v45 }
 0x515   : > { %v3075_v20 = vadd.f32 %v8944_v26, %v11331_v62  ;;  %v8946_v6 = vadd.f32 %v3018_v48, %v11262_v2  ;;  %v3020_v15 = vpop.f32.mrb[7].mxu0  ;;  %8782 = vmatprep.mubr.msk.bf16.mxu1 %vm1429_vm13, %v11282_v21 }
 0x516   : > { %8001 = vst.msk [vmem:[%s10426_s5 + $0x48] sm:$0xff] %vm10429_vm3, %v8431_v27  ;;  %v3076_v31 = vadd.f32 %v8945_v39, %v11334_v18  ;;  %v8947_v9 = vadd.f32 %v3020_v15, %v11264_v11 }
 0x517   : > { %v3091_v36 = vmax.f32 %v3075_v20, 0.0  ;;  %v3077_v42 = vadd.f32 %v8946_v6, %v11331_v62 }
 0x518   : > { %v3092_v63 = vmax.f32 %v3076_v31, 0.0  ;;  %v3078_v43 = vadd.f32 %v8947_v9, %v11334_v18 }
 0x519   : > { %v3093_v41 = vmax.f32 %v3077_v42, 0.0 }
 0x51a   : > { %v8432_v2 = vpack.c.bf16 %v3092_v63, %v3091_v36  ;;  %v3094_v4 = vmax.f32 %v3078_v43, 0.0  ;;  %v3024_v17 = vpop.f32.mrb[8].mxu0 }
 0x51b   : > { %v8948_v21 = vadd.f32 %v3024_v17, %v11266_v55  ;;  %v3026_v19 = vpop.f32.mrb[9].mxu0 }
 0x51c   : > { %8002 = vst.msk [vmem:[%s10426_s5 + $0x50] sm:$0xff] %vm10429_vm3, %v8432_v2  ;;  %v8433_v40 = vpack.c.bf16 %v3094_v4, %v3093_v41  ;;  %v8949_v11 = vadd.f32 %v3026_v19, %v11268_v8  ;;  %v3028_v51 = vpop.f32.mrb[10].mxu0  ;;  %8783 = vmatmul.mubr.msk.bf16.vlgmr.msra.gmra.mrb[56].mxu1 %vm1429_vm13, %v11294_v30 }
 0x51d   : > { %v3079_v29 = vadd.f32 %v8948_v21, %v11331_v62  ;;  %v8950_v49 = vadd.f32 %v3028_v51, %v11270_v37  ;;  %v3030_v12 = vpop.f32.mrb[11].mxu0  ;;  %8786 = vmatprep.mubr.msk.bf16.mxu1 %vm1429_vm13, %v11292_v16  ;;  %8791 = vmatpush3.bf16.msra.mxu1 %v9496_v38 }
 0x51e   : > { %8003 = vst.msk [vmem:[%s10426_s5 + $0x58] sm:$0xff] %vm10429_vm3, %v8433_v40  ;;  %v3080_v55 = vadd.f32 %v8949_v11, %v11334_v18  ;;  %v8951_v8 = vadd.f32 %v3030_v12, %v11272_v33 }
 0x51f   : > { %v3095_v57 = vmax.f32 %v3079_v29, 0.0  ;;  %v3081_v30 = vadd.f32 %v8950_v49, %v11331_v62 }
 0x520   : > { %v3096_v34 = vmax.f32 %v3080_v55, 0.0  ;;  %v3082_v13 = vadd.f32 %v8951_v8, %v11334_v18 }
 0x521   : > { %v3097_v37 = vmax.f32 %v3081_v30, 0.0 }
 0x522   : > { %v8434_v52 = vpack.c.bf16 %v3096_v34, %v3095_v57  ;;  %v3098_v47 = vmax.f32 %v3082_v13, 0.0  ;;  %v3034_v46 = vpop.f32.mrb[12].mxu0 }
 0x523   : > { %v8952_v16 = vadd.f32 %v3034_v46, %v11274_v24  ;;  %v3036_v38 = vpop.f32.mrb[13].mxu0 }
 0x524   : > { %8004 = vst.msk [vmem:[%s10426_s5 + $0x60] sm:$0xff] %vm10429_vm3, %v8434_v52  ;;  %v8435_v50 = vpack.c.bf16 %v3098_v47, %v3097_v37  ;;  %v8953_v33 = vadd.f32 %v3036_v38, %v11276_v0  ;;  %v3038_v60 = vpop.f32.mrb[14].mxu0  ;;  %8787 = vmatmul.mubr.msk.bf16.gmra.mrb[60].mxu1 %vm1429_vm13, %v13166_v25 }
 0x525   : > { %v3083_v26 = vadd.f32 %v8952_v16, %v11331_v62  ;;  %v8954_v61 = vadd.f32 %v3038_v60, %v11278_v10  ;;  %v3040_v27 = vpop.f32.mrb[15].mxu0  ;;  %8792 = vmatprep.mubr.msk.bf16.mxu1 %vm1429_vm13, %v11290_v28 }
 0x526   : > { %8005 = vst.msk [vmem:[%s10426_s5 + $0x68] sm:$0xff] %vm10429_vm3, %v8435_v50  ;;  %v3084_v24 = vadd.f32 %v8953_v33, %v11334_v18  ;;  %v8955_v0 = vadd.f32 %v3040_v27, %v11280_v7  ;;  %v11422_v7 = vld [vmem:[#allocation13] sm:$0xff]  }
 0x527   : > { %v3099_v39 = vmax.f32 %v3083_v26, 0.0  ;;  %v3085_v48 = vadd.f32 %v8954_v61, %v11331_v62  ;;  %8810 = vmatprep.subr.bf16.mxu0 %v11422_v7  ;;  %v11425_v62 = vld [vmem:[#allocation12] ss:$0 sm:$0xff] }
 0x528   : > { %v3100_v20 = vmax.f32 %v3084_v24, 0.0  ;;  %v3086_v6 = vadd.f32 %v8955_v0, %v11334_v18 }
 0x529   : > { %v3101_v15 = vmax.f32 %v3085_v48, 0.0 }
 0x52a   : > { %v8436_v10 = vpack.c.bf16 %v3100_v20, %v3099_v39  ;;  %v3102_v31 = vmax.f32 %v3086_v6, 0.0 }
 0x52c   : > { %8006 = vst.msk [vmem:[%s10426_s5 + $0x70] sm:$0xff] %vm10429_vm3, %v8436_v10  ;;  %v8437_v28 = vpack.c.bf16 %v3102_v31, %v3101_v15  ;;  %8793 = vmatmul.mubr.msk.bf16.vlgmr.msra.gmra.mrb[56].mxu1 %vm1429_vm13, %v11296_v14 }
 0x52d   : > { %8796 = vmatprep.mubr.msk.bf16.mxu1 %vm1429_vm13, %v11352_v45 }
 0x52e   : > { %8007 = vst.msk [vmem:[%s10426_s5 + $0x78] sm:$0xff] %vm10429_vm3, %v8437_v28 }
 0x534   : > { %8797 = vmatmul.mubr.msk.bf16.gmra.mrb[60].mxu1 %vm1429_vm13, %v13166_v25 }
 0x535   : > { %8872 = vmatprep.mubr.msk.bf16.mxu1 %vm1429_vm13, %v13166_v25 }
 0x5ff   : > { %v8794_v18 = vpop.f32.mrb[56].mxu1 }
 0x600   : > { %v3898_v14 = vadd.f32 %v8794_v18, %v11425_v62  ;;  %v3850_v9 = vpop.f32.mrb[57].mxu1 }
 0x601   : > { %v3896_v45 = vadd.f32 %v11425_v62, %v3850_v9  ;;  %v8795_v36 = vpop.f32.mrb[58].mxu1 }
 0x602   : > { %v3906_v42 = vmax.f32 %v3898_v14, 0.0  ;;  %v3899_v63 = vadd.f32 %v8795_v36, %v11425_v62  ;;  %v3853_v43 = vpop.f32.mrb[59].mxu1 }
 0x603   : > { %v3904_v41 = vmax.f32 %v3896_v45, 0.0  ;;  %v3897_v2 = vadd.f32 %v11425_v62, %v3853_v43 }
 0x604   : > { %v3914_v4 = vpack.c.bf16 %v3906_v42, %v3906_v42  ;;  %v3907_v17 = vmax.f32 %v3899_v63, 0.0 }
 0x605   : > { %v3912_v21 = vpack.c.bf16 %v3904_v41, %v3904_v41  ;;  %v3905_v19 = vmax.f32 %v3897_v2, 0.0 }
 0x606   : > { %v3930_v40 = vrot.slane %v3914_v4, 4  ;;  %v3915_v11 = vpack.c.bf16 %v3907_v17, %v3907_v17 }
 0x607   : > { %v3928_v51 = vrot.slane %v3912_v21, 4  ;;  %v3913_v29 = vpack.c.bf16 %v3905_v19, %v3905_v19  ;;  %v8798_v49 = vpop.f32.mrb[60].mxu1 }
 0x608   : > { %v11432_v12 = vsel %vm1036_vm0, 0, %v3930_v40  ;;  %v3931_v55 = vrot.slane %v3915_v11, 4  ;;  %v11435_v8 = vadd.f32 %v8798_v49, %v11425_v62  ;;  %v11437_v57 = vpop.f32.mrb[61].mxu1 }
 0x609   : > { %13174 = vst [vmem:[#allocation62_spill] sm:$0xff] %v11432_v12  ;;  %v8076_v30 = vcombine.low %v11432_v12, %v11432_v12  ;;  %v11443_v34 = vcombine.high %v11432_v12, %v11432_v12  ;;  %v11446_v13 = vsel %vm1036_vm0, 0, %v3928_v51  ;;  %v3929_v37 = vrot.slane %v3913_v29, 4  ;;  %v11448_v52 = vpop.f32.mrb[62].mxu1 }
 0x60a   : > { %13176 = vst [vmem:[#allocation59_spill] sm:$0xff] %v11446_v13  ;;  %v11452_v47 = vcombine.low %v11446_v13, %v11446_v13  ;;  %v11456_v46 = vcombine.high %v11446_v13, %v11446_v13  ;;  %v11459_v16 = vsel %vm1036_vm0, 0, %v3931_v55  ;;  %v3910_v38 = vmax.f32 %v11435_v8, 0.0  ;;  %v11462_v50 = vpop.f32.mrb[63].mxu1 }
 0x60b   : > { %13175 = vst [vmem:[#allocation55_spill] sm:$0xff] %v11443_v34  ;;  %13178 = vst [vmem:[#allocation56_spill] sm:$0xff] %v11459_v16  ;;  %v4029_v33 = vshrl.u32 %v8076_v30, 16  ;;  %v4032_v60 = vshll.u32 %v8076_v30, 16  ;;  %v11465_v26 = vshrl.u32 %v11443_v34, 16  ;;  %v11468_v61 = vshll.u32 %v11443_v34, 16 }
 0x60c   : > { %13177 = vst [vmem:[#allocation64_spill] sm:$0xff] %v11456_v46  ;;  %v8090_v27 = vrot.slane %v8076_v30, 11  ;;  %v4148_v24 = vrot.slane %v11443_v34, 7  ;;  %v3993_v39 = vshrl.u32 %v11452_v47, 16  ;;  %v3996_v41 = vshll.u32 %v11452_v47, 16 }
 0x60d   : > { %v4031_v48 = vrot.slane %v4029_v33, 6  ;;  %v4034_v20 = vrot.slane %v4032_v60, 7  ;;  %v4040_v6 = vrot.slane %v11465_v26, 6  ;;  %v4043_v15 = vrot.slane %v11468_v61, 7 }
 0x60e   : > { %v11477_v10 = vsel %vm10520_vm10, %v8090_v27, %v4148_v24  ;;  %v11479_v31 = vrot.slane %v4029_v33, 11  ;;  %v4375_v28 = vrot.slane %v11465_v26, 7  ;;  %v11491_v43 = vrot.slane %v3993_v39, 6 }
 0x60f   : > { %v4035_v14 = vor.u32 %v4034_v20, %v4031_v48  ;;  %v11483_v9 = vor.u32 %v4043_v15, %v4040_v6  ;;  %v11497_v4 = vshrl.u32 %v11456_v46, 16  ;;  %v11500_v17 = vshll.u32 %v11456_v46, 16 }
 0x610   : > { %v11488_v42 = vor.u32 %v4375_v28, %v11468_v61  ;;  %v8088_v21 = vrot.slane %v11452_v47, 11  ;;  %v3998_v40 = vrot.slane %v3996_v41, 7  ;;  %v11507_v11 = vrot.slane %v3993_v39, 11 }
 0x611   : > { %v11494_v2 = vrot.slane %v4035_v14, 4  ;;  %v8078_v51 = vcombine.low %v11459_v16, %v11459_v16  ;;  %v11517_v49 = vcombine.high %v11459_v16, %v11459_v16  ;;  %v11522_v30 = vsel %vm1036_vm0, 0, %v3929_v37  ;;  %v11624_v16 = vld [vmem:[#allocation13 + $0x10] sm:$0xff]  }
 0x612   : > { %13180 = vst [vmem:[#allocation53_spill] sm:$0xff] %v11522_v30  ;;  %v3999_v33 = vor.u32 %v3998_v40, %v11491_v43  ;;  %v8074_v37 = vcombine.low %v11522_v30, %v11522_v30  ;;  %v9504_v43 = vld [vmem:[#allocation16 + $0x8] sm:$0xff]   ;;  %v3900_v8 = vadd.f32 %v11425_v62, %v11437_v57  ;;  %v3903_v19 = vadd.f32 %v11448_v52, %v11425_v62 }
 0x613   : > { %13179 = vst [vmem:[#allocation60_spill] sm:$0xff] %v11517_v49  ;;  %v4047_v60 = vshrl.u32 %v8078_v51, 16  ;;  %v4050_v27 = vshll.u32 %v8078_v51, 16  ;;  %v8091_v24 = vrot.slane %v8078_v51, 11  ;;  %v11526_v39 = vshrl.u32 %v11517_v49, 16  ;;  %8870 = vmatprep.subr.bf16.mxu1 %v9504_v43 }
 0x614   : > { %v11529_v48 = vshll.u32 %v11517_v49, 16  ;;  %v4152_v20 = vrot.slane %v11517_v49, 7  ;;  %8871 = vmatpush3.bf16.msra.mxu1 %v9504_v43  ;;  %v3908_v43 = vmax.f32 %v3900_v8, 0.0  ;;  %v3911_v52 = vmax.f32 %v3903_v19, 0.0 }
 0x615   : > { %v4049_v15 = vrot.slane %v4047_v60, 6  ;;  %v4052_v28 = vrot.slane %v4050_v27, 7  ;;  %v11533_v14 = vrot.slane %v4047_v60, 11  ;;  %v4058_v41 = vrot.slane %v11526_v39, 6 }
 0x616   : > { %13181 = vst [vmem:[#allocation58_spill] sm:$0xff] %v11529_v48  ;;  %v4061_v40 = vrot.slane %v11529_v48, 7  ;;  %v11541_v51 = vsel %vm10520_vm10, %v8091_v24, %v4152_v20  ;;  %v4380_v55 = vrot.slane %v11526_v39, 7  ;;  %v4014_v60 = vshll.u32 %v8074_v37, 16 }
 0x617   : > { %v4053_v63 = vor.u32 %v4052_v28, %v4049_v15  ;;  %v11559_v15 = vcombine.high %v11522_v30, %v11522_v30  ;;  %v4011_v28 = vshrl.u32 %v8074_v37, 16  ;;  %v11593_v27 = vrot.slane %v3999_v33, 4 }
 0x618   : > { %v11548_v6 = vor.u32 %v4061_v40, %v4058_v41  ;;  %v11551_v0 = vor.u32 %v4380_v55, %v11529_v48  ;;  %v8089_v55 = vrot.slane %v8074_v37, 11  ;;  %v4016_v45 = vrot.slane %v4014_v60, 7 }
 0x619   : > { %v11555_v20 = vrot.slane %v4053_v63, 4  ;;  %13182 = vst [vmem:[#allocation63_spill] sm:$0xff] %v11559_v15  ;;  %v3918_v63 = vpack.c.bf16 %v3910_v38, %v3910_v38  ;;  %v4013_v24 = vrot.slane %v4011_v28, 6  ;;  %v11575_v36 = vshrl.u32 %v11559_v15, 16 }
 0x61a   : > { %v11578_v18 = vshll.u32 %v11559_v15, 16  ;;  %v11580_v37 = vrot.slane %v4011_v28, 11  ;;  %v3901_v41 = vadd.f32 %v11425_v62, %v11462_v50  ;;  %v4140_v60 = vrot.slane %v11456_v46, 7 }
 0x61b   : > { %v3934_v40 = vrot.slane %v3918_v63, 4  ;;  %v4017_v38 = vor.u32 %v4016_v45, %v4013_v24  ;;  %v4144_v28 = vrot.slane %v11559_v15, 7  ;;  %v3916_v62 = vpack.c.bf16 %v3908_v43, %v3908_v43 }
 0x61c   : > { %v3909_v24 = vmax.f32 %v3901_v41, 0.0  ;;  %v4141_v50 = vsel %vm10520_vm10, %v8088_v21, %v4140_v60  ;;  %v3919_v43 = vpack.c.bf16 %v3911_v52, %v3911_v52  ;;  %v13187_v46 = vrot.slane %v11497_v4, 6 }
 0x61d   : > { %v11590_v29 = vsel %vm1036_vm0, 0, %v3934_v40  ;;  %v4145_v40 = vsel %vm10520_vm10, %v8089_v55, %v4144_v28  ;;  %v3932_v41 = vrot.slane %v3916_v62, 4  ;;  %v4007_v62 = vrot.slane %v11500_v17, 7 }
 0x61e   : > { %13183 = vst [vmem:[#allocation65_spill] sm:$0xff] %v11590_v29  ;;  %v8084_v57 = vcombine.low %v11590_v29, %v11590_v29  ;;  %v11599_v45 = vcombine.high %v11590_v29, %v11590_v29  ;;  %v3917_v47 = vpack.c.bf16 %v3909_v24, %v3909_v24  ;;  %v8096_v55 = vcombine.low %v4141_v50, %v4145_v40 }
 0x61f   : > { %v11621_v28 = vsel %vm1036_vm0, 0, %v3932_v41  ;;  %v3935_v33 = vrot.slane %v3919_v43, 4  ;;  %v4018_v41 = vrot.slane %v4017_v38, 4  ;;  %v4008_v53 = vor.u32 %v4007_v62, %v13187_v46 }
 0x620   : > { %13184 = vst [vmem:[#allocation27_spill] sm:$0xff] %v11599_v45  ;;  %v4101_v63 = vshrl.u32 %v8084_v57, 16  ;;  %v4104_v8 = vshll.u32 %v8084_v57, 16  ;;  %v11609_v56 = vshrl.u32 %v11599_v45, 16  ;;  %v11612_v44 = vshll.u32 %v11599_v45, 16  ;;  %8802 = vmatprep.mubr.msk.bf16.mxu0 %vm1429_vm13, %v8096_v55 }
 0x621   : > { %v8094_v19 = vrot.slane %v8084_v57, 11  ;;  %v3933_v25 = vrot.slane %v3917_v47, 4  ;;  %v4164_v23 = vrot.slane %v11599_v45, 7  ;;  %v8080_v52 = vcombine.low %v11621_v28, %v11621_v28 }
 0x622   : > { %v11614_v54 = vrot.slane %v4101_v63, 6  ;;  %v11616_v21 = vrot.slane %v4104_v8, 7  ;;  %v11618_v60 = vrot.slane %v4101_v63, 11  ;;  %v11632_v24 = vcombine.high %v11621_v28, %v11621_v28 }
 0x623   : > { %v11637_v50 = vsel %vm1036_vm0, 0, %v3935_v33  ;;  %v11640_v40 = vsel %vm1036_vm0, 0, %v3933_v25  ;;  %v13186_v63 = vcombine.low %v11477_v10, %v11541_v51  ;;  %v4165_v8 = vsel %vm10520_vm10, %v8094_v19, %v4164_v23 }
 0x624   : > { %13185 = vst [vmem:[#allocation32_spill] sm:$0xff] %v11637_v50  ;;  %v4065_v43 = vshrl.u32 %v8080_v52, 16  ;;  %v4068_v47 = vshll.u32 %v8080_v52, 16  ;;  %v11649_v55 = vshrl.u32 %v11632_v24, 16  ;;  %v11652_v33 = vshll.u32 %v11632_v24, 16 }
 0x625   : > { %8803 = vmatmul.mubr.msk.bf16.vlgmr.msra.gmra.mrb[16].mxu0 %vm1429_vm13, %v13186_v63  ;;  %v8092_v25 = vrot.slane %v8080_v52, 11  ;;  %v8086_v10 = vcombine.low %v11637_v50, %v11637_v50  ;;  %v11659_v51 = vcombine.high %v11637_v50, %v11637_v50  ;;  %v11676_v23 = vcombine.high %v11640_v40, %v11640_v40 }
 0x626   : > { %8811 = vmatpush3.bf16.msra.mxu0 %v11422_v7  ;;  %v4067_v38 = vrot.slane %v4065_v43, 6  ;;  %v4070_v19 = vrot.slane %v4068_v47, 7  ;;  %v11664_v63 = vrot.slane %v4065_v43, 11  ;;  %v8082_v7 = vcombine.low %v11640_v40, %v11640_v40 }
 0x627   : > { %8820 = vmatprep.subr.bf16.mxu0 %v11624_v16  ;;  %v4119_v52 = vshrl.u32 %v8086_v10, 16  ;;  %v4122_v57 = vshll.u32 %v8086_v10, 16  ;;  %v11669_v12 = vshrl.u32 %v11659_v51, 16  ;;  %v11672_v30 = vshll.u32 %v11659_v51, 16 }
 0x628   : > { %v4071_v13 = vor.u32 %v4070_v19, %v4067_v38  ;;  %v8095_v3 = vrot.slane %v8086_v10, 11  ;;  %v4083_v47 = vshrl.u32 %v8082_v7, 16  ;;  %v4086_v32 = vshll.u32 %v8082_v7, 16 }
 0x629   : > { %v4121_v43 = vrot.slane %v4119_v52, 6  ;;  %v4124_v50 = vrot.slane %v4122_v57, 7  ;;  %v11678_v29 = vrot.slane %v4119_v52, 11  ;;  %v11681_v49 = vshrl.u32 %v11676_v23, 16 }
 0x62a   : > { %v4085_v45 = vrot.slane %v4083_v47, 6  ;;  %v11684_v22 = vshll.u32 %v11676_v23, 16  ;;  %v8093_v34 = vrot.slane %v8082_v7, 11  ;;  %v4088_v10 = vrot.slane %v4086_v32, 7 }
 0x62b   : > { %v4125_v38 = vor.u32 %v4124_v50, %v4121_v43  ;;  %v11686_v19 = vrot.slane %v4083_v47, 11  ;;  %v4156_v57 = vrot.slane %v11632_v24, 7  ;;  %v4160_v52 = vrot.slane %v11676_v23, 7 }
 0x62c   : > { %v4168_v15 = vrot.slane %v11659_v51, 7  ;;  %v4089_v5 = vor.u32 %v4088_v10, %v4085_v45  ;;  %v4022_v48 = vrot.slane %v11575_v36, 6  ;;  %v4025_v50 = vrot.slane %v11578_v18, 7 }
 0x62d   : > { %v13188_v32 = vsel %vm10549_vm12, %v11555_v20, %v11548_v6  ;;  %v13189_v7 = vsel %vm10549_vm12, %v11494_v2, %v11483_v9  ;;  %v4157_v43 = vsel %vm10520_vm10, %v8092_v25, %v4156_v57  ;;  %v4161_v46 = vsel %vm10520_vm10, %v8093_v34, %v4160_v52 }
 0x62e   : > { %v8106_v47 = vcombine.low %v13189_v7, %v13188_v32  ;;  %v4169_v45 = vsel %vm10520_vm10, %v8095_v3, %v4168_v15  ;;  %v4009_v62 = vsel %vm10549_vm12, %v11593_v27, %v4008_v53  ;;  %v8098_v6 = vcombine.low %v4157_v43, %v4161_v46 }
 0x62f   : > { %v8099_v20 = vcombine.low %v4165_v8, %v4169_v45  ;;  %v4026_v10 = vor.u32 %v4025_v50, %v4022_v48  ;;  %v4072_v35 = vrot.slane %v4071_v13, 4  ;;  %v4076_v9 = vrot.slane %v11649_v55, 6 }
 0x630   : > { %v4079_v2 = vrot.slane %v11652_v33, 7  ;;  %v4090_v32 = vrot.slane %v4089_v5, 4  ;;  %v4094_v25 = vrot.slane %v11681_v49, 6  ;;  %8806 = vmatprep.mubr.msk.bf16.mxu0 %vm1429_vm13, %v8098_v6  ;;  %v4097_v34 = vrot.slane %v11684_v22, 7 }
 0x631   : > { %v4027_v3 = vsel %vm10549_vm12, %v4018_v41, %v4026_v10  ;;  %v13190_v53 = vor.u32 %v11616_v21, %v11614_v54  ;;  %v4112_v13 = vrot.slane %v11609_v56, 6  ;;  %8807 = vmatmul.mubr.msk.bf16.gmra.mrb[20].mxu0 %vm1429_vm13, %v8099_v20  ;;  %v4115_v5 = vrot.slane %v11612_v44, 7 }
 0x632   : > { %v8105_v48 = vcombine.low %v4009_v62, %v4027_v3  ;;  %v4080_v15 = vor.u32 %v4079_v2, %v4076_v9  ;;  %v4126_v8 = vrot.slane %v4125_v38, 4  ;;  %v4098_v57 = vor.u32 %v4097_v34, %v4094_v25  ;;  %v11766_v3 = vld [vmem:[#allocation13 + $0x18] sm:$0xff]  }
 0x633   : > { %v4108_v27 = vrot.slane %v13190_v53, 4  ;;  %v4130_v52 = vrot.slane %v11669_v12, 6  ;;  %v4133_v41 = vrot.slane %v11672_v30, 7  ;;  %v4365_v50 = vrot.slane %v11497_v4, 7 }
 0x634   : > { %8812 = vmatprep.mubr.msk.bf16.mxu0 %vm1429_vm13, %v8105_v48  ;;  %v4081_v54 = vsel %vm10549_vm12, %v4072_v35, %v4080_v15  ;;  %v4116_v21 = vor.u32 %v4115_v5, %v4112_v13  ;;  %v4370_v7 = vrot.slane %v11575_v36, 7  ;;  %v13191_v38 = vsel %vm10541_vm11, %v11533_v14, %v11551_v0 }
 0x635   : > { %v13192_v43 = vsel %vm10541_vm11, %v11479_v31, %v11488_v42  ;;  %v4099_v45 = vsel %vm10549_vm12, %v4090_v32, %v4098_v57  ;;  %v4134_v62 = vor.u32 %v4133_v41, %v4130_v52  ;;  %v4366_v35 = vor.u32 %v4365_v50, %v11500_v17 }
 0x636   : > { %v11746_v46 = vcombine.low %v13192_v43, %v13191_v38  ;;  %v4385_v6 = vrot.slane %v11649_v55, 7  ;;  %v8107_v20 = vcombine.low %v4081_v54, %v4099_v45  ;;  %v4117_v10 = vsel %vm10549_vm12, %v4108_v27, %v4116_v21  ;;  %v13196_v21 = vld [vmem:[#allocation58_spill] sm:$0xff] }
 0x637   : > { %v4371_v0 = vor.u32 %v4370_v7, %v11578_v18  ;;  %v4390_v14 = vrot.slane %v11681_v49, 7  ;;  %v4135_v31 = vsel %vm10549_vm12, %v4126_v8, %v4134_v62  ;;  %v4367_v42 = vsel %vm10541_vm11, %v11507_v11, %v4366_v35 }
 0x638   : > { %v4386_v9 = vor.u32 %v4385_v6, %v11652_v33  ;;  %v4395_v2 = vrot.slane %v11609_v56, 7  ;;  %v8108_v32 = vcombine.low %v4117_v10, %v4135_v31  ;;  %v4400_v53 = vrot.slane %v11669_v12, 7 }
 0x639   : > { %v4372_v25 = vsel %vm10541_vm11, %v11580_v37, %v4371_v0  ;;  %v4391_v34 = vor.u32 %v4390_v14, %v11684_v22  ;;  %v4607_v48 = vrot.slane %v11497_v4, 4  ;;  %8813 = vmatmul.mubr.msk.bf16.vlgmr.msra.gmra.mrb[16].mxu0 %vm1429_vm13, %v8106_v47  ;;  %v4608_v5 = vrot.slane %v11500_v17, 5  ;;  %v13198_v14 = vld [vmem:[#allocation51_spill] sm:$0xff] }
 0x63a   : > { %v8122_v27 = vcombine.low %v4367_v42, %v4372_v25  ;;  %v4387_v11 = vsel %vm10541_vm11, %v11664_v63, %v4386_v9  ;;  %v4396_v13 = vor.u32 %v4395_v2, %v11612_v44  ;;  %v4401_v15 = vor.u32 %v4400_v53, %v11672_v30  ;;  %8816 = vmatprep.mubr.msk.bf16.mxu0 %vm1429_vm13, %v8107_v20 }
 0x63b   : > { %v4392_v37 = vsel %vm10541_vm11, %v11686_v19, %v4391_v34  ;;  %v4612_v8 = vrot.slane %v11575_v36, 4  ;;  %8821 = vmatpush3.bf16.msra.mxu0 %v11624_v16  ;;  %v4613_v57 = vrot.slane %v11578_v18, 5  ;;  %v13193_v19 = vrot.slane %v11465_v26, 4 }
 0x63c   : > { %v11784_v63 = vcombine.low %v4387_v11, %v4392_v37  ;;  %v4397_v47 = vsel %vm10541_vm11, %v11618_v60, %v4396_v13  ;;  %v13194_v52 = vrot.slane %v11468_v61, 5  ;;  %8830 = vmatprep.subr.bf16.mxu0 %v11766_v3  ;;  %v4402_v50 = vsel %vm10541_vm11, %v11678_v29, %v4401_v15 }
 0x63d   : > { %v4609_v16 = vor.u32 %v4608_v5, %v4607_v48  ;;  %v13195_v54 = vrot.slane %v11526_v39, 4  ;;  %v13197_v7 = vrot.slane %v13196_v21, 5  ;;  %v4627_v60 = vrot.slane %v11649_v55, 4 }
 0x63e   : > { %v4619_v41 = vor.u32 %v13194_v52, %v13193_v19  ;;  %v11803_v43 = vcombine.low %v4397_v47, %v4402_v50  ;;  %v4614_v45 = vor.u32 %v4613_v57, %v4612_v8  ;;  %v4628_v35 = vrot.slane %v11652_v33, 5  ;;  %v13200_v52 = vld [vmem:[#allocation64_spill] sm:$0xff]  ;;  %v13201_v50 = vld [vmem:[#allocation63_spill] sm:$0xff] }
 0x63f   : > { %v4624_v38 = vor.u32 %v13197_v7, %v13195_v54  ;;  %v4610_v6 = vrot.slane %v4609_v16, 4  ;;  %v4632_v10 = vrot.slane %v11681_v49, 4  ;;  %v4633_v29 = vrot.slane %v11684_v22, 5  ;;  %v13202_v54 = vld [vmem:[#allocation52_spill] sm:$0xff] }
 0x640   : > { %v4620_v62 = vrot.slane %v4619_v41, 4  ;;  %v4615_v0 = vrot.slane %v4614_v45, 4  ;;  %v4629_v9 = vor.u32 %v4628_v35, %v4627_v60  ;;  %v4637_v2 = vrot.slane %v11609_v56, 4  ;;  %v13206_v35 = vld [vmem:[#allocation60_spill] sm:$0xff] }
 0x641   : > { %v4625_v20 = vrot.slane %v4624_v38, 4  ;;  %v11817_v25 = vsel %vm10869_vm5, %v4610_v6, %v13198_v14  ;;  %v4634_v53 = vor.u32 %v4633_v29, %v4632_v10  ;;  %v4638_v11 = vrot.slane %v11612_v44, 5  ;;  %8817 = vmatmul.mubr.msk.bf16.gmra.mrb[20].mxu0 %vm1429_vm13, %v8108_v32  ;;  %v13203_v32 = vld [vmem:[#allocation55_spill] sm:$0xff] }
 0x642   : > { %v11811_v42 = vsel %vm10869_vm5, %v4620_v62, %v13198_v14  ;;  %v11828_v13 = vsel %vm10869_vm5, %v4615_v0, %v13198_v14  ;;  %v4630_v37 = vrot.slane %v4629_v9, 4  ;;  %v4642_v15 = vrot.slane %v11669_v12, 4  ;;  %8822 = vmatprep.mubr.msk.bf16.mxu0 %vm1429_vm13, %v8122_v27 }
 0x643   : > { %v11822_v34 = vsel %vm10869_vm5, %v4625_v20, %v13198_v14  ;;  %v8140_v5 = vcombine.low %v11817_v25, %v11828_v13  ;;  %v4635_v8 = vrot.slane %v4634_v53, 4  ;;  %v4639_v47 = vor.u32 %v4638_v11, %v4637_v2 }
 0x644   : > { %v8141_v48 = vcombine.low %v11811_v42, %v11822_v34  ;;  %v4643_v57 = vrot.slane %v11672_v30, 5  ;;  %v11841_v19 = vsel %vm10869_vm5, %v4630_v37, %v13198_v14  ;;  %v8149_v41 = vrot.slane %v13200_v52, 9  ;;  %v8175_v42 = vld [vmem:[#allocation15] ss:$0 sm:$0xff] }
 0x645   : > { %v8150_v16 = vrot.slane %v13201_v50, 9  ;;  %v13204_v7 = vrot.slane %v13203_v32, 9  ;;  %v11855_v27 = vsel %vm10869_vm5, %v4635_v8, %v13198_v14  ;;  %v4640_v45 = vrot.slane %v4639_v47, 4  ;;  %v13208_v8 = vld [vmem:[#allocation27_spill] sm:$0xff] }
 0x646   : > { %v4644_v62 = vor.u32 %v4643_v57, %v4642_v15  ;;  %v13207_v6 = vrot.slane %v13206_v35, 9  ;;  %v8142_v10 = vcombine.low %v11841_v19, %v11855_v27  ;;  %v11869_v29 = vsel %vm10902_vm6, %v8149_v41, %v13202_v54  ;;  %v9501_v41 = vld [vmem:[#allocation13 + $0x20] sm:$0xff]  }
 0x647   : > { %v11850_v60 = vsel %vm10902_vm6, %v13204_v7, %v13202_v54  ;;  %v11874_v0 = vsel %vm10902_vm6, %v8150_v16, %v13202_v54  ;;  %v11881_v2 = vsel %vm10869_vm5, %v4640_v45, %v13198_v14  ;;  %v8153_v37 = vrot.slane %v11632_v24, 9 }
 0x648   : > { %v11862_v20 = vsel %vm10902_vm6, %v13207_v6, %v13202_v54  ;;  %v4645_v53 = vrot.slane %v4644_v62, 4  ;;  %v8157_v11 = vcombine.low %v11869_v29, %v11874_v0  ;;  %v8154_v15 = vrot.slane %v11676_v23, 9 }
 0x649   : > { %v8158_v9 = vcombine.low %v11850_v60, %v11862_v20  ;;  %v8155_v47 = vrot.slane %v13208_v8, 9  ;;  %v8156_v57 = vrot.slane %v11659_v51, 9  ;;  %v4883_v52 = vrot.slane %v11497_v4, 5  ;;  %8823 = vmatmul.mubr.msk.bf16.vlgmr.msra.gmra.mrb[16].mxu0 %vm1429_vm13, %v11746_v46 }
 0x64a   : > { %v11893_v50 = vsel %vm10869_vm5, %v4645_v53, %v13198_v14  ;;  %v11898_v16 = vsel %vm10902_vm6, %v8153_v37, %v13202_v54  ;;  %v4884_v24 = vrot.slane %v11500_v17, 6  ;;  %v4888_v23 = vrot.slane %v11575_v36, 5  ;;  %8826 = vmatprep.mubr.msk.bf16.mxu0 %vm1429_vm13, %v11784_v63  ;;  %8831 = vmatpush3.bf16.msra.mxu0 %v11766_v3 }
 0x64b   : > { %v8143_v51 = vcombine.low %v11881_v2, %v11893_v50  ;;  %v11907_v4 = vsel %vm10902_vm6, %v8154_v15, %v13202_v54  ;;  %v11912_v32 = vsel %vm10902_vm6, %v8155_v47, %v13202_v54  ;;  %v11917_v7 = vsel %vm10902_vm6, %v8156_v57, %v13202_v54  ;;  %8840 = vmatprep.subr.bf16.mxu0 %v9501_v41 }
 0x64c   : > { %v8159_v36 = vcombine.low %v11898_v16, %v11907_v4  ;;  %v8160_v17 = vcombine.low %v11912_v32, %v11917_v7  ;;  %v4885_v45 = vor.u32 %v4884_v24, %v4883_v52  ;;  %v4889_v62 = vrot.slane %v11578_v18, 6 }
 0x64d   : > { %v13209_v35 = vrot.slane %v11465_v26, 5  ;;  %v13210_v6 = vrot.slane %v11468_v61, 6  ;;  %v13211_v46 = vrot.slane %v11526_v39, 5  ;;  %v13212_v53 = vrot.slane %v13196_v21, 6  ;;  %v13213_v39 = vld [vmem:[#allocation54_spill] sm:$0xff] }
 0x64e   : > { %v4903_v15 = vrot.slane %v11649_v55, 5  ;;  %v4904_v8 = vrot.slane %v11652_v33, 6  ;;  %v4886_v18 = vrot.slane %v4885_v45, 4  ;;  %v4890_v47 = vor.u32 %v4889_v62, %v4888_v23 }
 0x64f   : > { %v4895_v2 = vor.u32 %v13210_v6, %v13209_v35  ;;  %v4900_v37 = vor.u32 %v13212_v53, %v13211_v46  ;;  %v4908_v63 = vrot.slane %v11681_v49, 5  ;;  %v4909_v3 = vrot.slane %v11684_v22, 6  ;;  %v13215_v35 = vld [vmem:[#allocation59_spill] sm:$0xff]  ;;  %v13216_v6 = vld [vmem:[#allocation53_spill] sm:$0xff] }
 0x650   : > { %v4905_v61 = vor.u32 %v4904_v8, %v4903_v15  ;;  %v4913_v52 = vrot.slane %v11609_v56, 5  ;;  %v4887_v21 = vsel %vm11012_vm9, %v4886_v18, %v13213_v39  ;;  %v4891_v16 = vrot.slane %v4890_v47, 4  ;;  %v9502_v8 = vld [vmem:[#allocation13 + $0x28] sm:$0xff]   ;;  %v13218_v47 = vld [vmem:[#allocation62_spill] sm:$0xff] }
 0x651   : > { %v4896_v26 = vrot.slane %v4895_v2, 4  ;;  %v4901_v57 = vrot.slane %v4900_v37, 4  ;;  %v4910_v55 = vor.u32 %v4909_v3, %v4908_v63  ;;  %v4914_v33 = vrot.slane %v11612_v44, 6  ;;  %8827 = vmatmul.mubr.msk.bf16.gmra.mrb[20].mxu0 %vm1429_vm13, %v11803_v43  ;;  %v13219_v63 = vld [vmem:[#allocation56_spill] sm:$0xff] }
 0x652   : > { %v4906_v49 = vrot.slane %v4905_v61, 4  ;;  %v4918_v23 = vrot.slane %v11669_v12, 5  ;;  %v4892_v56 = vsel %vm11012_vm9, %v4891_v16, %v13213_v39  ;;  %v4919_v44 = vrot.slane %v11672_v30, 6  ;;  %v13223_v61 = vld [vmem:[#allocation32_spill] sm:$0xff] }
 0x653   : > { %v4897_v24 = vsel %vm11012_vm9, %v4896_v26, %v13213_v39  ;;  %v4902_v22 = vsel %vm11012_vm9, %v4901_v57, %v13213_v39  ;;  %v4911_v32 = vrot.slane %v4910_v55, 4  ;;  %v4915_v7 = vor.u32 %v4914_v33, %v4913_v52  ;;  %v13222_v57 = vld [vmem:[#allocation65_spill] sm:$0xff] }
 0x654   : > { %v8167_v4 = vcombine.low %v4897_v24, %v4902_v22  ;;  %v8166_v45 = vcombine.low %v4887_v21, %v4892_v56  ;;  %v4907_v62 = vsel %vm11012_vm9, %v4906_v49, %v13213_v39  ;;  %v13217_v2 = vcombine.high %v13215_v35, %v13216_v6  ;;  %v9503_v21 = vld [vmem:[#allocation13 + $0x30] sm:$0xff]  }
 0x655   : > { %v4912_v12 = vsel %vm11012_vm9, %v4911_v32, %v13213_v39  ;;  %v4916_v53 = vrot.slane %v4915_v7, 4  ;;  %v4920_v37 = vor.u32 %v4919_v44, %v4918_v23  ;;  %v13220_v3 = vcombine.high %v13218_v47, %v13219_v63 }
 0x656   : > { %8832 = vmatprep.mubr.msk.bf16.mxu0 %vm1429_vm13, %v13217_v2  ;;  %v8168_v46 = vcombine.low %v4907_v62, %v4912_v12  ;;  %v13221_v26 = vcombine.high %v11621_v28, %v11640_v40  ;;  %v13224_v52 = vcombine.high %v13222_v57, %v13223_v61  ;;  %v13225_v28 = vmov 0   ;;  %v9505_v40 = vld [vmem:[#allocation16] sm:$0xff]   ;;  %v13226_v12 = vld [vmem:[#allocation50_spill] sm:$0xff] }
 0x657   : > { %v4921_v30 = vrot.slane %v4920_v37, 4  ;;  %v4917_v43 = vsel %vm11012_vm9, %v4916_v53, %v13213_v39  ;;  %8880 = vmatprep.subr.bf16.mxu1 %v9505_v40  ;;  %v9507_v2 = vld [vmem:[#allocation16 + $0x18] sm:$0xff]   ;;  %v9509_v53 = vld [vmem:[#allocation16 + $0x28] sm:$0xff]   ;;  %v9510_v37 = vld [vmem:[#allocation16 + $0x30] sm:$0xff]   ;;  %v7088_v47 = vunpack.c.l.bf16 %v13225_v28 }
 0x659   : > { %v4922_v15 = vsel %vm11012_vm9, %v4921_v30, %v13213_v39  ;;  %8833 = vmatmul.mubr.msk.bf16.vlgmr.msra.gmra.mrb[16].mxu0 %vm1429_vm13, %v13220_v3  ;;  %v7107_v63 = vadd.f32 %v7088_v47, %v7088_v47  ;;  %v12061_v3 = vld [vmem:[%s13227_s6] ss:$0 sm:$0xff] }
 0x65a   : > { %v8169_v18 = vcombine.low %v4917_v43, %v4922_v15  ;;  %8836 = vmatprep.mubr.msk.bf16.mxu0 %vm1429_vm13, %v13221_v26  ;;  %8841 = vmatpush3.bf16.msra.mxu0 %v9501_v41  ;;  %v9511_v15 = vld [vmem:[%s12924_s17 + $0x10] ss:$8 sps:$4 sm:$0xff]  }
 0x65b   : > { %8850 = vmatprep.subr.bf16.mxu0 %v9502_v8  ;;  %v7124_v26 = vadd.f32 %v7107_v63, %v7088_v47 }
 0x661   : > { %8837 = vmatmul.mubr.msk.bf16.gmra.mrb[20].mxu0 %vm1429_vm13, %v13224_v52 }
 0x662   : > { %8842 = vmatprep.mubr.msk.bf16.mxu0 %vm1429_vm13, %v8140_v5 }
 0x669   : > { %8843 = vmatmul.mubr.msk.bf16.vlgmr.msra.gmra.mrb[16].mxu0 %vm1429_vm13, %v8141_v48 }
 0x66a   : > { %8846 = vmatprep.mubr.msk.bf16.mxu0 %vm1429_vm13, %v8142_v10  ;;  %8851 = vmatpush3.bf16.msra.mxu0 %v9502_v8  ;;  %v9513_v8 = vld [vmem:[%s12924_s17 + $0x14] ss:$8 sps:$4 sm:$0xff]  }
 0x66b   : > { %8860 = vmatprep.subr.bf16.mxu0 %v9503_v21 }
 0x671   : > { %8847 = vmatmul.mubr.msk.bf16.gmra.mrb[20].mxu0 %vm1429_vm13, %v8143_v51 }
 0x672   : > { %8852 = vmatprep.mubr.msk.bf16.mxu0 %vm1429_vm13, %v8157_v11 }
 0x679   : > { %8853 = vmatmul.mubr.msk.bf16.vlgmr.msra.gmra.mrb[16].mxu0 %vm1429_vm13, %v8158_v9 }
 0x67a   : > { %8856 = vmatprep.mubr.msk.bf16.mxu0 %vm1429_vm13, %v8159_v36  ;;  %8861 = vmatpush3.bf16.msra.mxu0 %v9503_v21  ;;  %v9506_v36 = vld [vmem:[#allocation16 + $0x10] sm:$0xff]  }
 0x67b   : > { %5987 = vmatprep.subr.bf16.mxu0 %v9513_v8 }
 0x681   : > { %8857 = vmatmul.mubr.msk.bf16.gmra.mrb[20].mxu0 %vm1429_vm13, %v8160_v17 }
 0x682   : > { %8862 = vmatprep.mubr.msk.bf16.mxu0 %vm1429_vm13, %v8166_v45 }
 0x689   : > { %8863 = vmatmul.mubr.msk.bf16.vlgmr.msra.gmra.mrb[16].mxu0 %vm1429_vm13, %v8167_v4 }
 0x68a   : > { %8866 = vmatprep.mubr.msk.bf16.mxu0 %vm1429_vm13, %v8168_v46  ;;  %v9508_v46 = vld [vmem:[#allocation16 + $0x20] sm:$0xff]   ;;  %5988 = vmatpush1.bf16.msra.mxu0 %v9511_v15 }
 0x691   : > { %8867 = vmatmul.mubr.msk.bf16.gmra.mrb[20].mxu0 %vm1429_vm13, %v8169_v18  ;;  %v9516_v18 = vld [vmem:[%s12924_s17 + $0x4] ss:$8 sps:$4 sm:$0xff]  }
 0x692   : > { %6019 = vmatprep.mubr.bf16.mxu0 %v13225_v28  ;;  %6094 = vmatprep.subr.bf16.mxu0 %v9516_v18 }
 0x75c   : > { %v8864_v25 = vpop.f32.mrb[16].mxu0 }
 0x75d   : > { %v5038_v34 = vadd.f32 %v8864_v25, %v8175_v42  ;;  %v4990_v13 = vpop.f32.mrb[17].mxu0 }
 0x75e   : > { %v5036_v48 = vadd.f32 %v8175_v42, %v4990_v13  ;;  %v8865_v5 = vpop.f32.mrb[18].mxu0  ;;  %v12066_v13 = vrot.slane %v7124_v26, 2 }
 0x75f   : > { %v5039_v19 = vadd.f32 %v8865_v5, %v8175_v42  ;;  %v4993_v60 = vpop.f32.mrb[19].mxu0  ;;  %v5046_v20 = vmax.f32 %v5038_v34, 0.0 }
 0x760   : > { %v5037_v27 = vadd.f32 %v8175_v42, %v4993_v60  ;;  %v5044_v29 = vmax.f32 %v5036_v48, 0.0  ;;  %13228 = vst [vmem:[#allocation39_spill] sm:$0xff] %v12066_v13 }
 0x761   : > { %v5047_v10 = vmax.f32 %v5039_v19, 0.0 }
 0x762   : > { %v5045_v0 = vmax.f32 %v5037_v27, 0.0  ;;  %v5052_v35 = vpack.c.bf16 %v5044_v29, %v5044_v29 }
 0x763   : > { %v8446_v9 = vpack.c.bf16 %v5047_v10, %v5046_v20 }
 0x764   : > { %v8445_v11 = vpack.c.bf16 %v5045_v0, %v5044_v29  ;;  %v8448_v41 = vpack.c.bf16 %v5046_v20, %v5045_v0  ;;  %v8868_v51 = vpop.f32.mrb[20].mxu0  ;;  %v8184_v6 = vcombine.low %v13225_v28, %v5052_v35 }
 0x765   : > { %v5042_v17 = vadd.f32 %v8868_v51, %v8175_v42  ;;  %v5006_v16 = vpop.f32.mrb[21].mxu0 }
 0x766   : > { %v5040_v55 = vadd.f32 %v8175_v42, %v5006_v16  ;;  %v8869_v33 = vpop.f32.mrb[22].mxu0  ;;  %8873 = vmatmul.mubr.msk.bf16.vlgmr.msra.gmra.mrb[64].mxu1 %vm1429_vm13, %v8445_v11 }
 0x767   : > { %v5043_v24 = vadd.f32 %v8869_v33, %v8175_v42  ;;  %v5009_v22 = vpop.f32.mrb[23].mxu0  ;;  %8876 = vmatprep.mubr.msk.bf16.mxu1 %vm1429_vm13, %v8446_v9  ;;  %8881 = vmatpush3.bf16.msra.mxu1 %v9505_v40  ;;  %v5050_v56 = vmax.f32 %v5042_v17, 0.0 }
 0x768   : > { %v5048_v49 = vmax.f32 %v5040_v55, 0.0  ;;  %v5041_v23 = vadd.f32 %v8175_v42, %v5009_v22  ;;  %8890 = vmatprep.subr.bf16.mxu1 %v9506_v36 }
 0x769   : > { %v5051_v4 = vmax.f32 %v5043_v24, 0.0 }
 0x76a   : > { %v8449_v32 = vpack.c.bf16 %v5048_v49, %v5047_v10  ;;  %v5049_v7 = vmax.f32 %v5041_v23, 0.0  ;;  %v13229_v10 = vld [vmem:[#allocation28_spill] sm:$0xff] }
 0x76b   : > { %v8451_v45 = vpack.c.bf16 %v5051_v4, %v5050_v56  ;;  %v5059_v30 = vpack.c.bf16 %v5051_v4, %v5051_v4  ;;  %v13230_v29 = vrot.slane %v13229_v10, 1 }
 0x76c   : > { %v8447_v44 = vpack.c.bf16 %v5049_v7, %v5048_v49  ;;  %v8450_v62 = vpack.c.bf16 %v5050_v56, %v5049_v7 }
 0x76d   : > { %v8204_v43 = vcombine.low %v5059_v30, %v13225_v28  ;;  %v12072_v0 = vadd.f32 %v13230_v29, %v13229_v10 }
 0x76e   : > { %8877 = vmatmul.mubr.msk.bf16.gmra.mrb[68].mxu1 %vm1429_vm13, %v8447_v44 }
 0x76f   : > { %8882 = vmatprep.mubr.msk.bf16.mxu1 %vm1429_vm13, %v13226_v12  ;;  %13231 = vst [vmem:[#allocation46_spill] sm:$0xff] %v12072_v0 }
 0x776   : > { %8883 = vmatmul.mubr.msk.bf16.vlgmr.msra.gmra.mrb[64].mxu1 %vm1429_vm13, %v8184_v6 }
 0x777   : > { %8886 = vmatprep.mubr.msk.bf16.mxu1 %vm1429_vm13, %v8448_v41  ;;  %8891 = vmatpush3.bf16.msra.mxu1 %v9506_v36  ;;  %v13234_v36 = vld [vmem:[#allocation29_spill] sm:$0xff] }
 0x778   : > { %8900 = vmatprep.subr.bf16.mxu1 %v9507_v2  ;;  %v13235_v17 = vrot.slane %v13234_v36, 1  ;;  %v13237_v22 = vrot.slane %v13234_v36, 2 }
 0x77a   : > { %v12083_v16 = vadd.f32 %v13235_v17, %v13234_v36  ;;  %v12089_v49 = vsel %vm7180_vm14, %v13237_v22, %v12066_v13 }
 0x77b   : > { %13238 = vst [vmem:[#allocation66_spill] sm:$0xff] %v12089_v49 }
 0x77c   : > { %13236 = vst [vmem:[#allocation51_spill] sm:$0xff] %v12083_v16 }
 0x77e   : > { %8887 = vmatmul.mubr.msk.bf16.gmra.mrb[68].mxu1 %vm1429_vm13, %v8449_v32 }
 0x77f   : > { %8892 = vmatprep.mubr.msk.bf16.mxu1 %vm1429_vm13, %v8184_v6 }
 0x786   : > { %8893 = vmatmul.mubr.msk.bf16.vlgmr.msra.gmra.mrb[64].mxu1 %vm1429_vm13, %v8448_v41 }
 0x787   : > { %8896 = vmatprep.mubr.msk.bf16.mxu1 %vm1429_vm13, %v8449_v32  ;;  %8901 = vmatpush3.bf16.msra.mxu1 %v9507_v2 }
 0x788   : > { %8910 = vmatprep.subr.bf16.mxu1 %v9508_v46 }
 0x78e   : > { %8897 = vmatmul.mubr.msk.bf16.gmra.mrb[68].mxu1 %vm1429_vm13, %v8450_v62 }
 0x78f   : > { %8902 = vmatprep.mubr.msk.bf16.mxu1 %vm1429_vm13, %v8445_v11 }
 0x796   : > { %8903 = vmatmul.mubr.msk.bf16.vlgmr.msra.gmra.mrb[64].mxu1 %vm1429_vm13, %v8446_v9 }
 0x797   : > { %8906 = vmatprep.mubr.msk.bf16.mxu1 %vm1429_vm13, %v8447_v44  ;;  %8911 = vmatpush3.bf16.msra.mxu1 %v9508_v46 }
 0x798   : > { %8920 = vmatprep.subr.bf16.mxu1 %v9509_v53 }
 0x79e   : > { %8907 = vmatmul.mubr.msk.bf16.gmra.mrb[68].mxu1 %vm1429_vm13, %v8451_v45 }
 0x79f   : > { %8912 = vmatprep.mubr.msk.bf16.mxu1 %vm1429_vm13, %v8448_v41  ;;  %v13232_v41 = vrot.slane %v13229_v10, 2 }
 0x7a1   : > { %v12078_v51 = vsel %vm7180_vm14, %v13232_v41, %v12066_v13 }
 0x7a2   : > { %13233 = vst [vmem:[#allocation58_spill] sm:$0xff] %v12078_v51 }
 0x7a6   : > { %8913 = vmatmul.mubr.msk.bf16.vlgmr.msra.gmra.mrb[64].mxu1 %vm1429_vm13, %v8449_v32 }
 0x7a7   : > { %8916 = vmatprep.mubr.msk.bf16.mxu1 %vm1429_vm13, %v8450_v62  ;;  %8921 = vmatpush3.bf16.msra.mxu1 %v9509_v53 }
 0x7a8   : > { %8930 = vmatprep.subr.bf16.mxu1 %v9510_v37 }
 0x7ae   : > { %8917 = vmatmul.mubr.msk.bf16.gmra.mrb[68].mxu1 %vm1429_vm13, %v8204_v43 }
 0x7af   : > { %8922 = vmatprep.mubr.msk.bf16.mxu1 %vm1429_vm13, %v8446_v9 }
 0x7b6   : > { %8923 = vmatmul.mubr.msk.bf16.vlgmr.msra.gmra.mrb[64].mxu1 %vm1429_vm13, %v8447_v44 }
 0x7b7   : > { %8926 = vmatprep.mubr.msk.bf16.mxu1 %vm1429_vm13, %v8451_v45  ;;  %8931 = vmatpush3.bf16.msra.mxu1 %v9510_v37 }
 0x7be   : > { %8927 = vmatmul.mubr.msk.bf16.gmra.mrb[68].mxu1 %vm1429_vm13, %v13226_v12 }
 0x7bf   : > { %8932 = vmatprep.mubr.msk.bf16.mxu1 %vm1429_vm13, %v8449_v32 }
 0x7c6   : > { %8933 = vmatmul.mubr.msk.bf16.vlgmr.msra.gmra.mrb[64].mxu1 %vm1429_vm13, %v8450_v62 }
 0x7c7   : > { %8936 = vmatprep.mubr.msk.bf16.mxu1 %vm1429_vm13, %v8204_v43 }
 0x7ce   : > { %8937 = vmatmul.mubr.msk.bf16.gmra.mrb[68].mxu1 %vm1429_vm13, %v13226_v12 }
 0x7cf   : > { %7474 = vmatprep.mubr.bf16.mxu1 %v13225_v28 }
 0x899   : > { %v8934_v57 = vpop.f32.mrb[64].mxu1 }
 0x89a   : > { %v5678_v61 = vadd.f32 %v8934_v57, %v12061_v3  ;;  %v5630_v52 = vpop.f32.mrb[65].mxu1 }
 0x89b   : > { %v5676_v21 = vadd.f32 %v12061_v3, %v5630_v52  ;;  %v8935_v40 = vpop.f32.mrb[66].mxu1 }
 0x89c   : > { %v5686_v42 = vmax.f32 %v5678_v61, 0.0  ;;  %v5679_v25 = vadd.f32 %v8935_v40, %v12061_v3  ;;  %v5633_v34 = vpop.f32.mrb[67].mxu1 }
 0x89d   : > { %v5684_v48 = vmax.f32 %v5676_v21, 0.0  ;;  %v5677_v5 = vadd.f32 %v12061_v3, %v5633_v34 }
 0x89e   : > { %v5694_v19 = vpack.c.bf16 %v5686_v42, %v5686_v42  ;;  %v5687_v60 = vmax.f32 %v5679_v25, 0.0 }
 0x89f   : > { %v5692_v27 = vpack.c.bf16 %v5684_v48, %v5684_v48  ;;  %v5685_v20 = vmax.f32 %v5677_v5, 0.0 }
 0x8a0   : > { %v5710_v9 = vrot.slane %v5694_v19, 4  ;;  %v5695_v11 = vpack.c.bf16 %v5687_v60, %v5687_v60 }
 0x8a1   : > { %v5708_v55 = vrot.slane %v5692_v27, 4  ;;  %v5693_v33 = vpack.c.bf16 %v5685_v20, %v5685_v20  ;;  %v8938_v24 = vpop.f32.mrb[68].mxu1 }
 0x8a2   : > { %v12092_v23 = vsel %vm1036_vm0, 0, %v5710_v9  ;;  %v5711_v56 = vrot.slane %v5695_v11, 4  ;;  %v5682_v4 = vadd.f32 %v8938_v24, %v12061_v3  ;;  %v12095_v32 = vpop.f32.mrb[69].mxu1 }
 0x8a3   : > { %13239 = vst [vmem:[#allocation64_spill] sm:$0xff] %v12092_v23  ;;  %v12099_v7 = vcombine.low %v12092_v23, %v12092_v23  ;;  %v12103_v45 = vcombine.high %v12092_v23, %v12092_v23  ;;  %v12106_v44 = vsel %vm1036_vm0, 0, %v5708_v55  ;;  %v5709_v62 = vrot.slane %v5693_v33, 4  ;;  %v12108_v12 = vpop.f32.mrb[70].mxu1 }
 0x8a4   : > { %13240 = vst [vmem:[#allocation63_spill] sm:$0xff] %v12106_v44  ;;  %v8221_v35 = vcombine.low %v12106_v44, %v12106_v44  ;;  %v12114_v6 = vcombine.high %v12106_v44, %v12106_v44  ;;  %v12117_v2 = vsel %vm1036_vm0, 0, %v5711_v56  ;;  %v5690_v46 = vmax.f32 %v5682_v4, 0.0  ;;  %v12119_v53 = vpop.f32.mrb[71].mxu1 }
 0x8a5   : > { %13241 = vst [vmem:[#allocation52_spill] sm:$0xff] %v12117_v2  ;;  %v5809_v37 = vshrl.u32 %v12099_v7, 16  ;;  %v5812_v30 = vshll.u32 %v12099_v7, 16  ;;  %v12124_v43 = vshrl.u32 %v12103_v45, 16  ;;  %v12127_v15 = vshll.u32 %v12103_v45, 16 }
 0x8a6   : > { %v5773_v18 = vshrl.u32 %v8221_v35, 16  ;;  %v5776_v47 = vshll.u32 %v8221_v35, 16  ;;  %v12131_v63 = vshrl.u32 %v12114_v6, 16  ;;  %v12140_v52 = vshll.u32 %v12114_v6, 16 }
 0x8a7   : > { %v12133_v26 = vrot.slane %v5809_v37, 6  ;;  %v12135_v57 = vrot.slane %v5812_v30, 7  ;;  %v12137_v61 = vrot.slane %v5809_v37, 11  ;;  %v8237_v25 = vrot.slane %v8221_v35, 11  ;;  %v9514_v37 = vld [vmem:[%s12924_s17] ss:$8 sps:$4 sm:$0xff]  }
 0x8a8   : > { %v5775_v21 = vrot.slane %v5773_v18, 6  ;;  %v5778_v40 = vrot.slane %v5776_v47, 7  ;;  %v5784_v42 = vrot.slane %v12131_v63, 6  ;;  %v5787_v48 = vrot.slane %v12140_v52, 7 }
 0x8a9   : > { %v5920_v5 = vrot.slane %v12114_v6, 7  ;;  %v12147_v19 = vrot.slane %v5773_v18, 11  ;;  %v6169_v27 = vrot.slane %v12131_v63, 7  ;;  %v12166_v33 = vcombine.low %v12117_v2, %v12117_v2 }
 0x8aa   : > { %v5779_v60 = vor.u32 %v5778_v40, %v5775_v21  ;;  %v12152_v29 = vor.u32 %v5787_v48, %v5784_v42  ;;  %v12170_v24 = vcombine.high %v12117_v2, %v12117_v2  ;;  %v12175_v56 = vsel %vm1036_vm0, 0, %v5709_v62 }
 0x8ab   : > { %v5921_v9 = vsel %vm10520_vm10, %v8237_v25, %v5920_v5  ;;  %v12161_v17 = vor.u32 %v6169_v27, %v12140_v52  ;;  %13243 = vst [vmem:[#allocation61_spill] sm:$0xff] %v12175_v56  ;;  %v5698_v4 = vpack.c.bf16 %v5690_v46, %v5690_v46  ;;  %v5827_v30 = vshrl.u32 %v12166_v33, 16 }
 0x8ac   : > { %v12158_v36 = vrot.slane %v5779_v60, 4  ;;  %13242 = vst [vmem:[#allocation55_spill] sm:$0xff] %v12170_v24  ;;  %v5830_v18 = vshll.u32 %v12166_v33, 16  ;;  %v12188_v47 = vshrl.u32 %v12170_v24, 16  ;;  %v12191_v62 = vshll.u32 %v12170_v24, 16 }
 0x8ad   : > { %v8240_v46 = vrot.slane %v12166_v33, 11  ;;  %v8223_v21 = vcombine.low %v12175_v56, %v12175_v56  ;;  %v12196_v40 = vrot.slane %v5827_v30, 6  ;;  %v12200_v25 = vrot.slane %v5827_v30, 11 }
 0x8ae   : > { %v5789_v35 = vsel %vm10549_vm12, %v12158_v36, %v12152_v29  ;;  %v12198_v42 = vrot.slane %v5830_v18, 7  ;;  %v12204_v48 = vcombine.high %v12175_v56, %v12175_v56  ;;  %v5714_v56 = vrot.slane %v5698_v4, 4 }
 0x8af   : > { %v5791_v5 = vshrl.u32 %v8223_v21, 16  ;;  %v5794_v60 = vshll.u32 %v8223_v21, 16  ;;  %v8238_v27 = vrot.slane %v8223_v21, 11  ;;  %v9519_v21 = vld [vmem:[%s12924_s17 + $0x24] ss:$8 sps:$4 sm:$0xff]  }
 0x8b0   : > { %v12211_v33 = vshrl.u32 %v12204_v48, 16  ;;  %v12214_v18 = vshll.u32 %v12204_v48, 16  ;;  %v5924_v30 = vrot.slane %v12204_v48, 7 }
 0x8b1   : > { %v5793_v22 = vrot.slane %v5791_v5, 6  ;;  %v5796_v55 = vrot.slane %v5794_v60, 7  ;;  %v12217_v41 = vrot.slane %v5791_v5, 11 }
 0x8b2   : > { %v5802_v11 = vrot.slane %v12211_v33, 6  ;;  %v5805_v29 = vrot.slane %v12214_v18, 7  ;;  %v5925_v10 = vsel %vm10520_vm10, %v8238_v27, %v5924_v30  ;;  %v6174_v20 = vrot.slane %v12211_v33, 7 }
 0x8b3   : > { %v5797_v36 = vor.u32 %v5796_v55, %v5793_v22  ;;  %v8247_v34 = vcombine.low %v5921_v9, %v5925_v10  ;;  %v5680_v10 = vadd.f32 %v12061_v3, %v12095_v32  ;;  %v5683_v9 = vadd.f32 %v12108_v12, %v12061_v3 }
 0x8b4   : > { %v5806_v8 = vor.u32 %v5805_v29, %v5802_v11  ;;  %v12234_v2 = vor.u32 %v6174_v20, %v12214_v18  ;;  %v5681_v11 = vadd.f32 %v12061_v3, %v12119_v53  ;;  %v5928_v55 = vrot.slane %v12103_v45, 7 }
 0x8b5   : > { %v5798_v23 = vrot.slane %v5797_v36, 4  ;;  %8253 = vmatmul.mubr.msk.bf16.vlgmr.msra.gmra.mrb[24].mxu0 %vm1429_vm13, %v8247_v34  ;;  %v5932_v32 = vrot.slane %v12170_v24, 7  ;;  %v12255_v34 = vsel %vm1036_vm0, 0, %v5714_v56  ;;  %v5688_v22 = vmax.f32 %v5680_v10, 0.0 }
 0x8b6   : > { %6095 = vmatpush1.bf16.msra.mxu0 %v9514_v37  ;;  %6029 = vmatprep.mubr.bf16.mxu0 %v13225_v28  ;;  %13244 = vst [vmem:[#allocation60_spill] sm:$0xff] %v12255_v34  ;;  %v5691_v4 = vmax.f32 %v5683_v9, 0.0  ;;  %v8233_v29 = vcombine.low %v12255_v34, %v12255_v34  ;;  %v12261_v3 = vcombine.high %v12255_v34, %v12255_v34  ;;  %v5689_v53 = vmax.f32 %v5681_v11, 0.0 }
 0x8b7   : > { %v5807_v12 = vsel %vm10549_vm12, %v5798_v23, %v5806_v8  ;;  %6244 = vmatprep.subr.bf16.mxu0 %v9519_v21  ;;  %v13246_v37 = vrot.slane %v12099_v7, 11  ;;  %v5696_v23 = vpack.c.bf16 %v5688_v22, %v5688_v22  ;;  %v5933_v56 = vsel %vm10520_vm10, %v8240_v46, %v5932_v32 }
 0x8b8   : > { %13245 = vst [vmem:[#allocation27_spill] sm:$0xff] %v12261_v3  ;;  %v5699_v8 = vpack.c.bf16 %v5691_v4, %v5691_v4  ;;  %v12269_v10 = vcombine.low %v5789_v35, %v5807_v12  ;;  %v5881_v21 = vshrl.u32 %v8233_v29, 16  ;;  %v5884_v9 = vshll.u32 %v8233_v29, 16 }
 0x8b9   : > { %v5929_v36 = vsel %vm10520_vm10, %v13246_v37, %v5928_v55  ;;  %v12272_v30 = vshrl.u32 %v12261_v3, 16  ;;  %v12275_v27 = vshll.u32 %v12261_v3, 16  ;;  %v8243_v11 = vrot.slane %v8233_v29, 11 }
 0x8ba   : > { %v5712_v7 = vrot.slane %v5696_v23, 4  ;;  %v5715_v60 = vrot.slane %v5699_v8, 4  ;;  %v5697_v5 = vpack.c.bf16 %v5689_v53, %v5689_v53  ;;  %v12277_v55 = vrot.slane %v5881_v21, 6 }
 0x8bb   : > { %v12279_v22 = vrot.slane %v5884_v9, 7  ;;  %v12281_v4 = vrot.slane %v5881_v21, 11  ;;  %v8248_v35 = vcombine.low %v5929_v36, %v5933_v56  ;;  %v5944_v37 = vrot.slane %v12261_v3, 7 }
 0x8bc   : > { %v12284_v46 = vsel %vm1036_vm0, 0, %v5712_v7  ;;  %v12287_v32 = vsel %vm1036_vm0, 0, %v5715_v60  ;;  %v5713_v12 = vrot.slane %v5697_v5, 4 }
 0x8bd   : > { %13247 = vst [vmem:[#allocation59_spill] sm:$0xff] %v12284_v46  ;;  %13248 = vst [vmem:[#allocation53_spill] sm:$0xff] %v12287_v32  ;;  %v8229_v53 = vcombine.low %v12284_v46, %v12284_v46  ;;  %v12296_v23 = vcombine.high %v12284_v46, %v12284_v46  ;;  %v8235_v36 = vcombine.low %v12287_v32, %v12287_v32  ;;  %8254 = vmatmul.mubr.msk.bf16.gmra.mrb[28].mxu0 %vm1429_vm13, %v8248_v35  ;;  %v13306_v59 = vld [vmem:[#allocation60_spill] sm:$0xff] }
 0x8be   : > { %v12303_v5 = vcombine.high %v12287_v32, %v12287_v32  ;;  %v12308_v8 = vsel %vm1036_vm0, 0, %v5713_v12  ;;  %6039 = vmatprep.mubr.bf16.mxu0 %v13225_v28  ;;  %v12313_v56 = vsel %vm10520_vm10, %v8243_v11, %v5944_v37 }
 0x8bf   : > { %13249 = vst [vmem:[#allocation62_spill] sm:$0xff] %v12296_v23  ;;  %13251 = vst [vmem:[#allocation65_spill] sm:$0xff] %v12308_v8  ;;  %v5845_v21 = vshrl.u32 %v8229_v53, 16  ;;  %v5848_v9 = vshll.u32 %v8229_v53, 16  ;;  %v12316_v7 = vshrl.u32 %v12296_v23, 16  ;;  %v12319_v35 = vshll.u32 %v12296_v23, 16 }
 0x8c0   : > { %13250 = vst [vmem:[#allocation56_spill] sm:$0xff] %v12303_v5  ;;  %v8241_v20 = vrot.slane %v8229_v53, 11  ;;  %v5899_v29 = vshrl.u32 %v8235_v36, 16  ;;  %v5902_v60 = vshll.u32 %v8235_v36, 16  ;;  %v12322_v12 = vshrl.u32 %v12303_v5, 16 }
 0x8c1   : > { %v5847_v32 = vrot.slane %v5845_v21, 6  ;;  %v5850_v34 = vrot.slane %v5848_v9, 7  ;;  %v12324_v44 = vrot.slane %v5845_v21, 11  ;;  %v12327_v11 = vshll.u32 %v12303_v5, 16 }
 0x8c2   : > { %v5901_v37 = vrot.slane %v5899_v29, 6  ;;  %v5904_v13 = vrot.slane %v5902_v60, 7  ;;  %v8244_v49 = vrot.slane %v8235_v36, 11  ;;  %v12329_v16 = vrot.slane %v5899_v29, 11 }
 0x8c3   : > { %v5851_v51 = vor.u32 %v5850_v34, %v5847_v32  ;;  %v8231_v53 = vcombine.low %v12308_v8, %v12308_v8  ;;  %v12335_v0 = vcombine.high %v12308_v8, %v12308_v8  ;;  %v5936_v50 = vrot.slane %v12296_v23, 7 }
 0x8c4   : > { %v5905_v9 = vor.u32 %v5904_v13, %v5901_v37  ;;  %v5948_v39 = vrot.slane %v12303_v5, 7  ;;  %v13253_v29 = vor.u32 %v12135_v57, %v12133_v26  ;;  %v5820_v5 = vrot.slane %v12124_v43, 6 }
 0x8c5   : > { %13252 = vst [vmem:[#allocation32_spill] sm:$0xff] %v12335_v0  ;;  %v5863_v34 = vshrl.u32 %v8231_v53, 16  ;;  %v5866_v32 = vshll.u32 %v8231_v53, 16  ;;  %v12345_v60 = vshrl.u32 %v12335_v0, 16  ;;  %v12348_v3 = vshll.u32 %v12335_v0, 16 }
 0x8c6   : > { %v5816_v36 = vrot.slane %v13253_v29, 4  ;;  %v8242_v24 = vrot.slane %v8231_v53, 11  ;;  %v5937_v13 = vsel %vm10520_vm10, %v8241_v20, %v5936_v50  ;;  %v5940_v37 = vrot.slane %v12335_v0, 7 }
 0x8c7   : > { %v5949_v21 = vsel %vm10520_vm10, %v8244_v49, %v5948_v39  ;;  %v5865_v8 = vrot.slane %v5863_v34, 6  ;;  %v5868_v26 = vrot.slane %v5866_v32, 7  ;;  %v12355_v57 = vrot.slane %v5863_v34, 11 }
 0x8c8   : > { %v8250_v29 = vcombine.low %v12313_v56, %v5949_v21  ;;  %v5941_v46 = vsel %vm10520_vm10, %v8242_v24, %v5940_v37  ;;  %v5823_v53 = vrot.slane %v12127_v15, 7  ;;  %v13254_v50 = vor.u32 %v12198_v42, %v12196_v40 }
 0x8c9   : > { %v5869_v0 = vor.u32 %v5868_v26, %v5865_v8  ;;  %v8249_v23 = vcombine.low %v5937_v13, %v5941_v46  ;;  %v5838_v39 = vrot.slane %v12188_v47, 6  ;;  %v5841_v49 = vrot.slane %v12191_v62, 7 }
 0x8ca   : > { %v5834_v20 = vrot.slane %v13254_v50, 4  ;;  %v5824_v34 = vor.u32 %v5823_v53, %v5820_v5  ;;  %v5852_v32 = vrot.slane %v5851_v51, 4  ;;  %v5856_v56 = vrot.slane %v12316_v7, 6 }
 0x8cb   : > { %v5859_v1 = vrot.slane %v12319_v35, 7  ;;  %8255 = vmatmul.mubr.msk.bf16.gmra.mrb[32].mxu0 %vm1429_vm13, %v8249_v23  ;;  %v5842_v24 = vor.u32 %v5841_v49, %v5838_v39  ;;  %v5870_v21 = vrot.slane %v5869_v0, 4  ;;  %v5874_v37 = vrot.slane %v12345_v60, 6 }
 0x8cc   : > { %v5877_v40 = vrot.slane %v12348_v3, 7  ;;  %6049 = vmatprep.mubr.bf16.mxu0 %v13225_v28  ;;  %v5825_v42 = vsel %vm10549_vm12, %v5816_v36, %v5824_v34  ;;  %v13255_v51 = vor.u32 %v12279_v22, %v12277_v55  ;;  %v5892_v8 = vrot.slane %v12272_v30, 6 }
 0x8cd   : > { %v5860_v46 = vor.u32 %v5859_v1, %v5856_v56  ;;  %v5843_v23 = vsel %vm10549_vm12, %v5834_v20, %v5842_v24  ;;  %v5895_v13 = vrot.slane %v12275_v27, 7  ;;  %v5906_v26 = vrot.slane %v5905_v9, 4 }
 0x8ce   : > { %v5888_v5 = vrot.slane %v13255_v51, 4  ;;  %v5878_v0 = vor.u32 %v5877_v40, %v5874_v37  ;;  %v12382_v53 = vcombine.low %v5825_v42, %v5843_v23  ;;  %v5910_v36 = vrot.slane %v12322_v12, 6 }
 0x8cf   : > { %v5861_v50 = vsel %vm10549_vm12, %v5852_v32, %v5860_v46  ;;  %v5913_v39 = vrot.slane %v12327_v11, 7  ;;  %v5896_v22 = vor.u32 %v5895_v13, %v5892_v8  ;;  %v13256_v20 = vsel %vm10541_vm11, %v12217_v41, %v12234_v2 }
 0x8d0   : > { %v5879_v55 = vsel %vm10549_vm12, %v5870_v21, %v5878_v0  ;;  %v13257_v9 = vsel %vm10541_vm11, %v12147_v19, %v12161_v17  ;;  %v6179_v34 = vrot.slane %v12124_v43, 7  ;;  %v6184_v1 = vrot.slane %v12188_v47, 7 }
 0x8d1   : > { %v12400_v49 = vcombine.low %v13257_v9, %v13256_v20  ;;  %v12403_v32 = vcombine.low %v5861_v50, %v5879_v55  ;;  %v5914_v56 = vor.u32 %v5913_v39, %v5910_v36  ;;  %v6189_v24 = vrot.slane %v12316_v7, 7 }
 0x8d2   : > { %v5897_v21 = vsel %vm10549_vm12, %v5888_v5, %v5896_v22  ;;  %v6180_v2 = vor.u32 %v6179_v34, %v12127_v15  ;;  %v6194_v41 = vrot.slane %v12345_v60, 7  ;;  %v6199_v19 = vrot.slane %v12272_v30, 7 }
 0x8d3   : > { %v5915_v17 = vsel %vm10549_vm12, %v5906_v26, %v5914_v56  ;;  %v6185_v37 = vor.u32 %v6184_v1, %v12191_v62  ;;  %v6190_v40 = vor.u32 %v6189_v24, %v12319_v35  ;;  %v6204_v42 = vrot.slane %v12322_v12, 7  ;;  %8256 = vmatmul.mubr.msk.bf16.gmra.mrb[36].mxu0 %vm1429_vm13, %v8250_v29  ;;  %v9517_v1 = vld [vmem:[%s12924_s17 + $0x20] ss:$8 sps:$4 sm:$0xff]  }
 0x8d4   : > { %v12418_v46 = vcombine.low %v5897_v21, %v5915_v17  ;;  %v6181_v51 = vsel %vm10541_vm11, %v12137_v61, %v6180_v2  ;;  %v6195_v5 = vor.u32 %v6194_v41, %v12348_v3  ;;  %v6200_v8 = vor.u32 %v6199_v19, %v12275_v27  ;;  %6126 = vmatprep.mubr.bf16.mxu0 %v13225_v28  ;;  %v9522_v41 = vld [vmem:[%s12924_s17 + $0x34] ss:$8 sps:$4 sm:$0xff]  }
 0x8d5   : > { %v6186_v58 = vsel %vm10541_vm11, %v12200_v25, %v6185_v37  ;;  %v6191_v29 = vsel %vm10541_vm11, %v12324_v44, %v6190_v40  ;;  %v6205_v23 = vor.u32 %v6204_v42, %v12327_v11  ;;  %v13258_v0 = vrot.slane %v12131_v63, 4 }
 0x8d6   : > { %v13259_v61 = vrot.slane %v12140_v52, 5  ;;  %v12437_v26 = vcombine.low %v6181_v51, %v6186_v58  ;;  %v6196_v50 = vsel %vm10541_vm11, %v12355_v57, %v6195_v5  ;;  %v6201_v25 = vsel %vm10541_vm11, %v12281_v4, %v6200_v8 }
 0x8d7   : > { %v13260_v36 = vrot.slane %v12211_v33, 4  ;;  %v13261_v44 = vrot.slane %v12214_v18, 5  ;;  %v12449_v55 = vcombine.low %v6191_v29, %v6196_v50  ;;  %v6206_v22 = vsel %vm10541_vm11, %v12329_v16, %v6205_v23 }
 0x8d8   : > { %v6453_v13 = vor.u32 %v13259_v61, %v13258_v0  ;;  %v6461_v9 = vrot.slane %v12124_v43, 4  ;;  %v12455_v34 = vcombine.low %v6201_v25, %v6206_v22  ;;  %v6462_v56 = vrot.slane %v12127_v15, 5 }
 0x8d9   : > { %v6458_v39 = vor.u32 %v13261_v44, %v13260_v36  ;;  %v6466_v4 = vrot.slane %v12188_v47, 4  ;;  %v6467_v16 = vrot.slane %v12191_v62, 5  ;;  %v6471_v21 = vrot.slane %v12316_v7, 4 }
 0x8da   : > { %v6454_v20 = vrot.slane %v6453_v13, 4  ;;  %v6472_v2 = vrot.slane %v12319_v35, 5  ;;  %v6463_v17 = vor.u32 %v6462_v56, %v6461_v9  ;;  %v6476_v37 = vrot.slane %v12345_v60, 4 }
 0x8db   : > { %v6459_v57 = vrot.slane %v6458_v39, 4  ;;  %v6477_v40 = vrot.slane %v12348_v3, 5  ;;  %v6468_v51 = vor.u32 %v6467_v16, %v6466_v4  ;;  %v6481_v8 = vrot.slane %v12272_v30, 4  ;;  %8263 = vmatmul.mubr.msk.bf16.vlgmr.msra.gmra.mrb[24].mxu0 %vm1429_vm13, %v12269_v10 }
 0x8dc   : > { %v12465_v24 = vsel %vm10869_vm5, %v6454_v20, %v13198_v14  ;;  %v6473_v5 = vor.u32 %v6472_v2, %v6471_v21  ;;  %v6464_v58 = vrot.slane %v6463_v17, 4  ;;  %v6482_v23 = vrot.slane %v12275_v27, 5  ;;  %6245 = vmatpush1.bf16.msra.mxu0 %v9517_v1  ;;  %6136 = vmatprep.mubr.bf16.mxu0 %v13225_v28 }
 0x8dd   : > { %v12476_v19 = vsel %vm10869_vm5, %v6459_v57, %v13198_v14  ;;  %v6478_v29 = vor.u32 %v6477_v40, %v6476_v37  ;;  %v6486_v0 = vrot.slane %v12322_v12, 4  ;;  %v6469_v61 = vrot.slane %v6468_v51, 4  ;;  %6362 = vmatprep.subr.bf16.mxu0 %v9522_v41  ;;  %v13264_v41 = vld [vmem:[#allocation55_spill] sm:$0xff]  ;;  %v13265_v37 = vld [vmem:[#allocation62_spill] sm:$0xff] }
 0x8de   : > { %v8301_v42 = vcombine.low %v12465_v24, %v12476_v19  ;;  %v6474_v13 = vrot.slane %v6473_v5, 4  ;;  %v6487_v50 = vrot.slane %v12327_v11, 5  ;;  %v13262_v25 = vrot.slane %v12114_v6, 9  ;;  %v9529_v24 = vld [vmem:[%s12924_s17 + $0x60] ss:$8 sps:$4 sm:$0xff]  }
 0x8df   : > { %v12499_v10 = vsel %vm10869_vm5, %v6464_v58, %v13198_v14  ;;  %v6479_v44 = vrot.slane %v6478_v29, 4  ;;  %v6483_v39 = vor.u32 %v6482_v23, %v6481_v8  ;;  %v13263_v22 = vrot.slane %v12204_v48, 9  ;;  %v13266_v8 = vld [vmem:[#allocation32_spill] sm:$0xff]  ;;  %v13267_v58 = vld [vmem:[#allocation27_spill] sm:$0xff] }
 0x8e0   : > { %v12494_v36 = vsel %vm10902_vm6, %v13262_v25, %v13202_v54  ;;  %v12511_v6 = vsel %vm10869_vm5, %v6469_v61, %v13198_v14  ;;  %v12516_v9 = vsel %vm10869_vm5, %v6474_v13, %v13198_v14  ;;  %v6488_v57 = vor.u32 %v6487_v50, %v6486_v0  ;;  %v13268_v13 = vld [vmem:[#allocation56_spill] sm:$0xff] }
 0x8e1   : > { %v12506_v20 = vsel %vm10902_vm6, %v13263_v22, %v13202_v54  ;;  %v8302_v48 = vcombine.low %v12499_v10, %v12511_v6  ;;  %v12525_v4 = vsel %vm10869_vm5, %v6479_v44, %v13198_v14  ;;  %v6484_v1 = vrot.slane %v6483_v39, 4  ;;  %v7386_v6 = vld [vmem:[%s13314_s22] sm:$0x3] }
 0x8e2   : > { %v8321_v56 = vcombine.low %v12494_v36, %v12506_v20  ;;  %v8313_v16 = vrot.slane %v12103_v45, 9  ;;  %v8303_v21 = vcombine.low %v12516_v9, %v12525_v4  ;;  %v6489_v2 = vrot.slane %v6488_v57, 4  ;;  %v13315_v9 = vld [vmem:[#allocation47_spill] sm:$0xff] }
 0x8e3   : > { %v8314_v17 = vrot.slane %v13264_v41, 9  ;;  %v8315_v40 = vrot.slane %v13265_v37, 9  ;;  %v12535_v51 = vsel %vm10869_vm5, %v6484_v1, %v13198_v14  ;;  %v8316_v45 = vrot.slane %v13266_v8, 9  ;;  %8264 = vmatmul.mubr.msk.bf16.gmra.mrb[28].mxu0 %vm1429_vm13, %v12382_v53 }
 0x8e4   : > { %v12540_v5 = vsel %vm10902_vm6, %v8313_v16, %v13202_v54  ;;  %v8317_v29 = vrot.slane %v13267_v58, 9  ;;  %v12547_v23 = vsel %vm10869_vm5, %v6489_v2, %v13198_v14  ;;  %v8318_v50 = vrot.slane %v13268_v13, 9  ;;  %6146 = vmatprep.mubr.bf16.mxu0 %v13225_v28 }
 0x8e5   : > { %v12552_v0 = vsel %vm10902_vm6, %v8314_v17, %v13202_v54  ;;  %v12557_v61 = vsel %vm10902_vm6, %v8315_v40, %v13202_v54  ;;  %v8304_v31 = vcombine.low %v12535_v51, %v12547_v23  ;;  %v12569_v25 = vsel %vm10902_vm6, %v8316_v45, %v13202_v54 }
 0x8e6   : > { %v8322_v14 = vcombine.low %v12540_v5, %v12552_v0  ;;  %v12574_v44 = vsel %vm10902_vm6, %v8317_v29, %v13202_v54  ;;  %v8323_v53 = vcombine.low %v12557_v61, %v12569_v25  ;;  %v12582_v39 = vsel %vm10902_vm6, %v8318_v50, %v13202_v54  ;;  %v13273_v29 = vld [vmem:[#allocation54_spill] sm:$0xff] }
 0x8e7   : > { %v13269_v22 = vrot.slane %v12131_v63, 5  ;;  %v13270_v57 = vrot.slane %v12140_v52, 6  ;;  %v13271_v16 = vrot.slane %v12211_v33, 5  ;;  %v13272_v2 = vrot.slane %v12214_v18, 6 }
 0x8e8   : > { %v6777_v37 = vrot.slane %v12124_v43, 5  ;;  %v6778_v40 = vrot.slane %v12127_v15, 6  ;;  %v6782_v54 = vrot.slane %v12188_v47, 5  ;;  %v6783_v63 = vrot.slane %v12191_v62, 6 }
 0x8e9   : > { %v6769_v1 = vor.u32 %v13270_v57, %v13269_v22  ;;  %v6774_v41 = vor.u32 %v13272_v2, %v13271_v16  ;;  %v6787_v52 = vrot.slane %v12316_v7, 5  ;;  %v6788_v33 = vrot.slane %v12319_v35, 6  ;;  %v13275_v16 = vld [vmem:[#allocation46_spill] sm:$0xff] }
 0x8ea   : > { %v6779_v45 = vor.u32 %v6778_v40, %v6777_v37  ;;  %v6792_v18 = vrot.slane %v12345_v60, 5  ;;  %v6793_v58 = vrot.slane %v12348_v3, 6  ;;  %v6784_v47 = vor.u32 %v6783_v63, %v6782_v54  ;;  %v13276_v2 = vld [vmem:[#allocation58_spill] sm:$0xff]  ;;  %v13277_v37 = vld [vmem:[#allocation51_spill] sm:$0xff] }
 0x8eb   : > { %v6770_v38 = vrot.slane %v6769_v1, 4  ;;  %v6775_v8 = vrot.slane %v6774_v41, 4  ;;  %v6797_v62 = vrot.slane %v12272_v30, 5  ;;  %v6789_v60 = vor.u32 %v6788_v33, %v6787_v52  ;;  %v13278_v40 = vld [vmem:[#allocation66_spill] sm:$0xff]  ;;  %8265 = vmatmul.mubr.msk.bf16.gmra.mrb[32].mxu0 %vm1429_vm13, %v12403_v32 }
 0x8ec   : > { %v6780_v35 = vrot.slane %v6779_v45, 4  ;;  %v6794_v50 = vor.u32 %v6793_v58, %v6792_v18  ;;  %v6785_v3 = vrot.slane %v6784_v47, 4  ;;  %v6798_v22 = vrot.slane %v12275_v27, 6  ;;  %v9532_v30 = vld [vmem:[#allocation18] ss:$8 sps:$4 sm:$0xff]   ;;  %6156 = vmatprep.mubr.bf16.mxu0 %v13225_v28  ;;  %v13279_v45 = vld [vmem:[#allocation33_spill] sm:$0xff] }
 0x8ed   : > { %v12605_v43 = vsel %vm11012_vm9, %v6770_v38, %v13273_v29  ;;  %v12610_v15 = vsel %vm11012_vm9, %v6775_v8, %v13273_v29  ;;  %v6802_v57 = vrot.slane %v12322_v12, 5  ;;  %v6803_v1 = vrot.slane %v12327_v11, 6  ;;  %v9534_v38 = vld [vmem:[#allocation18 + $0x4] ss:$8 sps:$4 sm:$0xff]  }
 0x8ee   : > { %v7215_v41 = vadd.f32 %v13276_v2, %v13275_v16  ;;  %v7217_v54 = vadd.f32 %v13278_v40, %v13277_v37  ;;  %v6790_v8 = vrot.slane %v6789_v60, 4  ;;  %v6795_v63 = vrot.slane %v6794_v50, 4  ;;  %7442 = vmatprep.subr.bf16.mxu1 %v9534_v38  ;;  %v13280_v47 = vld [vmem:[#allocation34_spill] sm:$0xff]  ;;  %v9537_v40 = vld [vmem:[#allocation18 + $0x14] ss:$8 sps:$4 sm:$0xff]  }
 0x8ef   : > { %v12628_v27 = vsel %vm11012_vm9, %v6780_v35, %v13273_v29  ;;  %v12633_v12 = vsel %vm11012_vm9, %v6785_v3, %v13273_v29  ;;  %v6799_v11 = vor.u32 %v6798_v22, %v6797_v62  ;;  %v6804_v52 = vor.u32 %v6803_v1, %v6802_v57  ;;  %7443 = vmatpush1.bf16.msra.mxu1 %v9532_v30 }
 0x8f0   : > { %v8460_v32 = vpack.c.bf16 %v13279_v45, %v13279_v45  ;;  %v12642_v18 = vsel %vm11012_vm9, %v6790_v8, %v13273_v29  ;;  %v12647_v58 = vsel %vm11012_vm9, %v6795_v63, %v13273_v29  ;;  %v8462_v62 = vpack.c.bf16 %v13280_v47, %v13280_v47  ;;  %7444 = vmatprep.subr.bf16.mxu1 %v9537_v40  ;;  %v9520_v45 = vld [vmem:[%s12924_s17 + $0x30] ss:$8 sps:$4 sm:$0xff]  }
 0x8f1   : > { %v6800_v60 = vrot.slane %v6799_v11, 4  ;;  %v6805_v50 = vrot.slane %v6804_v52, 4  ;;  %v8461_v3 = vpack.c.bf16 %v7215_v41, %v7215_v41  ;;  %v8463_v22 = vpack.c.bf16 %v7217_v54, %v7217_v54  ;;  %v9535_v41 = vld [vmem:[#allocation18 + $0x10] ss:$8 sps:$4 sm:$0xff]   ;;  %v13283_v40 = vld [vmem:[#allocation30_spill] sm:$0xff] }
 0x8f2   : > { %v7279_v16 = vshrl.u32 %v8460_v32, 16  ;;  %v7292_v37 = vshrl.u32 %v8462_v62, 16  ;;  %v9525_v32 = vld [vmem:[%s12924_s17 + $0x44] ss:$8 sps:$4 sm:$0xff]   ;;  %v13309_v19 = vcombine.low %v12574_v44, %v12582_v39  ;;  %v13311_v36 = vcombine.low %v12628_v27, %v12633_v12 }
 0x8f3   : > { %v12656_v57 = vsel %vm11012_vm9, %v6800_v60, %v13273_v29  ;;  %v12661_v1 = vsel %vm11012_vm9, %v6805_v50, %v13273_v29  ;;  %8266 = vmatmul.mubr.msk.bf16.gmra.mrb[36].mxu0 %vm1429_vm13, %v12418_v46  ;;  %v7284_v54 = vshrl.u32 %v8461_v3, 16  ;;  %v7287_v30 = vshll.u32 %v8461_v3, 16  ;;  %7445 = vmatpush1.bf16.msra.mxu1 %v9535_v41  ;;  %v13281_v50 = vld [vmem:[#allocation31_spill] sm:$0xff] }
 0x8f4   : > { %6276 = vmatprep.mubr.bf16.mxu0 %v13225_v28  ;;  %v7297_v38 = vshrl.u32 %v8463_v22, 16  ;;  %v7300_v8 = vshll.u32 %v8463_v22, 16  ;;  %v8375_v63 = vrot.slane %v7279_v16, 11  ;;  %v8376_v13 = vrot.slane %v7292_v37, 11  ;;  %v13282_v22 = vld [vmem:[#allocation36_spill] sm:$0xff] }
 0x8f5   : > { %v7286_v29 = vrot.slane %v7284_v54, 7  ;;  %v7149_v3 = vrot.slane %v13281_v50, 1  ;;  %v7150_v16 = vrot.slane %v13282_v22, 1  ;;  %v7186_v37 = vrot.slane %v13281_v50, 2 }
 0x8f6   : > { %v7299_v11 = vrot.slane %v7297_v38, 7  ;;  %v7188_v41 = vrot.slane %v13282_v22, 2  ;;  %v13312_v10 = vcombine.low %v12642_v18, %v12647_v58  ;;  %v13313_v20 = vcombine.low %v12656_v57, %v12661_v1 }
 0x8f7   : > { %v7289_v52 = vor.u32 %v7287_v30, %v7286_v29  ;;  %v7167_v54 = vadd.f32 %v7149_v3, %v13283_v40  ;;  %v7168_v30 = vadd.f32 %v7149_v3, %v13281_v50  ;;  %v13288_v3 = vld [vmem:[#allocation42_spill] sm:$0xff] }
 0x8f8   : > { %v7302_v46 = vor.u32 %v7300_v8, %v7299_v11  ;;  %v7170_v8 = vadd.f32 %v7150_v16, %v13282_v22 }
 0x8f9   : > { %v7290_v47 = vsel %vm10541_vm11, %v8375_v63, %v7289_v52  ;;  %v13285_v63 = vld [vmem:[#allocation39_spill] sm:$0xff]  ;;  %v7218_v11 = vadd.f32 %v7186_v37, %v7167_v54  ;;  %v13289_v54 = vld [vmem:[#allocation38_spill] sm:$0xff] }
 0x8fa   : > { %v7303_v62 = vsel %vm10541_vm11, %v8376_v13, %v7302_v46  ;;  %v7187_v29 = vsel %vm7180_vm14, %v7186_v37, %v13285_v63  ;;  %v7189_v13 = vsel %vm7180_vm14, %v7188_v41, %v13285_v63 }
 0x8fb   : > { %8283 = vmatmul.mubr.msk.bf16.vlgmr.msra.gmra.mrb[24].mxu0 %vm1429_vm13, %v12400_v49  ;;  %v8383_v60 = vcombine.low %v7290_v47, %v7303_v62  ;;  %v13284_v49 = vld [vmem:[#allocation35_spill] sm:$0xff]  ;;  %v7219_v52 = vadd.f32 %v7187_v29, %v7168_v30  ;;  %v7221_v46 = vadd.f32 %v7189_v13, %v7170_v8  ;;  %v7151_v30 = vrot.slane %v13289_v54, 1 }
 0x8fc   : > { %6363 = vmatpush1.bf16.msra.mxu0 %v9520_v45  ;;  %6286 = vmatprep.mubr.bf16.mxu0 %v13225_v28  ;;  %v7169_v38 = vadd.f32 %v7150_v16, %v13284_v49 }
 0x8fd   : > { %6528 = vmatprep.subr.bf16.mxu0 %v9525_v32  ;;  %8391 = vmatmul.mubr.msk.bf16.vlgmr.msra.gmra.mrb[72].mxu1 %vm870_vm1, %v8383_v60  ;;  %v8464_v32 = vpack.c.bf16 %v7218_v11, %v7218_v11  ;;  %v8465_v47 = vpack.c.bf16 %v7219_v52, %v7219_v52  ;;  %v13286_v60 = vld [vmem:[#allocation26_spill] sm:$0xff]  ;;  %v8467_v49 = vpack.c.bf16 %v7221_v46, %v7221_v46  ;;  %v7190_v52 = vrot.slane %v13289_v54, 2  ;;  %v13291_v46 = vld [vmem:[#allocation37_spill] sm:$0xff] }
 0x8fe   : > { %7484 = vmatprep.mubr.bf16.mxu1 %v13225_v28  ;;  %v7220_v45 = vadd.f32 %v7188_v41, %v7169_v38  ;;  %v13287_v50 = vunpack.c.h.bf16 %v13286_v60  ;;  %v13290_v38 = vld [vmem:[#allocation43_spill] sm:$0xff]  ;;  %v13293_v7 = vunpack.c.l.bf16 %v13286_v60 }
 0x8ff   : > { %v7305_v22 = vshrl.u32 %v8464_v32, 16  ;;  %v7310_v16 = vshrl.u32 %v8465_v47, 16  ;;  %v7313_v2 = vshll.u32 %v8465_v47, 16  ;;  %v7323_v37 = vshrl.u32 %v8467_v49, 16  ;;  %v13292_v47 = vld [vmem:[#allocation41_spill] sm:$0xff] }
 0x900   : > { %v8466_v62 = vpack.c.bf16 %v7220_v45, %v7220_v45  ;;  %v12698_v40 = vadd.f32 %v13288_v3, %v13287_v50  ;;  %v7326_v41 = vshll.u32 %v8467_v49, 16  ;;  %v7152_v8 = vrot.slane %v13290_v38, 1 }
 0x901   : > { %v8377_v29 = vrot.slane %v7305_v22, 11  ;;  %v7312_v13 = vrot.slane %v7310_v16, 7  ;;  %v7325_v45 = vrot.slane %v7323_v37, 7  ;;  %v7172_v32 = vadd.f32 %v7151_v30, %v13289_v54  ;;  %v13294_v37 = vld [vmem:[#allocation40_spill] sm:$0xff] }
 0x902   : > { %v7318_v35 = vshrl.u32 %v8466_v62, 16  ;;  %v7173_v62 = vadd.f32 %v7152_v8, %v13292_v47  ;;  %v7174_v3 = vadd.f32 %v7152_v8, %v13290_v38  ;;  %v7191_v49 = vsel %vm7180_vm14, %v7190_v52, %v13285_v63  ;;  %v13296_v47 = vld [vmem:[#allocation44_spill] sm:$0xff] }
 0x903   : > { %8284 = vmatmul.mubr.msk.bf16.gmra.mrb[28].mxu0 %vm1429_vm13, %v12437_v26  ;;  %v7171_v26 = vadd.f32 %v7151_v30, %v13291_v46  ;;  %v7315_v50 = vor.u32 %v7313_v2, %v7312_v13  ;;  %v7192_v33 = vrot.slane %v13290_v38, 2  ;;  %v7328_v22 = vor.u32 %v7326_v41, %v7325_v45 }
 0x904   : > { %6296 = vmatprep.mubr.bf16.mxu0 %v13225_v28  ;;  %v8378_v11 = vrot.slane %v7318_v35, 11  ;;  %v7223_v35 = vadd.f32 %v7191_v49, %v7172_v32  ;;  %v7137_v17 = vadd.f32 %v13294_v37, %v13293_v7  ;;  %v7154_v45 = vrot.slane %v12698_v40, 1 }
 0x905   : > { %v7222_v16 = vadd.f32 %v7190_v52, %v7171_v26  ;;  %v7316_v54 = vsel %vm10541_vm11, %v8377_v29, %v7315_v50  ;;  %v7193_v2 = vsel %vm7180_vm14, %v7192_v33, %v13285_v63  ;;  %v7224_v30 = vadd.f32 %v7192_v33, %v7173_v62  ;;  %v13295_v52 = vld [vmem:[#allocation45_spill] sm:$0xff] }
 0x906   : > { %v7329_v8 = vsel %vm10541_vm11, %v8378_v11, %v7328_v22  ;;  %v7225_v13 = vadd.f32 %v7193_v2, %v7174_v3  ;;  %v8469_v38 = vpack.c.bf16 %v7223_v35, %v7223_v35  ;;  %v7153_v7 = vrot.slane %v13295_v52, 1 }
 0x907   : > { %v8468_v46 = vpack.c.bf16 %v7222_v16, %v7222_v16  ;;  %v8384_v41 = vcombine.low %v7316_v54, %v7329_v8  ;;  %v8470_v60 = vpack.c.bf16 %v7224_v30, %v7224_v30  ;;  %v7178_v35 = vadd.f32 %v7154_v45, %v12698_v40 }
 0x908   : > { %v8471_v29 = vpack.c.bf16 %v7225_v13, %v7225_v13  ;;  %v7336_v33 = vshrl.u32 %v8469_v38, 16  ;;  %v7339_v32 = vshll.u32 %v8469_v38, 16  ;;  %v7175_v62 = vadd.f32 %v7153_v7, %v13296_v47 }
 0x909   : > { %v7331_v26 = vshrl.u32 %v8468_v46, 16  ;;  %8392 = vmatmul.mubr.msk.bf16.gmra.mrb[76].mxu1 %vm870_vm1, %v8384_v41  ;;  %v7344_v11 = vshrl.u32 %v8470_v60, 16  ;;  %v7176_v50 = vadd.f32 %v7153_v7, %v13295_v52  ;;  %v7194_v37 = vrot.slane %v13295_v52, 2 }
 0x90a   : > { %7494 = vmatprep.mubr.bf16.mxu1 %v13225_v28  ;;  %v7338_v49 = vrot.slane %v7336_v33, 7  ;;  %v7349_v22 = vshrl.u32 %v8471_v29, 16  ;;  %v7352_v16 = vshll.u32 %v8471_v29, 16  ;;  %v7196_v54 = vrot.slane %v12698_v40, 2 }
 0x90b   : > { %8285 = vmatmul.mubr.msk.bf16.gmra.mrb[32].mxu0 %vm1429_vm13, %v12449_v55  ;;  %v7177_v55 = vadd.f32 %v7154_v45, %v7137_v17  ;;  %v8379_v3 = vrot.slane %v7331_v26, 11  ;;  %v8380_v30 = vrot.slane %v7344_v11, 11  ;;  %v7195_v13 = vsel %vm7180_vm14, %v7194_v37, %v13285_v63 }
 0x90c   : > { %6306 = vmatprep.mubr.bf16.mxu0 %v13225_v28  ;;  %v7341_v2 = vor.u32 %v7339_v32, %v7338_v49  ;;  %v7351_v8 = vrot.slane %v7349_v22, 7  ;;  %v7197_v17 = vsel %vm7180_vm14, %v7196_v54, %v13285_v63  ;;  %v7226_v46 = vadd.f32 %v7194_v37, %v7175_v62 }
 0x90d   : > { %v7228_v38 = vadd.f32 %v7196_v54, %v7177_v55  ;;  %v7227_v7 = vadd.f32 %v7195_v13, %v7176_v50  ;;  %v7229_v45 = vadd.f32 %v7197_v17, %v7178_v35  ;;  %v9528_v35 = vld [vmem:[%s12924_s17 + $0x54] ss:$8 sps:$4 sm:$0xff]  }
 0x90e   : > { %v7342_v41 = vsel %vm10541_vm11, %v8379_v3, %v7341_v2  ;;  %v7354_v60 = vor.u32 %v7352_v16, %v7351_v8  ;;  %v8472_v40 = vpack.c.bf16 %v7226_v46, %v7226_v46  ;;  %v13297_v2 = vld [vmem:[#allocation63_spill] sm:$0xff] }
 0x90f   : > { %v8474_v52 = vpack.c.bf16 %v7228_v38, %v7228_v38  ;;  %v8473_v26 = vpack.c.bf16 %v7227_v7, %v7227_v7  ;;  %v8475_v63 = vpack.c.bf16 %v7229_v45, %v7229_v45  ;;  %v13300_v38 = vld [vmem:[#allocation64_spill] sm:$0xff]  ;;  %v13303_v7 = vld [vmem:[#allocation59_spill] sm:$0xff]  ;;  %v13304_v45 = vld [vmem:[#allocation65_spill] sm:$0xff] }
 0x910   : > { %v7355_v29 = vsel %vm10541_vm11, %v8380_v30, %v7354_v60  ;;  %v7357_v32 = vshrl.u32 %v8472_v40, 16  ;;  %v13298_v30 = vld [vmem:[#allocation61_spill] sm:$0xff]  ;;  %v13305_v40 = vcombine.high %v13303_v7, %v13304_v45 }
 0x911   : > { %v8385_v33 = vcombine.low %v7342_v41, %v7355_v29  ;;  %v7370_v11 = vshrl.u32 %v8474_v52, 16  ;;  %v7362_v47 = vshrl.u32 %v8473_v26, 16  ;;  %v7365_v62 = vshll.u32 %v8473_v26, 16  ;;  %v13301_v41 = vld [vmem:[#allocation52_spill] sm:$0xff]  ;;  %v13307_v52 = vld [vmem:[#allocation53_spill] sm:$0xff] }
 0x912   : > { %v7375_v55 = vshrl.u32 %v8475_v63, 16  ;;  %v7378_v50 = vshll.u32 %v8475_v63, 16  ;;  %v8381_v3 = vrot.slane %v7357_v32, 11  ;;  %v13299_v8 = vcombine.high %v13297_v2, %v13298_v30  ;;  %v9526_v26 = vld [vmem:[%s12924_s17 + $0x50] ss:$8 sps:$4 sm:$0xff]  }
 0x913   : > { %8286 = vmatmul.mubr.msk.bf16.gmra.mrb[36].mxu0 %vm1429_vm13, %v12455_v34  ;;  %8393 = vmatmul.mubr.msk.bf16.gmra.mrb[80].mxu1 %vm870_vm1, %v8385_v33  ;;  %v9523_v34 = vld [vmem:[%s12924_s17 + $0x40] ss:$8 sps:$4 sm:$0xff]   ;;  %v7364_v49 = vrot.slane %v7362_v47, 7  ;;  %v8382_v22 = vrot.slane %v7370_v11, 11  ;;  %v13302_v60 = vcombine.high %v13300_v38, %v13301_v41  ;;  %v13308_v29 = vcombine.high %v13306_v59, %v13307_v52  ;;  %v9531_v63 = vld [vmem:[%s12924_s17 + $0x64] ss:$8 sps:$4 sm:$0xff]  }
 0x914   : > { %6394 = vmatprep.mubr.bf16.mxu0 %v13225_v28  ;;  %7504 = vmatprep.mubr.bf16.mxu1 %v13225_v28  ;;  %v7377_v16 = vrot.slane %v7375_v55, 7 }
 0x915   : > { %v7367_v37 = vor.u32 %v7365_v62, %v7364_v49 }
 0x916   : > { %v7380_v54 = vor.u32 %v7378_v50, %v7377_v16 }
 0x917   : > { %v7368_v13 = vsel %vm10541_vm11, %v8381_v3, %v7367_v37 }
 0x918   : > { %v7381_v17 = vsel %vm10541_vm11, %v8382_v22, %v7380_v54 }
 0x919   : > { %v8386_v46 = vcombine.low %v7368_v13, %v7381_v17 }
 0x91b   : > { %8295 = vmatmul.mubr.msk.bf16.vlgmr.msra.gmra.mrb[24].mxu0 %vm1429_vm13, %v13299_v8  ;;  %8394 = vmatmul.mubr.msk.bf16.gmra.mrb[84].mxu1 %vm870_vm1, %v8386_v46 }
 0x91c   : > { %6529 = vmatpush1.bf16.msra.mxu0 %v9523_v34  ;;  %6404 = vmatprep.mubr.bf16.mxu0 %v13225_v28 }
 0x91d   : > { %6678 = vmatprep.subr.bf16.mxu0 %v9528_v35 }
 0x923   : > { %8296 = vmatmul.mubr.msk.bf16.gmra.mrb[28].mxu0 %vm1429_vm13, %v13302_v60 }
 0x924   : > { %6414 = vmatprep.mubr.bf16.mxu0 %v13225_v28 }
 0x92b   : > { %8297 = vmatmul.mubr.msk.bf16.gmra.mrb[32].mxu0 %vm1429_vm13, %v13305_v40 }
 0x92c   : > { %6424 = vmatprep.mubr.bf16.mxu0 %v13225_v28 }
 0x933   : > { %8298 = vmatmul.mubr.msk.bf16.gmra.mrb[36].mxu0 %vm1429_vm13, %v13308_v29 }
 0x934   : > { %6560 = vmatprep.mubr.bf16.mxu0 %v13225_v28 }
 0x93b   : > { %8307 = vmatmul.mubr.msk.bf16.vlgmr.msra.gmra.mrb[24].mxu0 %vm1429_vm13, %v8301_v42  ;;  %v13310_v42 = vcombine.low %v12605_v43, %v12610_v15 }
 0x93c   : > { %6679 = vmatpush1.bf16.msra.mxu0 %v9526_v26  ;;  %6570 = vmatprep.mubr.bf16.mxu0 %v13225_v28 }
 0x93d   : > { %6844 = vmatprep.subr.bf16.mxu0 %v9531_v63 }
 0x943   : > { %8308 = vmatmul.mubr.msk.bf16.gmra.mrb[28].mxu0 %vm1429_vm13, %v8302_v48  ;;  %v13316_v48 = vld [vmem:[#allocation48_spill] sm:$0xff] }
 0x944   : > { %6580 = vmatprep.mubr.bf16.mxu0 %v13225_v28  ;;  %v7395_v4 = vrot.slane %v7386_v6, %v13316_v48 }
 0x94b   : > { %8309 = vmatmul.mubr.msk.bf16.gmra.mrb[32].mxu0 %vm1429_vm13, %v8303_v21 }
 0x94c   : > { %6590 = vmatprep.mubr.bf16.mxu0 %v13225_v28 }
 0x953   : > { %8310 = vmatmul.mubr.msk.bf16.gmra.mrb[36].mxu0 %vm1429_vm13, %v8304_v31 }
 0x954   : > { %6710 = vmatprep.mubr.bf16.mxu0 %v13225_v28 }
 0x95b   : > { %8327 = vmatmul.mubr.msk.bf16.vlgmr.msra.gmra.mrb[24].mxu0 %vm1429_vm13, %v8321_v56  ;;  %v7391_v56 = vrot.slane %v7386_v6, %v13315_v9 }
 0x95c   : > { %6845 = vmatpush1.bf16.msra.mxu0 %v9529_v24  ;;  %6720 = vmatprep.mubr.bf16.mxu0 %v13225_v28 }
 0x963   : > { %8328 = vmatmul.mubr.msk.bf16.gmra.mrb[28].mxu0 %vm1429_vm13, %v8322_v14 }
 0x964   : > { %6730 = vmatprep.mubr.bf16.mxu0 %v13225_v28 }
 0x96b   : > { %8329 = vmatmul.mubr.msk.bf16.gmra.mrb[32].mxu0 %vm1429_vm13, %v8323_v53 }
 0x96c   : > { %6740 = vmatprep.mubr.bf16.mxu0 %v13225_v28 }
 0x973   : > { %8330 = vmatmul.mubr.msk.bf16.gmra.mrb[36].mxu0 %vm1429_vm13, %v13309_v19 }
 0x974   : > { %6876 = vmatprep.mubr.bf16.mxu0 %v13225_v28 }
 0x97b   : > { %8339 = vmatmul.mubr.msk.bf16.vlgmr.msra.gmra.mrb[24].mxu0 %vm1429_vm13, %v13310_v42 }
 0x97c   : > { %6886 = vmatprep.mubr.bf16.mxu0 %v13225_v28 }
 0x983   : > { %8340 = vmatmul.mubr.msk.bf16.gmra.mrb[28].mxu0 %vm1429_vm13, %v13311_v36 }
 0x984   : > { %6896 = vmatprep.mubr.bf16.mxu0 %v13225_v28 }
 0x98b   : > { %8341 = vmatmul.mubr.msk.bf16.gmra.mrb[32].mxu0 %vm1429_vm13, %v13312_v10  ;;  %v6933_v10 = vld [vmem:[%s13318_s20] sm:$0x3] }
 0x98c   : > { %6906 = vmatprep.mubr.bf16.mxu0 %v13225_v28  ;;  %v6942_v6 = vrot.slane %v6933_v10, %v13316_v48 }
 0x993   : > { %8342 = vmatmul.mubr.msk.bf16.gmra.mrb[36].mxu0 %vm1429_vm13, %v13313_v20  ;;  %v6938_v20 = vrot.slane %v6933_v10, %v13315_v9 }
 0x9d0   : > { %v7476_v21 = vpop.f32.mrb[72].mxu1 }
 0x9d1   : > { %v7477_v51 = vadd.f32 %v7476_v21, %v7391_v56  ;;  %v7478_v5 = vpop.f32.mrb[73].mxu1 }
 0x9d2   : > { %v7479_v23 = vadd.f32 %v7478_v5, %v7395_v4  ;;  %v7480_v28 = vpop.f32.mrb[74].mxu1 }
 0x9d3   : > { %v7515_v0 = vmax.f32 %v7477_v51, 0.0  ;;  %v7481_v61 = vadd.f32 %v7480_v28, %v7391_v56  ;;  %v7482_v25 = vpop.f32.mrb[75].mxu1 }
 0x9d4   : > { %v7516_v31 = vmax.f32 %v7479_v23, 0.0  ;;  %v7483_v53 = vadd.f32 %v7482_v25, %v7395_v4 }
 0x9d5   : > { %v7517_v44 = vmax.f32 %v7481_v61, 0.0 }
 0x9d6   : > { %v8476_v14 = vpack.c.bf16 %v7516_v31, %v7515_v0  ;;  %v7518_v43 = vmax.f32 %v7483_v53, 0.0 }
 0x9d8   : > { %8403 = vst.msk [vmem:[%s10426_s5 + $0xc0] sm:$0xff] %vm10429_vm3, %v8476_v14  ;;  %v8477_v15 = vpack.c.bf16 %v7518_v43, %v7517_v44 }
 0x9da   : > { %8404 = vst.msk [vmem:[%s10426_s5 + $0xc8] sm:$0xff] %vm10429_vm3, %v8477_v15 }
 0x9dc   : > { %v7486_v27 = vpop.f32.mrb[76].mxu1 }
 0x9dd   : > { %v7487_v12 = vadd.f32 %v7486_v27, %v7391_v56  ;;  %v7488_v18 = vpop.f32.mrb[77].mxu1 }
 0x9de   : > { %v7489_v58 = vadd.f32 %v7488_v18, %v7395_v4  ;;  %v7490_v57 = vpop.f32.mrb[78].mxu1 }
 0x9df   : > { %v7519_v1 = vmax.f32 %v7487_v12, 0.0  ;;  %v7491_v33 = vadd.f32 %v7490_v57, %v7391_v56  ;;  %v7492_v32 = vpop.f32.mrb[79].mxu1 }
 0x9e0   : > { %v7520_v11 = vmax.f32 %v7489_v58, 0.0  ;;  %v7493_v47 = vadd.f32 %v7492_v32, %v7395_v4 }
 0x9e1   : > { %v7521_v62 = vmax.f32 %v7491_v33, 0.0 }
 0x9e2   : > { %v8478_v55 = vpack.c.bf16 %v7520_v11, %v7519_v1  ;;  %v7522_v50 = vmax.f32 %v7493_v47, 0.0 }
 0x9e4   : > { %8405 = vst.msk [vmem:[%s10426_s5 + $0xd0] sm:$0xff] %vm10429_vm3, %v8478_v55  ;;  %v8479_v34 = vpack.c.bf16 %v7522_v50, %v7521_v62 }
 0x9e6   : > { %8406 = vst.msk [vmem:[%s10426_s5 + $0xd8] sm:$0xff] %vm10429_vm3, %v8479_v34  ;;  %v7496_v3 = vpop.f32.mrb[80].mxu1 }
 0x9e7   : > { %v7497_v49 = vadd.f32 %v7496_v3, %v7391_v56  ;;  %v7498_v22 = vpop.f32.mrb[81].mxu1 }
 0x9e8   : > { %v7499_v16 = vadd.f32 %v7498_v22, %v7395_v4  ;;  %v7500_v35 = vpop.f32.mrb[82].mxu1 }
 0x9e9   : > { %v7523_v37 = vmax.f32 %v7497_v49, 0.0  ;;  %v7501_v54 = vadd.f32 %v7500_v35, %v7391_v56  ;;  %v7502_v2 = vpop.f32.mrb[83].mxu1 }
 0x9ea   : > { %v7524_v30 = vmax.f32 %v7499_v16, 0.0  ;;  %v7503_v8 = vadd.f32 %v7502_v2, %v7395_v4 }
 0x9eb   : > { %v7525_v13 = vmax.f32 %v7501_v54, 0.0 }
 0x9ec   : > { %v8480_v17 = vpack.c.bf16 %v7524_v30, %v7523_v37  ;;  %v7526_v46 = vmax.f32 %v7503_v8, 0.0 }
 0x9ee   : > { %8407 = vst.msk [vmem:[%s10426_s5 + $0xe0] sm:$0xff] %vm10429_vm3, %v8480_v17  ;;  %v8481_v38 = vpack.c.bf16 %v7526_v46, %v7525_v13  ;;  %v7506_v41 = vpop.f32.mrb[84].mxu1 }
 0x9ef   : > { %v7507_v60 = vadd.f32 %v7506_v41, %v7391_v56  ;;  %v7508_v7 = vpop.f32.mrb[85].mxu1 }
 0x9f0   : > { %8408 = vst.msk [vmem:[%s10426_s5 + $0xe8] sm:$0xff] %vm10429_vm3, %v8481_v38  ;;  %v7509_v45 = vadd.f32 %v7508_v7, %v7395_v4  ;;  %v7510_v40 = vpop.f32.mrb[86].mxu1 }
 0x9f1   : > { %v7527_v59 = vmax.f32 %v7507_v60, 0.0  ;;  %v7511_v52 = vadd.f32 %v7510_v40, %v7391_v56  ;;  %v7512_v29 = vpop.f32.mrb[87].mxu1 }
 0x9f2   : > { %v7528_v26 = vmax.f32 %v7509_v45, 0.0  ;;  %v7513_v63 = vadd.f32 %v7512_v29, %v7395_v4 }
 0x9f3   : > { %v7529_v24 = vmax.f32 %v7511_v52, 0.0 }
 0x9f4   : > { %v8482_v19 = vpack.c.bf16 %v7528_v26, %v7527_v59  ;;  %v7530_v42 = vmax.f32 %v7513_v63, 0.0 }
 0x9f6   : > { %8409 = vst.msk [vmem:[%s10426_s5 + $0xf0] sm:$0xff] %vm10429_vm3, %v8482_v19  ;;  %v8483_v36 = vpack.c.bf16 %v7530_v42, %v7529_v24 }
 0x9f8   : > { %8410 = vst.msk [vmem:[%s10426_s5 + $0xf8] sm:$0xff] %vm10429_vm3, %v8483_v36 }
 0xa4e   : > { %v6878_v56 = vpop.f32.mrb[24].mxu0 }
 0xa4f   : > { %v6945_v4 = vadd.f32 %v6938_v20, %v6878_v56  ;;  %v6880_v21 = vpop.f32.mrb[25].mxu0 }
 0xa50   : > { %v6946_v51 = vadd.f32 %v6942_v6, %v6880_v21  ;;  %v6882_v5 = vpop.f32.mrb[26].mxu0 }
 0xa51   : > { %v6961_v23 = vmax.f32 %v6945_v4, 0.0  ;;  %v6947_v28 = vadd.f32 %v6938_v20, %v6882_v5  ;;  %v6884_v0 = vpop.f32.mrb[27].mxu0 }
 0xa52   : > { %v6962_v61 = vmax.f32 %v6946_v51, 0.0  ;;  %v6948_v31 = vadd.f32 %v6942_v6, %v6884_v0 }
 0xa53   : > { %v6963_v14 = vmax.f32 %v6947_v28, 0.0 }
 0xa54   : > { %v8452_v25 = vpack.c.bf16 %v6962_v61, %v6961_v23  ;;  %v6964_v44 = vmax.f32 %v6948_v31, 0.0 }
 0xa56   : > { %8351 = vst.msk [vmem:[%s10426_s5 + $0x80] sm:$0xff] %vm10429_vm3, %v8452_v25  ;;  %v8453_v9 = vpack.c.bf16 %v6964_v44, %v6963_v14  ;;  %v6888_v48 = vpop.f32.mrb[28].mxu0 }
 0xa57   : > { %v6949_v53 = vadd.f32 %v6938_v20, %v6888_v48  ;;  %v6890_v43 = vpop.f32.mrb[29].mxu0 }
 0xa58   : > { %8352 = vst.msk [vmem:[%s10426_s5 + $0x88] sm:$0xff] %vm10429_vm3, %v8453_v9  ;;  %v6950_v15 = vadd.f32 %v6942_v6, %v6890_v43  ;;  %v6892_v27 = vpop.f32.mrb[30].mxu0 }
 0xa59   : > { %v6965_v12 = vmax.f32 %v6949_v53, 0.0  ;;  %v6951_v18 = vadd.f32 %v6938_v20, %v6892_v27  ;;  %v6894_v58 = vpop.f32.mrb[31].mxu0 }
 0xa5a   : > { %v6966_v57 = vmax.f32 %v6950_v15, 0.0  ;;  %v6952_v1 = vadd.f32 %v6942_v6, %v6894_v58 }
 0xa5b   : > { %v6967_v33 = vmax.f32 %v6951_v18, 0.0 }
 0xa5c   : > { %v8454_v32 = vpack.c.bf16 %v6966_v57, %v6965_v12  ;;  %v6968_v11 = vmax.f32 %v6952_v1, 0.0 }
 0xa5e   : > { %8353 = vst.msk [vmem:[%s10426_s5 + $0x90] sm:$0xff] %vm10429_vm3, %v8454_v32  ;;  %v8455_v47 = vpack.c.bf16 %v6968_v11, %v6967_v33  ;;  %v6898_v62 = vpop.f32.mrb[32].mxu0 }
 0xa5f   : > { %v6953_v55 = vadd.f32 %v6938_v20, %v6898_v62  ;;  %v6900_v50 = vpop.f32.mrb[33].mxu0 }
 0xa60   : > { %8354 = vst.msk [vmem:[%s10426_s5 + $0x98] sm:$0xff] %vm10429_vm3, %v8455_v47  ;;  %v6954_v34 = vadd.f32 %v6942_v6, %v6900_v50  ;;  %v6902_v3 = vpop.f32.mrb[34].mxu0 }
 0xa61   : > { %v6969_v49 = vmax.f32 %v6953_v55, 0.0  ;;  %v6955_v22 = vadd.f32 %v6938_v20, %v6902_v3  ;;  %v6904_v16 = vpop.f32.mrb[35].mxu0 }
 0xa62   : > { %v6970_v35 = vmax.f32 %v6954_v34, 0.0  ;;  %v6956_v37 = vadd.f32 %v6942_v6, %v6904_v16 }
 0xa63   : > { %v6971_v54 = vmax.f32 %v6955_v22, 0.0 }
 0xa64   : > { %v8456_v2 = vpack.c.bf16 %v6970_v35, %v6969_v49  ;;  %v6972_v30 = vmax.f32 %v6956_v37, 0.0 }
 0xa66   : > { %8355 = vst.msk [vmem:[%s10426_s5 + $0xa0] sm:$0xff] %vm10429_vm3, %v8456_v2  ;;  %v8457_v8 = vpack.c.bf16 %v6972_v30, %v6971_v54  ;;  %v6908_v13 = vpop.f32.mrb[36].mxu0 }
 0xa67   : > { %v6957_v17 = vadd.f32 %v6938_v20, %v6908_v13  ;;  %v6910_v46 = vpop.f32.mrb[37].mxu0 }
 0xa68   : > { %8356 = vst.msk [vmem:[%s10426_s5 + $0xa8] sm:$0xff] %vm10429_vm3, %v8457_v8  ;;  %v6958_v38 = vadd.f32 %v6942_v6, %v6910_v46  ;;  %v6912_v41 = vpop.f32.mrb[38].mxu0 }
 0xa69   : > { %v6973_v60 = vmax.f32 %v6957_v17, 0.0  ;;  %v6959_v7 = vadd.f32 %v6938_v20, %v6912_v41  ;;  %v6914_v45 = vpop.f32.mrb[39].mxu0 }
 0xa6a   : > { %v6974_v40 = vmax.f32 %v6958_v38, 0.0  ;;  %v6960_v59 = vadd.f32 %v6942_v6, %v6914_v45 }
 0xa6b   : > { %v6975_v52 = vmax.f32 %v6959_v7, 0.0 }
 0xa6c   : > { %v8458_v29 = vpack.c.bf16 %v6974_v40, %v6973_v60  ;;  %v6976_v26 = vmax.f32 %v6960_v59, 0.0 }
 0xa6e   : > { %8357 = vst.msk [vmem:[%s10426_s5 + $0xb0] sm:$0xff] %vm10429_vm3, %v8458_v29  ;;  %v8459_v63 = vpack.c.bf16 %v6976_v26, %v6975_v52 }
 0xa70   : > { %8358 = vst.msk [vmem:[%s10426_s5 + $0xb8] sm:$0xff] %vm10429_vm3, %v8459_v63 }
 0xa71 PF: > { %s13319_s15 = sld [smem:[#allocation25_spill]] }
 0xa77   : > { %s37_s2 = sadd.s32 1, %s13319_s15  }
 0xa78   : > { %p34_p2 = scmp.ge.s32.totalorder %s37_s2, 4  }
 0xa7a   :  { %36 = sbr.rel (!%p34_p2) target bundleno = 20 (0x14), region = 218 }
 0xa81   :  { %7625 = vsyncpa [#allocation3], 1 }
 0xa82   :  { %7627 = vsyncpa [#allocation3 + $0x1], 1 }
 0xa83   :  { %7628 = vsyncpa [#allocation5], 1 }
 0xa84   :  { %7629 = vsyncpa [#allocation8], 1 }
 0xa85   :  { %7630 = vsyncpa [#allocation11], 1 }
 0xa86   :  { %7631 = vsyncpa [#allocation14], 1 }
 0xa87   :  { %7632 = vsyncpa [#allocation17], 1 }

</bundles_post_ra>
